<compile_context>
chip_gen: v7x
topology: tpu7x:2x2x1
jax: 0.10.0
libtpu: 0.0.40
codegen_flags: <defaults>
</compile_context>

<pallas_src>
import functools

import jax
import jax.numpy as jnp
from jax.experimental import pallas as pl
from jax.experimental.pallas import tpu as pltpu


def _round_up(x, m):
    return ((x + m - 1) // m) * m


# ----------------------------------------------------------------------------
# Fused Pallas kernel: conv1(+BN1+bias, tap-packed K)+ReLU  ->  conv2(+bias)
# ----------------------------------------------------------------------------
def _cnnblock_kernel(x1_ref, w1_ref, w2_ref, b2_ref, o_ref, mid_ref, *,
                     taps, m_out, store_off, tm):
    """One image per grid step.

    x1_ref:  (1, Mp, K1)   conv1 im2col (9*CIN tap lanes + validity/bias lane), bf16.
                           Wrap-around-column rows and Mp-M pad rows are all-zero.
    w1_ref:  (K1, CP)      conv1 weight matrix, BN1 scale folded, one extra row =
                           fused bias (picked up by the validity lane), bf16.
    w2_ref:  (9, CP, CP)   conv2 HWIO weights per tap, bf16.
    b2_ref:  (1, CP)       conv2 bias, f32.
    o_ref:   (1, m_out, CP) conv2 output over the padded-width grid, f32.
    mid_ref: (Lp, CP)      VMEM scratch: zero-padded conv1 activation flattened
                           over (H+3, W+2); persists across grid steps.
    """
    Mp = x1_ref.shape[1]
    Lp, CP = mid_ref.shape
    store_end = store_off + Mp

    # Zero the halo strips of the padded intermediate.  Done EVERY grid step
    # (not under pl.program_id(0)==0) so it stays correct when the "parallel"
    # batch axis is split across TensorCores, each with its own scratch.
    mid_ref[pl.ds(0, store_off), :] = jnp.zeros((store_off, CP), mid_ref.dtype)
    if Lp > store_end:
        mid_ref[pl.ds(store_end, Lp - store_end), :] = jnp.zeros(
            (Lp - store_end, CP), mid_ref.dtype)

    # --- conv1 + BN1 + bias (via validity lane) + ReLU ----------------------
    # One tap-packed GEMM, register-accumulated per row slab.  All-zero im2col
    # rows (wrap-around columns / padding) give relu(0) = 0, which is exactly
    # the zero halo conv2 expects at the positions they land on.
    w1 = w1_ref[...]
    for start in range(0, Mp, tm):
        size = min(tm, Mp - start)
        acc = jnp.dot(x1_ref[0, pl.ds(start, size), :], w1,
                      preferred_element_type=jnp.float32)
        mid_ref[pl.ds(store_off + start, size), :] = (
            jnp.maximum(acc, 0.0).astype(mid_ref.dtype))

    # --- conv2 + bias --------------------------------------------------------
    # 9 statically shifted reads of the VMEM-resident intermediate; f32 register
    # accumulation (no VMEM accumulator round trips), f32 epilogue, single cast
    # at the store.
    b2 = b2_ref[...]
    for start in range(0, m_out, tm):
        size = min(tm, m_out - start)
        acc = jnp.dot(mid_ref[pl.ds(taps[0] + start, size), :], w2_ref[0],
                      preferred_element_type=jnp.float32)
        for t in range(1, len(taps)):
            acc += jnp.dot(mid_ref[pl.ds(taps[t] + start, size), :], w2_ref[t],
                           preferred_element_type=jnp.float32)
        o_ref[0, pl.ds(start, size), :] = (acc + b2).astype(o_ref.dtype)


def cnnblock_pallas(im2col, w1mat, w2, b2, *, H, W, out_dtype=jnp.float32, tm=128):
    """Runs the fused CNNBlock kernel.  Returns (N, H*(W+2), CP) f32."""
    N, Mp, K1 = im2col.shape
    CP = w2.shape[-1]
    Wp = W + 2
    M = H * Wp                                    # outputs over the padded width
    store_off = Wp + 1
    Lp = _round_up(max((H + 3) * Wp, store_off + Mp), 16)
    taps = tuple(kh * Wp + kw for kh in range(3) for kw in range(3))

    kernel = functools.partial(_cnnblock_kernel, taps=taps, m_out=M,
                               store_off=store_off, tm=tm)

    # Explicit VMEM budget: double-buffered blocks + persistent scratch + margin.
    block_bytes = (Mp * K1 * 2 + K1 * CP * 2 + 9 * CP * CP * 2 + CP * 4
                   + M * CP * 4)
    vmem_bytes = int(2 * block_bytes + Lp * CP * 2 + (8 << 20))

    return pl.pallas_call(
        kernel,
        out_shape=jax.ShapeDtypeStruct((N, M, CP), out_dtype),
        grid_spec=pltpu.PrefetchScalarGridSpec(
            num_scalar_prefetch=0,
            grid=(N,),
            in_specs=[
                pl.BlockSpec((1, Mp, K1), lambda n: (n, 0, 0)),
                pl.BlockSpec((K1, CP), lambda n: (0, 0)),
                pl.BlockSpec((9, CP, CP), lambda n: (0, 0, 0)),
                pl.BlockSpec((1, CP), lambda n: (0, 0)),
            ],
            out_specs=pl.BlockSpec((1, M, CP), lambda n: (n, 0, 0)),
            scratch_shapes=[pltpu.VMEM((Lp, CP), jnp.bfloat16)],
        ),
        compiler_params=pltpu.CompilerParams(
            dimension_semantics=("parallel",),
            vmem_limit_bytes=vmem_bytes),
    )(im2col, w1mat, w2, b2)


# ----------------------------------------------------------------------------
# CNNBlock parameters (deterministic, in-script) and forward pass
# ----------------------------------------------------------------------------
def build_params(key, cin, cout, eps=1e-5):
    """Init mimicking a trained CNNBlock (inference-mode BN).

    kernel params:
      w1mat: (K1p, CP) bf16 — tap-packed conv1 weights with BN1 scale folded in;
             row 9*cin holds the fused bias (picked up by the im2col ones-lane).
      w2:    (9, CP, CP) bf16 HWIO per-tap conv2 weights.   b2: (1, CP) f32.
    raw params: un-fused PyTorch-layout tensors for the pure-JAX reference."""
    ks = jax.random.split(key, 8)
    w1 = jax.random.normal(ks[0], (cout, cin, 3, 3), jnp.float32) / float((cin * 9) ** 0.5)
    b1 = 0.05 * jax.random.normal(ks[1], (cout,), jnp.float32)
    w2 = jax.random.normal(ks[2], (cout, cout, 3, 3), jnp.float32) / float((cout * 9) ** 0.5)
    b2 = 0.05 * jax.random.normal(ks[3], (cout,), jnp.float32)
    gamma = 1.0 + 0.1 * jax.random.normal(ks[4], (cout,), jnp.float32)
    beta = 0.1 * jax.random.normal(ks[5], (cout,), jnp.float32)
    mean = 0.1 * jax.random.normal(ks[6], (cout,), jnp.float32)
    var = jnp.abs(1.0 + 0.1 * jax.random.normal(ks[7], (cout,), jnp.float32))
    raw = dict(w1=w1, b1=b1, w2=w2, b2=b2, gamma=gamma, beta=beta, mean=mean,
               var=var, eps=eps)

    cp = _round_up(cout, 128)
    k1p = _round_up(9 * cin + 1, 128)

    scale = gamma / jnp.sqrt(var + eps)                       # (cout,)
    w1_hwio = jnp.transpose(w1, (2, 3, 1, 0))                 # (3,3,cin,cout)
    w1_mat = (w1_hwio * scale).reshape(9 * cin, cout)         # BN1 scale folded in
    b1_fused = scale * (b1 - mean) + beta                     # conv1 bias + BN1 shift
    w1_full = jnp.zeros((k1p, cp), jnp.float32)
    w1_full = w1_full.at[:9 * cin, :cout].set(w1_mat)
    w1_full = w1_full.at[9 * cin, :cout].set(b1_fused)

    w2_hwio = jnp.transpose(w2, (2, 3, 1, 0)).reshape(9, cout, cout)
    w2_full = jnp.zeros((9, cp, cp), jnp.float32).at[:, :cout, :cout].set(w2_hwio)
    b2_full = jnp.zeros((1, cp), jnp.float32).at[0, :cout].set(b2)

    params = dict(w1mat=w1_full.astype(jnp.bfloat16),
                  w2=w2_full.astype(jnp.bfloat16),
                  b2=b2_full)
    return params, raw


def cnnblock_forward(params, x_nchw, *, cout):
    """CNNBlock.forward: conv1 -> (Dropout2d p=0: identity) -> BN1 -> ReLU -> conv2."""
    N, cin, H, W = x_nchw.shape
    Wp = W + 2
    M = H * Wp
    Mp = _round_up(M, 16)                       # bf16 sublane granule
    K1 = params["w1mat"].shape[0]
    cp = params["w2"].shape[-1]

    # Build conv1's tap-packed im2col: 9 shifted slices of the zero-padded image
    # (flattened over rows x padded-cols) + a validity lane that doubles as the
    # bias multiplier.  Rows for the 2 wrap-around columns per image row are
    # zeroed so conv1 emits exact zeros where conv2's halo must be zero.
    # TODO(synk): training-mode Dropout2d (p>0) / batch-stats BN not implemented;
    # module default drop=0 -> identity, BN folded in inference mode.
    x = jnp.transpose(x_nchw, (0, 2, 3, 1)).astype(jnp.bfloat16)      # NHWC
    xp = jnp.pad(x, ((0, 0), (1, 2), (1, 1), (0, 0)))                 # (N, H+3, Wp, cin)
    xf = xp.reshape(N, (H + 3) * Wp, cin)
    taps = tuple(kh * Wp + kw for kh in range(3) for kw in range(3))
    patches = jnp.concatenate([xf[:, t:t + M, :] for t in taps], axis=-1)
    valid = ((jnp.arange(M) % Wp) < W).astype(jnp.bfloat16)[None, :, None]
    im2col = jnp.concatenate([patches * valid,
                              jnp.broadcast_to(valid, (N, M, 1))], axis=-1)
    im2col = jnp.pad(im2col, ((0, 0), (0, Mp - M), (0, K1 - (9 * cin + 1))))

    out = cnnblock_pallas(im2col, params["w1mat"], params["w2"], params["b2"],
                          H=H, W=W)                                   # (N, M, cp) f32

    # Drop the 2 wrap-around columns per row and the padded channels in one
    # slice folded into the NHWC -> NCHW transpose.
    out = out.reshape(N, H, Wp, cp)[:, :, :W, :cout]
    return jnp.transpose(out, (0, 3, 1, 2))


# ----------------------------------------------------------------------------
# Pure-JAX reference (for validation only)
# ----------------------------------------------------------------------------
def reference_forward(x_nchw, raw):
    dn = ("NHWC", "HWIO", "NHWC")
    x = jnp.transpose(x_nchw, (0, 2, 3, 1))
    z = jax.lax.conv_general_dilated(
        x, jnp.transpose(raw["w1"], (2, 3, 1, 0)), (1, 1), "SAME",
        dimension_numbers=dn, precision=jax.lax.Precision.HIGHEST) + raw["b1"]
    z = raw["gamma"] * (z - raw["mean"]) / jnp.sqrt(raw["var"] + raw["eps"]) + raw["beta"]
    z = jnp.maximum(z, 0.0)
    out = jax.lax.conv_general_dilated(
        z, jnp.transpose(raw["w2"], (2, 3, 1, 0)), (1, 1), "SAME",
        dimension_numbers=dn, precision=jax.lax.Precision.HIGHEST) + raw["b2"]
    return jnp.transpose(out, (0, 3, 1, 2))


# ----------------------------------------------------------------------------
if __name__ == "__main__":
    key = jax.random.PRNGKey(0)
    k_x, k_p = jax.random.split(key)

    N, CIN, H, W = 2, 4, 16, 16
    COUT = 32
    x = jax.random.normal(k_x, (N, CIN, H, W), jnp.float32)
    params, raw = build_params(k_p, CIN, COUT)

    fwd = jax.jit(functools.partial(cnnblock_forward, cout=COUT))
    out = jax.block_until_ready(fwd(params, x))

    assert out.shape == (N, COUT, H, W), out.shape
    assert bool(jnp.all(jnp.isfinite(out)))

    # Validate against a pure-JAX f32 reference (loose tolerance: bf16 operands).
    ref = reference_forward(x, raw)
    max_err = float(jnp.max(jnp.abs(out - ref)))
    mean_err = float(jnp.mean(jnp.abs(out - ref)))
    assert max_err < 0.3 and mean_err < 0.03, (max_err, mean_err)

    print("KERNEL_OK")
</pallas_src>

<mosaic_0001>
module attributes {stable_mosaic.version = 11 : i64} {
  func.func @_cnnblock_kernel(%arg0: i32, %arg1: memref<1x288x128xbf16, #tpu.memory_space<vmem>>, %arg2: memref<128x128xbf16, #tpu.memory_space<vmem>>, %arg3: memref<9x128x128xbf16, #tpu.memory_space<vmem>>, %arg4: memref<1x128xf32, #tpu.memory_space<vmem>>, %arg5: memref<1x288x128xf32, #tpu.memory_space<vmem>>, %arg6: memref<352x128xbf16, #tpu.memory_space<vmem>>) attributes {dimension_semantics = [#tpu.dimension_semantics<parallel>], iteration_bounds = array<i64: 2>, scalar_prefetch = 0 : i64, scratch_operands = 1 : i64, tpu.core_type = #tpu.core_type<tc>, window_params = [{transform_indices = @transform_0, window_bounds = array<i64: 1, 288, 128>}, {pipeline_mode = #tpu.pipeline_mode<synchronous>, transform_indices = @transform_1, window_bounds = array<i64: 128, 128>}, {pipeline_mode = #tpu.pipeline_mode<synchronous>, transform_indices = @transform_2, window_bounds = array<i64: 9, 128, 128>}, {pipeline_mode = #tpu.pipeline_mode<synchronous>, transform_indices = @transform_3, window_bounds = array<i64: 1, 128>}, {transform_indices = @transform_4, window_bounds = array<i64: 1, 288, 128>}]} {
    %cst = arith.constant 0.000000e+00 : bf16
    %0 = vector.broadcast %cst : bf16 to vector<19x128xbf16>
    %c0 = arith.constant 0 : index
    %c0_0 = arith.constant 0 : index
    %1 = vector.load %arg6[%c0, %c0_0] : memref<352x128xbf16, #tpu.memory_space<vmem>>, vector<19x128xbf16>
    tpu.vector_store %arg6[%c0, %c0_0], %0 {strides = array<i32>} : memref<352x128xbf16, #tpu.memory_space<vmem>>, vector<19x128xbf16>,
    %cst_1 = arith.constant 0.000000e+00 : bf16
    %2 = vector.broadcast %cst_1 : bf16 to vector<45x128xbf16>
    %c307 = arith.constant 307 : index
    %c0_2 = arith.constant 0 : index
    %3 = vector.load %arg6[%c307, %c0_2] : memref<352x128xbf16, #tpu.memory_space<vmem>>, vector<45x128xbf16>
    tpu.vector_store %arg6[%c307, %c0_2], %2 {strides = array<i32>} : memref<352x128xbf16, #tpu.memory_space<vmem>>, vector<45x128xbf16>,
    %c0_3 = arith.constant 0 : index
    %c0_4 = arith.constant 0 : index
    %4 = vector.load %arg2[%c0_3, %c0_4] : memref<128x128xbf16, #tpu.memory_space<vmem>>, vector<128x128xbf16>
    %c0_5 = arith.constant 0 : index
    %c0_6 = arith.constant 0 : index
    %c0_7 = arith.constant 0 : index
    %5 = vector.load %arg1[%c0_5, %c0_6, %c0_7] : memref<1x288x128xbf16, #tpu.memory_space<vmem>>, vector<1x128x128xbf16>
    %6 = vector.shape_cast %5 : vector<1x128x128xbf16> to vector<128x128xbf16>
    %cst_8 = arith.constant dense<0.000000e+00> : vector<128x128xf32>
    %7 = tpu.matmul %6, %4, %cst_8 {dimension_numbers = #tpu.dot_dimension_numbers<[1], [0], [0], [1], [0, 0, 1, 1], [], []>} : vector<128x128xbf16>, vector<128x128xbf16>, vector<128x128xf32> -> vector<128x128xf32>
    %cst_9 = arith.constant 0.000000e+00 : f32
    %8 = vector.broadcast %cst_9 : f32 to vector<128x128xf32>
    %9 = arith.maximumf %7, %8 : vector<128x128xf32>
    %10 = arith.truncf %9 : vector<128x128xf32> to vector<128x128xbf16>
    %c19 = arith.constant 19 : index
    %c0_10 = arith.constant 0 : index
    %11 = vector.load %arg6[%c19, %c0_10] : memref<352x128xbf16, #tpu.memory_space<vmem>>, vector<128x128xbf16>
    tpu.vector_store %arg6[%c19, %c0_10], %10 {strides = array<i32>} : memref<352x128xbf16, #tpu.memory_space<vmem>>, vector<128x128xbf16>,
    %c0_11 = arith.constant 0 : index
    %c128 = arith.constant 128 : index
    %c0_12 = arith.constant 0 : index
    %12 = vector.load %arg1[%c0_11, %c128, %c0_12] : memref<1x288x128xbf16, #tpu.memory_space<vmem>>, vector<1x128x128xbf16>
    %13 = vector.shape_cast %12 : vector<1x128x128xbf16> to vector<128x128xbf16>
    %cst_13 = arith.constant dense<0.000000e+00> : vector<128x128xf32>
    %14 = tpu.matmul %13, %4, %cst_13 {dimension_numbers = #tpu.dot_dimension_numbers<[1], [0], [0], [1], [0, 0, 1, 1], [], []>} : vector<128x128xbf16>, vector<128x128xbf16>, vector<128x128xf32> -> vector<128x128xf32>
    %cst_14 = arith.constant 0.000000e+00 : f32
    %15 = vector.broadcast %cst_14 : f32 to vector<128x128xf32>
    %16 = arith.maximumf %14, %15 : vector<128x128xf32>
    %17 = arith.truncf %16 : vector<128x128xf32> to vector<128x128xbf16>
    %c147 = arith.constant 147 : index
    %c0_15 = arith.constant 0 : index
    %18 = vector.load %arg6[%c147, %c0_15] : memref<352x128xbf16, #tpu.memory_space<vmem>>, vector<128x128xbf16>
    tpu.vector_store %arg6[%c147, %c0_15], %17 {strides = array<i32>} : memref<352x128xbf16, #tpu.memory_space<vmem>>, vector<128x128xbf16>,
    %c0_16 = arith.constant 0 : index
    %c256 = arith.constant 256 : index
    %c0_17 = arith.constant 0 : index
    %19 = vector.load %arg1[%c0_16, %c256, %c0_17] : memref<1x288x128xbf16, #tpu.memory_space<vmem>>, vector<1x32x128xbf16>
    %20 = vector.shape_cast %19 : vector<1x32x128xbf16> to vector<32x128xbf16>
    %cst_18 = arith.constant dense<0.000000e+00> : vector<32x128xf32>
    %21 = tpu.matmul %20, %4, %cst_18 {dimension_numbers = #tpu.dot_dimension_numbers<[1], [0], [0], [1], [0, 0, 1, 1], [], []>} : vector<32x128xbf16>, vector<128x128xbf16>, vector<32x128xf32> -> vector<32x128xf32>
    %cst_19 = arith.constant 0.000000e+00 : f32
    %22 = vector.broadcast %cst_19 : f32 to vector<32x128xf32>
    %23 = arith.maximumf %21, %22 : vector<32x128xf32>
    %24 = arith.truncf %23 : vector<32x128xf32> to vector<32x128xbf16>
    %c275 = arith.constant 275 : index
    %c0_20 = arith.constant 0 : index
    %25 = vector.load %arg6[%c275, %c0_20] : memref<352x128xbf16, #tpu.memory_space<vmem>>, vector<32x128xbf16>
    tpu.vector_store %arg6[%c275, %c0_20], %24 {strides = array<i32>} : memref<352x128xbf16, #tpu.memory_space<vmem>>, vector<32x128xbf16>,
    %c0_21 = arith.constant 0 : index
    %c0_22 = arith.constant 0 : index
    %26 = vector.load %arg4[%c0_21, %c0_22] : memref<1x128xf32, #tpu.memory_space<vmem>>, vector<1x128xf32>
    %c0_23 = arith.constant 0 : index
    %c0_24 = arith.constant 0 : index
    %27 = vector.load %arg6[%c0_23, %c0_24] : memref<352x128xbf16, #tpu.memory_space<vmem>>, vector<128x128xbf16>
    %c0_25 = arith.constant 0 : index
    %c0_26 = arith.constant 0 : index
    %c0_27 = arith.constant 0 : index
    %28 = vector.load %arg3[%c0_25, %c0_26, %c0_27] : memref<9x128x128xbf16, #tpu.memory_space<vmem>>, vector<1x128x128xbf16>
    %29 = vector.shape_cast %28 : vector<1x128x128xbf16> to vector<128x128xbf16>
    %cst_28 = arith.constant dense<0.000000e+00> : vector<128x128xf32>
    %30 = tpu.matmul %27, %29, %cst_28 {dimension_numbers = #tpu.dot_dimension_numbers<[1], [0], [0], [1], [0, 0, 1, 1], [], []>} : vector<128x128xbf16>, vector<128x128xbf16>, vector<128x128xf32> -> vector<128x128xf32>
    %c1 = arith.constant 1 : index
    %c0_29 = arith.constant 0 : index
    %31 = vector.load %arg6[%c1, %c0_29] : memref<352x128xbf16, #tpu.memory_space<vmem>>, vector<128x128xbf16>
    %c1_30 = arith.constant 1 : index
    %c0_31 = arith.constant 0 : index
    %c0_32 = arith.constant 0 : index
    %32 = vector.load %arg3[%c1_30, %c0_31, %c0_32] : memref<9x128x128xbf16, #tpu.memory_space<vmem>>, vector<1x128x128xbf16>
    %33 = vector.shape_cast %32 : vector<1x128x128xbf16> to vector<128x128xbf16>
    %cst_33 = arith.constant dense<0.000000e+00> : vector<128x128xf32>
    %34 = tpu.matmul %31, %33, %cst_33 {dimension_numbers = #tpu.dot_dimension_numbers<[1], [0], [0], [1], [0, 0, 1, 1], [], []>} : vector<128x128xbf16>, vector<128x128xbf16>, vector<128x128xf32> -> vector<128x128xf32>
    %35 = arith.addf %30, %34 : vector<128x128xf32>
    %c2 = arith.constant 2 : index
    %c0_34 = arith.constant 0 : index
    %36 = vector.load %arg6[%c2, %c0_34] : memref<352x128xbf16, #tpu.memory_space<vmem>>, vector<128x128xbf16>
    %c2_35 = arith.constant 2 : index
    %c0_36 = arith.constant 0 : index
    %c0_37 = arith.constant 0 : index
    %37 = vector.load %arg3[%c2_35, %c0_36, %c0_37] : memref<9x128x128xbf16, #tpu.memory_space<vmem>>, vector<1x128x128xbf16>
    %38 = vector.shape_cast %37 : vector<1x128x128xbf16> to vector<128x128xbf16>
    %cst_38 = arith.constant dense<0.000000e+00> : vector<128x128xf32>
    %39 = tpu.matmul %36, %38, %cst_38 {dimension_numbers = #tpu.dot_dimension_numbers<[1], [0], [0], [1], [0, 0, 1, 1], [], []>} : vector<128x128xbf16>, vector<128x128xbf16>, vector<128x128xf32> -> vector<128x128xf32>
    %40 = arith.addf %35, %39 : vector<128x128xf32>
    %c18 = arith.constant 18 : index
    %c0_39 = arith.constant 0 : index
    %41 = vector.load %arg6[%c18, %c0_39] : memref<352x128xbf16, #tpu.memory_space<vmem>>, vector<128x128xbf16>
    %c3 = arith.constant 3 : index
    %c0_40 = arith.constant 0 : index
    %c0_41 = arith.constant 0 : index
    %42 = vector.load %arg3[%c3, %c0_40, %c0_41] : memref<9x128x128xbf16, #tpu.memory_space<vmem>>, vector<1x128x128xbf16>
    %43 = vector.shape_cast %42 : vector<1x128x128xbf16> to vector<128x128xbf16>
    %cst_42 = arith.constant dense<0.000000e+00> : vector<128x128xf32>
    %44 = tpu.matmul %41, %43, %cst_42 {dimension_numbers = #tpu.dot_dimension_numbers<[1], [0], [0], [1], [0, 0, 1, 1], [], []>} : vector<128x128xbf16>, vector<128x128xbf16>, vector<128x128xf32> -> vector<128x128xf32>
    %45 = arith.addf %40, %44 : vector<128x128xf32>
    %c19_43 = arith.constant 19 : index
    %c0_44 = arith.constant 0 : index
    %46 = vector.load %arg6[%c19_43, %c0_44] : memref<352x128xbf16, #tpu.memory_space<vmem>>, vector<128x128xbf16>
    %c4 = arith.constant 4 : index
    %c0_45 = arith.constant 0 : index
    %c0_46 = arith.constant 0 : index
    %47 = vector.load %arg3[%c4, %c0_45, %c0_46] : memref<9x128x128xbf16, #tpu.memory_space<vmem>>, vector<1x128x128xbf16>
    %48 = vector.shape_cast %47 : vector<1x128x128xbf16> to vector<128x128xbf16>
    %cst_47 = arith.constant dense<0.000000e+00> : vector<128x128xf32>
    %49 = tpu.matmul %46, %48, %cst_47 {dimension_numbers = #tpu.dot_dimension_numbers<[1], [0], [0], [1], [0, 0, 1, 1], [], []>} : vector<128x128xbf16>, vector<128x128xbf16>, vector<128x128xf32> -> vector<128x128xf32>
    %50 = arith.addf %45, %49 : vector<128x128xf32>
    %c20 = arith.constant 20 : index
    %c0_48 = arith.constant 0 : index
    %51 = vector.load %arg6[%c20, %c0_48] : memref<352x128xbf16, #tpu.memory_space<vmem>>, vector<128x128xbf16>
    %c5 = arith.constant 5 : index
    %c0_49 = arith.constant 0 : index
    %c0_50 = arith.constant 0 : index
    %52 = vector.load %arg3[%c5, %c0_49, %c0_50] : memref<9x128x128xbf16, #tpu.memory_space<vmem>>, vector<1x128x128xbf16>
    %53 = vector.shape_cast %52 : vector<1x128x128xbf16> to vector<128x128xbf16>
    %cst_51 = arith.constant dense<0.000000e+00> : vector<128x128xf32>
    %54 = tpu.matmul %51, %53, %cst_51 {dimension_numbers = #tpu.dot_dimension_numbers<[1], [0], [0], [1], [0, 0, 1, 1], [], []>} : vector<128x128xbf16>, vector<128x128xbf16>, vector<128x128xf32> -> vector<128x128xf32>
    %55 = arith.addf %50, %54 : vector<128x128xf32>
    %c36 = arith.constant 36 : index
    %c0_52 = arith.constant 0 : index
    %56 = vector.load %arg6[%c36, %c0_52] : memref<352x128xbf16, #tpu.memory_space<vmem>>, vector<128x128xbf16>
    %c6 = arith.constant 6 : index
    %c0_53 = arith.constant 0 : index
    %c0_54 = arith.constant 0 : index
    %57 = vector.load %arg3[%c6, %c0_53, %c0_54] : memref<9x128x128xbf16, #tpu.memory_space<vmem>>, vector<1x128x128xbf16>
    %58 = vector.shape_cast %57 : vector<1x128x128xbf16> to vector<128x128xbf16>
    %cst_55 = arith.constant dense<0.000000e+00> : vector<128x128xf32>
    %59 = tpu.matmul %56, %58, %cst_55 {dimension_numbers = #tpu.dot_dimension_numbers<[1], [0], [0], [1], [0, 0, 1, 1], [], []>} : vector<128x128xbf16>, vector<128x128xbf16>, vector<128x128xf32> -> vector<128x128xf32>
    %60 = arith.addf %55, %59 : vector<128x128xf32>
    %c37 = arith.constant 37 : index
    %c0_56 = arith.constant 0 : index
    %61 = vector.load %arg6[%c37, %c0_56] : memref<352x128xbf16, #tpu.memory_space<vmem>>, vector<128x128xbf16>
    %c7 = arith.constant 7 : index
    %c0_57 = arith.constant 0 : index
    %c0_58 = arith.constant 0 : index
    %62 = vector.load %arg3[%c7, %c0_57, %c0_58] : memref<9x128x128xbf16, #tpu.memory_space<vmem>>, vector<1x128x128xbf16>
    %63 = vector.shape_cast %62 : vector<1x128x128xbf16> to vector<128x128xbf16>
    %cst_59 = arith.constant dense<0.000000e+00> : vector<128x128xf32>
    %64 = tpu.matmul %61, %63, %cst_59 {dimension_numbers = #tpu.dot_dimension_numbers<[1], [0], [0], [1], [0, 0, 1, 1], [], []>} : vector<128x128xbf16>, vector<128x128xbf16>, vector<128x128xf32> -> vector<128x128xf32>
    %65 = arith.addf %60, %64 : vector<128x128xf32>
    %c38 = arith.constant 38 : index
    %c0_60 = arith.constant 0 : index
    %66 = vector.load %arg6[%c38, %c0_60] : memref<352x128xbf16, #tpu.memory_space<vmem>>, vector<128x128xbf16>
    %c8 = arith.constant 8 : index
    %c0_61 = arith.constant 0 : index
    %c0_62 = arith.constant 0 : index
    %67 = vector.load %arg3[%c8, %c0_61, %c0_62] : memref<9x128x128xbf16, #tpu.memory_space<vmem>>, vector<1x128x128xbf16>
    %68 = vector.shape_cast %67 : vector<1x128x128xbf16> to vector<128x128xbf16>
    %cst_63 = arith.constant dense<0.000000e+00> : vector<128x128xf32>
    %69 = tpu.matmul %66, %68, %cst_63 {dimension_numbers = #tpu.dot_dimension_numbers<[1], [0], [0], [1], [0, 0, 1, 1], [], []>} : vector<128x128xbf16>, vector<128x128xbf16>, vector<128x128xf32> -> vector<128x128xf32>
    %70 = arith.addf %65, %69 : vector<128x128xf32>
    %71 = vector.broadcast %26 : vector<1x128xf32> to vector<128x128xf32>
    %72 = arith.addf %70, %71 : vector<128x128xf32>
    %c0_64 = arith.constant 0 : index
    %c0_65 = arith.constant 0 : index
    %c0_66 = arith.constant 0 : index
    %73 = vector.load %arg5[%c0_64, %c0_65, %c0_66] : memref<1x288x128xf32, #tpu.memory_space<vmem>>, vector<1x128x128xf32>
    %74 = vector.shape_cast %73 : vector<1x128x128xf32> to vector<128x128xf32>
    %75 = vector.shape_cast %72 : vector<128x128xf32> to vector<1x128x128xf32>
    tpu.vector_store %arg5[%c0_64, %c0_65, %c0_66], %75 {strides = array<i32>} : memref<1x288x128xf32, #tpu.memory_space<vmem>>, vector<1x128x128xf32>,
    %c128_67 = arith.constant 128 : index
    %c0_68 = arith.constant 0 : index
    %76 = vector.load %arg6[%c128_67, %c0_68] : memref<352x128xbf16, #tpu.memory_space<vmem>>, vector<128x128xbf16>
    %c0_69 = arith.constant 0 : index
    %c0_70 = arith.constant 0 : index
    %c0_71 = arith.constant 0 : index
    %77 = vector.load %arg3[%c0_69, %c0_70, %c0_71] : memref<9x128x128xbf16, #tpu.memory_space<vmem>>, vector<1x128x128xbf16>
    %78 = vector.shape_cast %77 : vector<1x128x128xbf16> to vector<128x128xbf16>
    %cst_72 = arith.constant dense<0.000000e+00> : vector<128x128xf32>
    %79 = tpu.matmul %76, %78, %cst_72 {dimension_numbers = #tpu.dot_dimension_numbers<[1], [0], [0], [1], [0, 0, 1, 1], [], []>} : vector<128x128xbf16>, vector<128x128xbf16>, vector<128x128xf32> -> vector<128x128xf32>
    %c129 = arith.constant 129 : index
    %c0_73 = arith.constant 0 : index
    %80 = vector.load %arg6[%c129, %c0_73] : memref<352x128xbf16, #tpu.memory_space<vmem>>, vector<128x128xbf16>
    %c1_74 = arith.constant 1 : index
    %c0_75 = arith.constant 0 : index
    %c0_76 = arith.constant 0 : index
    %81 = vector.load %arg3[%c1_74, %c0_75, %c0_76] : memref<9x128x128xbf16, #tpu.memory_space<vmem>>, vector<1x128x128xbf16>
    %82 = vector.shape_cast %81 : vector<1x128x128xbf16> to vector<128x128xbf16>
    %cst_77 = arith.constant dense<0.000000e+00> : vector<128x128xf32>
    %83 = tpu.matmul %80, %82, %cst_77 {dimension_numbers = #tpu.dot_dimension_numbers<[1], [0], [0], [1], [0, 0, 1, 1], [], []>} : vector<128x128xbf16>, vector<128x128xbf16>, vector<128x128xf32> -> vector<128x128xf32>
    %84 = arith.addf %79, %83 : vector<128x128xf32>
    %c130 = arith.constant 130 : index
    %c0_78 = arith.constant 0 : index
    %85 = vector.load %arg6[%c130, %c0_78] : memref<352x128xbf16, #tpu.memory_space<vmem>>, vector<128x128xbf16>
    %c2_79 = arith.constant 2 : index
    %c0_80 = arith.constant 0 : index
    %c0_81 = arith.constant 0 : index
    %86 = vector.load %arg3[%c2_79, %c0_80, %c0_81] : memref<9x128x128xbf16, #tpu.memory_space<vmem>>, vector<1x128x128xbf16>
    %87 = vector.shape_cast %86 : vector<1x128x128xbf16> to vector<128x128xbf16>
    %cst_82 = arith.constant dense<0.000000e+00> : vector<128x128xf32>
    %88 = tpu.matmul %85, %87, %cst_82 {dimension_numbers = #tpu.dot_dimension_numbers<[1], [0], [0], [1], [0, 0, 1, 1], [], []>} : vector<128x128xbf16>, vector<128x128xbf16>, vector<128x128xf32> -> vector<128x128xf32>
    %89 = arith.addf %84, %88 : vector<128x128xf32>
    %c146 = arith.constant 146 : index
    %c0_83 = arith.constant 0 : index
    %90 = vector.load %arg6[%c146, %c0_83] : memref<352x128xbf16, #tpu.memory_space<vmem>>, vector<128x128xbf16>
    %c3_84 = arith.constant 3 : index
    %c0_85 = arith.constant 0 : index
    %c0_86 = arith.constant 0 : index
    %91 = vector.load %arg3[%c3_84, %c0_85, %c0_86] : memref<9x128x128xbf16, #tpu.memory_space<vmem>>, vector<1x128x128xbf16>
    %92 = vector.shape_cast %91 : vector<1x128x128xbf16> to vector<128x128xbf16>
    %cst_87 = arith.constant dense<0.000000e+00> : vector<128x128xf32>
    %93 = tpu.matmul %90, %92, %cst_87 {dimension_numbers = #tpu.dot_dimension_numbers<[1], [0], [0], [1], [0, 0, 1, 1], [], []>} : vector<128x128xbf16>, vector<128x128xbf16>, vector<128x128xf32> -> vector<128x128xf32>
    %94 = arith.addf %89, %93 : vector<128x128xf32>
    %c147_88 = arith.constant 147 : index
    %c0_89 = arith.constant 0 : index
    %95 = vector.load %arg6[%c147_88, %c0_89] : memref<352x128xbf16, #tpu.memory_space<vmem>>, vector<128x128xbf16>
    %c4_90 = arith.constant 4 : index
    %c0_91 = arith.constant 0 : index
    %c0_92 = arith.constant 0 : index
    %96 = vector.load %arg3[%c4_90, %c0_91, %c0_92] : memref<9x128x128xbf16, #tpu.memory_space<vmem>>, vector<1x128x128xbf16>
    %97 = vector.shape_cast %96 : vector<1x128x128xbf16> to vector<128x128xbf16>
    %cst_93 = arith.constant dense<0.000000e+00> : vector<128x128xf32>
    %98 = tpu.matmul %95, %97, %cst_93 {dimension_numbers = #tpu.dot_dimension_numbers<[1], [0], [0], [1], [0, 0, 1, 1], [], []>} : vector<128x128xbf16>, vector<128x128xbf16>, vector<128x128xf32> -> vector<128x128xf32>
    %99 = arith.addf %94, %98 : vector<128x128xf32>
    %c148 = arith.constant 148 : index
    %c0_94 = arith.constant 0 : index
    %100 = vector.load %arg6[%c148, %c0_94] : memref<352x128xbf16, #tpu.memory_space<vmem>>, vector<128x128xbf16>
    %c5_95 = arith.constant 5 : index
    %c0_96 = arith.constant 0 : index
    %c0_97 = arith.constant 0 : index
    %101 = vector.load %arg3[%c5_95, %c0_96, %c0_97] : memref<9x128x128xbf16, #tpu.memory_space<vmem>>, vector<1x128x128xbf16>
    %102 = vector.shape_cast %101 : vector<1x128x128xbf16> to vector<128x128xbf16>
    %cst_98 = arith.constant dense<0.000000e+00> : vector<128x128xf32>
    %103 = tpu.matmul %100, %102, %cst_98 {dimension_numbers = #tpu.dot_dimension_numbers<[1], [0], [0], [1], [0, 0, 1, 1], [], []>} : vector<128x128xbf16>, vector<128x128xbf16>, vector<128x128xf32> -> vector<128x128xf32>
    %104 = arith.addf %99, %103 : vector<128x128xf32>
    %c164 = arith.constant 164 : index
    %c0_99 = arith.constant 0 : index
    %105 = vector.load %arg6[%c164, %c0_99] : memref<352x128xbf16, #tpu.memory_space<vmem>>, vector<128x128xbf16>
    %c6_100 = arith.constant 6 : index
    %c0_101 = arith.constant 0 : index
    %c0_102 = arith.constant 0 : index
    %106 = vector.load %arg3[%c6_100, %c0_101, %c0_102] : memref<9x128x128xbf16, #tpu.memory_space<vmem>>, vector<1x128x128xbf16>
    %107 = vector.shape_cast %106 : vector<1x128x128xbf16> to vector<128x128xbf16>
    %cst_103 = arith.constant dense<0.000000e+00> : vector<128x128xf32>
    %108 = tpu.matmul %105, %107, %cst_103 {dimension_numbers = #tpu.dot_dimension_numbers<[1], [0], [0], [1], [0, 0, 1, 1], [], []>} : vector<128x128xbf16>, vector<128x128xbf16>, vector<128x128xf32> -> vector<128x128xf32>
    %109 = arith.addf %104, %108 : vector<128x128xf32>
    %c165 = arith.constant 165 : index
    %c0_104 = arith.constant 0 : index
    %110 = vector.load %arg6[%c165, %c0_104] : memref<352x128xbf16, #tpu.memory_space<vmem>>, vector<128x128xbf16>
    %c7_105 = arith.constant 7 : index
    %c0_106 = arith.constant 0 : index
    %c0_107 = arith.constant 0 : index
    %111 = vector.load %arg3[%c7_105, %c0_106, %c0_107] : memref<9x128x128xbf16, #tpu.memory_space<vmem>>, vector<1x128x128xbf16>
    %112 = vector.shape_cast %111 : vector<1x128x128xbf16> to vector<128x128xbf16>
    %cst_108 = arith.constant dense<0.000000e+00> : vector<128x128xf32>
    %113 = tpu.matmul %110, %112, %cst_108 {dimension_numbers = #tpu.dot_dimension_numbers<[1], [0], [0], [1], [0, 0, 1, 1], [], []>} : vector<128x128xbf16>, vector<128x128xbf16>, vector<128x128xf32> -> vector<128x128xf32>
    %114 = arith.addf %109, %113 : vector<128x128xf32>
    %c166 = arith.constant 166 : index
    %c0_109 = arith.constant 0 : index
    %115 = vector.load %arg6[%c166, %c0_109] : memref<352x128xbf16, #tpu.memory_space<vmem>>, vector<128x128xbf16>
    %c8_110 = arith.constant 8 : index
    %c0_111 = arith.constant 0 : index
    %c0_112 = arith.constant 0 : index
    %116 = vector.load %arg3[%c8_110, %c0_111, %c0_112] : memref<9x128x128xbf16, #tpu.memory_space<vmem>>, vector<1x128x128xbf16>
    %117 = vector.shape_cast %116 : vector<1x128x128xbf16> to vector<128x128xbf16>
    %cst_113 = arith.constant dense<0.000000e+00> : vector<128x128xf32>
    %118 = tpu.matmul %115, %117, %cst_113 {dimension_numbers = #tpu.dot_dimension_numbers<[1], [0], [0], [1], [0, 0, 1, 1], [], []>} : vector<128x128xbf16>, vector<128x128xbf16>, vector<128x128xf32> -> vector<128x128xf32>
    %119 = arith.addf %114, %118 : vector<128x128xf32>
    %120 = vector.broadcast %26 : vector<1x128xf32> to vector<128x128xf32>
    %121 = arith.addf %119, %120 : vector<128x128xf32>
    %c0_114 = arith.constant 0 : index
    %c128_115 = arith.constant 128 : index
    %c0_116 = arith.constant 0 : index
    %122 = vector.load %arg5[%c0_114, %c128_115, %c0_116] : memref<1x288x128xf32, #tpu.memory_space<vmem>>, vector<1x128x128xf32>
    %123 = vector.shape_cast %122 : vector<1x128x128xf32> to vector<128x128xf32>
    %124 = vector.shape_cast %121 : vector<128x128xf32> to vector<1x128x128xf32>
    tpu.vector_store %arg5[%c0_114, %c128_115, %c0_116], %124 {strides = array<i32>} : memref<1x288x128xf32, #tpu.memory_space<vmem>>, vector<1x128x128xf32>,
    %c256_117 = arith.constant 256 : index
    %c0_118 = arith.constant 0 : index
    %125 = vector.load %arg6[%c256_117, %c0_118] : memref<352x128xbf16, #tpu.memory_space<vmem>>, vector<32x128xbf16>
    %c0_119 = arith.constant 0 : index
    %c0_120 = arith.constant 0 : index
    %c0_121 = arith.constant 0 : index
    %126 = vector.load %arg3[%c0_119, %c0_120, %c0_121] : memref<9x128x128xbf16, #tpu.memory_space<vmem>>, vector<1x128x128xbf16>
    %127 = vector.shape_cast %126 : vector<1x128x128xbf16> to vector<128x128xbf16>
    %cst_122 = arith.constant dense<0.000000e+00> : vector<32x128xf32>
    %128 = tpu.matmul %125, %127, %cst_122 {dimension_numbers = #tpu.dot_dimension_numbers<[1], [0], [0], [1], [0, 0, 1, 1], [], []>} : vector<32x128xbf16>, vector<128x128xbf16>, vector<32x128xf32> -> vector<32x128xf32>
    %c257 = arith.constant 257 : index
    %c0_123 = arith.constant 0 : index
    %129 = vector.load %arg6[%c257, %c0_123] : memref<352x128xbf16, #tpu.memory_space<vmem>>, vector<32x128xbf16>
    %c1_124 = arith.constant 1 : index
    %c0_125 = arith.constant 0 : index
    %c0_126 = arith.constant 0 : index
    %130 = vector.load %arg3[%c1_124, %c0_125, %c0_126] : memref<9x128x128xbf16, #tpu.memory_space<vmem>>, vector<1x128x128xbf16>
    %131 = vector.shape_cast %130 : vector<1x128x128xbf16> to vector<128x128xbf16>
    %cst_127 = arith.constant dense<0.000000e+00> : vector<32x128xf32>
    %132 = tpu.matmul %129, %131, %cst_127 {dimension_numbers = #tpu.dot_dimension_numbers<[1], [0], [0], [1], [0, 0, 1, 1], [], []>} : vector<32x128xbf16>, vector<128x128xbf16>, vector<32x128xf32> -> vector<32x128xf32>
    %133 = arith.addf %128, %132 : vector<32x128xf32>
    %c258 = arith.constant 258 : index
    %c0_128 = arith.constant 0 : index
    %134 = vector.load %arg6[%c258, %c0_128] : memref<352x128xbf16, #tpu.memory_space<vmem>>, vector<32x128xbf16>
    %c2_129 = arith.constant 2 : index
    %c0_130 = arith.constant 0 : index
    %c0_131 = arith.constant 0 : index
    %135 = vector.load %arg3[%c2_129, %c0_130, %c0_131] : memref<9x128x128xbf16, #tpu.memory_space<vmem>>, vector<1x128x128xbf16>
    %136 = vector.shape_cast %135 : vector<1x128x128xbf16> to vector<128x128xbf16>
    %cst_132 = arith.constant dense<0.000000e+00> : vector<32x128xf32>
    %137 = tpu.matmul %134, %136, %cst_132 {dimension_numbers = #tpu.dot_dimension_numbers<[1], [0], [0], [1], [0, 0, 1, 1], [], []>} : vector<32x128xbf16>, vector<128x128xbf16>, vector<32x128xf32> -> vector<32x128xf32>
    %138 = arith.addf %133, %137 : vector<32x128xf32>
    %c274 = arith.constant 274 : index
    %c0_133 = arith.constant 0 : index
    %139 = vector.load %arg6[%c274, %c0_133] : memref<352x128xbf16, #tpu.memory_space<vmem>>, vector<32x128xbf16>
    %c3_134 = arith.constant 3 : index
    %c0_135 = arith.constant 0 : index
    %c0_136 = arith.constant 0 : index
    %140 = vector.load %arg3[%c3_134, %c0_135, %c0_136] : memref<9x128x128xbf16, #tpu.memory_space<vmem>>, vector<1x128x128xbf16>
    %141 = vector.shape_cast %140 : vector<1x128x128xbf16> to vector<128x128xbf16>
    %cst_137 = arith.constant dense<0.000000e+00> : vector<32x128xf32>
    %142 = tpu.matmul %139, %141, %cst_137 {dimension_numbers = #tpu.dot_dimension_numbers<[1], [0], [0], [1], [0, 0, 1, 1], [], []>} : vector<32x128xbf16>, vector<128x128xbf16>, vector<32x128xf32> -> vector<32x128xf32>
    %143 = arith.addf %138, %142 : vector<32x128xf32>
    %c275_138 = arith.constant 275 : index
    %c0_139 = arith.constant 0 : index
    %144 = vector.load %arg6[%c275_138, %c0_139] : memref<352x128xbf16, #tpu.memory_space<vmem>>, vector<32x128xbf16>
    %c4_140 = arith.constant 4 : index
    %c0_141 = arith.constant 0 : index
    %c0_142 = arith.constant 0 : index
    %145 = vector.load %arg3[%c4_140, %c0_141, %c0_142] : memref<9x128x128xbf16, #tpu.memory_space<vmem>>, vector<1x128x128xbf16>
    %146 = vector.shape_cast %145 : vector<1x128x128xbf16> to vector<128x128xbf16>
    %cst_143 = arith.constant dense<0.000000e+00> : vector<32x128xf32>
    %147 = tpu.matmul %144, %146, %cst_143 {dimension_numbers = #tpu.dot_dimension_numbers<[1], [0], [0], [1], [0, 0, 1, 1], [], []>} : vector<32x128xbf16>, vector<128x128xbf16>, vector<32x128xf32> -> vector<32x128xf32>
    %148 = arith.addf %143, %147 : vector<32x128xf32>
    %c276 = arith.constant 276 : index
    %c0_144 = arith.constant 0 : index
    %149 = vector.load %arg6[%c276, %c0_144] : memref<352x128xbf16, #tpu.memory_space<vmem>>, vector<32x128xbf16>
    %c5_145 = arith.constant 5 : index
    %c0_146 = arith.constant 0 : index
    %c0_147 = arith.constant 0 : index
    %150 = vector.load %arg3[%c5_145, %c0_146, %c0_147] : memref<9x128x128xbf16, #tpu.memory_space<vmem>>, vector<1x128x128xbf16>
    %151 = vector.shape_cast %150 : vector<1x128x128xbf16> to vector<128x128xbf16>
    %cst_148 = arith.constant dense<0.000000e+00> : vector<32x128xf32>
    %152 = tpu.matmul %149, %151, %cst_148 {dimension_numbers = #tpu.dot_dimension_numbers<[1], [0], [0], [1], [0, 0, 1, 1], [], []>} : vector<32x128xbf16>, vector<128x128xbf16>, vector<32x128xf32> -> vector<32x128xf32>
    %153 = arith.addf %148, %152 : vector<32x128xf32>
    %c292 = arith.constant 292 : index
    %c0_149 = arith.constant 0 : index
    %154 = vector.load %arg6[%c292, %c0_149] : memref<352x128xbf16, #tpu.memory_space<vmem>>, vector<32x128xbf16>
    %c6_150 = arith.constant 6 : index
    %c0_151 = arith.constant 0 : index
    %c0_152 = arith.constant 0 : index
    %155 = vector.load %arg3[%c6_150, %c0_151, %c0_152] : memref<9x128x128xbf16, #tpu.memory_space<vmem>>, vector<1x128x128xbf16>
    %156 = vector.shape_cast %155 : vector<1x128x128xbf16> to vector<128x128xbf16>
    %cst_153 = arith.constant dense<0.000000e+00> : vector<32x128xf32>
    %157 = tpu.matmul %154, %156, %cst_153 {dimension_numbers = #tpu.dot_dimension_numbers<[1], [0], [0], [1], [0, 0, 1, 1], [], []>} : vector<32x128xbf16>, vector<128x128xbf16>, vector<32x128xf32> -> vector<32x128xf32>
    %158 = arith.addf %153, %157 : vector<32x128xf32>
    %c293 = arith.constant 293 : index
    %c0_154 = arith.constant 0 : index
    %159 = vector.load %arg6[%c293, %c0_154] : memref<352x128xbf16, #tpu.memory_space<vmem>>, vector<32x128xbf16>
    %c7_155 = arith.constant 7 : index
    %c0_156 = arith.constant 0 : index
    %c0_157 = arith.constant 0 : index
    %160 = vector.load %arg3[%c7_155, %c0_156, %c0_157] : memref<9x128x128xbf16, #tpu.memory_space<vmem>>, vector<1x128x128xbf16>
    %161 = vector.shape_cast %160 : vector<1x128x128xbf16> to vector<128x128xbf16>
    %cst_158 = arith.constant dense<0.000000e+00> : vector<32x128xf32>
    %162 = tpu.matmul %159, %161, %cst_158 {dimension_numbers = #tpu.dot_dimension_numbers<[1], [0], [0], [1], [0, 0, 1, 1], [], []>} : vector<32x128xbf16>, vector<128x128xbf16>, vector<32x128xf32> -> vector<32x128xf32>
    %163 = arith.addf %158, %162 : vector<32x128xf32>
    %c294 = arith.constant 294 : index
    %c0_159 = arith.constant 0 : index
    %164 = vector.load %arg6[%c294, %c0_159] : memref<352x128xbf16, #tpu.memory_space<vmem>>, vector<32x128xbf16>
    %c8_160 = arith.constant 8 : index
    %c0_161 = arith.constant 0 : index
    %c0_162 = arith.constant 0 : index
    %165 = vector.load %arg3[%c8_160, %c0_161, %c0_162] : memref<9x128x128xbf16, #tpu.memory_space<vmem>>, vector<1x128x128xbf16>
    %166 = vector.shape_cast %165 : vector<1x128x128xbf16> to vector<128x128xbf16>
    %cst_163 = arith.constant dense<0.000000e+00> : vector<32x128xf32>
    %167 = tpu.matmul %164, %166, %cst_163 {dimension_numbers = #tpu.dot_dimension_numbers<[1], [0], [0], [1], [0, 0, 1, 1], [], []>} : vector<32x128xbf16>, vector<128x128xbf16>, vector<32x128xf32> -> vector<32x128xf32>
    %168 = arith.addf %163, %167 : vector<32x128xf32>
    %169 = vector.broadcast %26 : vector<1x128xf32> to vector<32x128xf32>
    %170 = arith.addf %168, %169 : vector<32x128xf32>
    %c0_164 = arith.constant 0 : index
    %c256_165 = arith.constant 256 : index
    %c0_166 = arith.constant 0 : index
    %171 = vector.load %arg5[%c0_164, %c256_165, %c0_166] : memref<1x288x128xf32, #tpu.memory_space<vmem>>, vector<1x32x128xf32>
    %172 = vector.shape_cast %171 : vector<1x32x128xf32> to vector<32x128xf32>
    %173 = vector.shape_cast %170 : vector<32x128xf32> to vector<1x32x128xf32>
    tpu.vector_store %arg5[%c0_164, %c256_165, %c0_166], %173 {strides = array<i32>} : memref<1x288x128xf32, #tpu.memory_space<vmem>>, vector<1x32x128xf32>,
    return
  }
  func.func @transform_0(%arg0: i32) -> (i32, i32, i32) {
    %c0_i32 = arith.constant 0 : i32
    %c0_i32_0 = arith.constant 0 : i32
    %c0_i32_1 = arith.constant 0 : i32
    return %arg0, %c0_i32, %c0_i32_0 : i32, i32, i32
  }
  func.func @transform_1(%arg0: i32) -> (i32, i32) {
    %c0_i32 = arith.constant 0 : i32
    %c0_i32_0 = arith.constant 0 : i32
    %c0_i32_1 = arith.constant 0 : i32
    return %c0_i32, %c0_i32_0 : i32, i32
  }
  func.func @transform_2(%arg0: i32) -> (i32, i32, i32) {
    %c0_i32 = arith.constant 0 : i32
    %c0_i32_0 = arith.constant 0 : i32
    %c0_i32_1 = arith.constant 0 : i32
    %c0_i32_2 = arith.constant 0 : i32
    return %c0_i32, %c0_i32_0, %c0_i32_1 : i32, i32, i32
  }
  func.func @transform_3(%arg0: i32) -> (i32, i32) {
    %c0_i32 = arith.constant 0 : i32
    %c0_i32_0 = arith.constant 0 : i32
    %c0_i32_1 = arith.constant 0 : i32
    return %c0_i32, %c0_i32_0 : i32, i32
  }
  func.func @transform_4(%arg0: i32) -> (i32, i32, i32) {
    %c0_i32 = arith.constant 0 : i32
    %c0_i32_0 = arith.constant 0 : i32
    %c0_i32_1 = arith.constant 0 : i32
    return %arg0, %c0_i32, %c0_i32_0 : i32, i32, i32
  }
}

</mosaic_0001>

<bundles_post_ra>
// kernel: cnnblock_forward.1
= control target key start
LH: loop header
LB: loop body
LE: loop exit
PB: predicated region body
PF: predicated region fallthrough
CT: control target
= control target key end

     0   :  { %s8741_s15 = smov 0   ;;  %s10474_s0 = inlined_call_operand.vmem [shape: bf16[2,288,128], index: 0, kind: input, shape index: {}]   ;;  %s10475_s1 = inlined_call_operand.vmem [shape: bf16[128,128], index: 1, kind: input, shape index: {}]   ;;  %s10476_s2 = inlined_call_operand.vmem [shape: bf16[9,128,128], index: 2, kind: input, shape index: {}]   ;;  %s10477_s3 = inlined_call_operand.vmem [shape: f32[1,128], index: 3, kind: input, shape index: {}]   ;;  %s10478_s4 = inlined_call_operand.vmem [shape: f32[2,288,128], index: 4, kind: output, shape index: {}]  }
   0x1 LB: > { %s6267_s16 = sadd.s32 4294967295, %s8713_s15   ;;  %p6271_p0 = scmp.ge.s32.totalorder %s8713_s15, 1  ;;  %s8713_s15 = sphi %s8741_s15, %s14_s15  }
   0x2   : > { %p162_p1 = scmp.lt.s32.totalorder %s8713_s15, 3 }
   0x4   : > { %p163_p2 = pnand %p6271_p0, %p162_p1 }
   0x5   : > { %v8752_v0 = vld [vmem:[%s10475_s1] sm:$0xff] (!%p163_p2)   ;;  %p188_p3 = scmp.lt.s32.totalorder (!%p163_p2), %s6267_s16, 1  ;;  %v8757_v1 = vld [vmem:[%s10475_s1 + $0x8] sm:$0xff] (!%p163_p2)   ;;  %v8767_v2 = vld [vmem:[%s10475_s1 + $0x10] sm:$0xff] (!%p163_p2)   ;;  %vm200_vm0 = vcmask (!%p163_p2), 1041408   ;;  %vm206_vm3 = vcmask (!%p163_p2), 1047553  }
   0x6   : > { %166 = sbr.rel (%p163_p2) target bundleno = 944 (0x3b0), region = 36  ;;  %7323 = vmatprep.subr.bf16.mxu0 (!%p163_p2), %v8752_v0  ;;  %v8779_v3 = vld [vmem:[%s10475_s1 + $0x18] sm:$0xff] (!%p163_p2)   ;;  %v8788_v5 = vld [vmem:[%s10475_s1 + $0x20] sm:$0xff] (!%p163_p2)   ;;  %v8795_v6 = vld [vmem:[%s10475_s1 + $0x28] sm:$0xff] (!%p163_p2)   ;;  %vm201_vm1 = vsmask.f32 (!%p163_p2), 1280 }
   0x7   : > { %7324 = vmatpush3.bf16.msra.mxu0 (!%p163_p2), %v8752_v0  ;;  %v8802_v7 = vld [vmem:[%s10475_s1 + $0x30] sm:$0xff] (!%p163_p2)   ;;  %v8809_v8 = vld [vmem:[%s10475_s1 + $0x38] sm:$0xff] (!%p163_p2)   ;;  %v8488_v9 = vld [vmem:[%s10476_s2 + $0x80] sm:$0xff] (!%p163_p2)   ;;  %vm207_vm4 = vsmask.f32 (!%p163_p2), 7942  ;;  %v8715_v43 = vmov (!%p163_p2), 0  }
   0x8   : > { %7325 = vmatprep.subr.bf16.mxu0 (!%p163_p2), %v8757_v1  ;;  %7471 = vmatprep.subr.bf16.mxu1 (!%p163_p2), %v8488_v9  ;;  %v8490_v11 = vld [vmem:[%s10476_s2 + $0x88] sm:$0xff] (!%p163_p2)   ;;  %v8489_v27 = vld [vmem:[%s10476_s2 + $0x40] sm:$0xff] (!%p163_p2)   ;;  %v8492_v30 = vld [vmem:[%s10476_s2 + $0x90] sm:$0xff] (!%p163_p2)   ;;  %199 = vst [vmem:[#allocation2] sm:$0xff] (!%p163_p2), %v8715_v43  ;;  %vm1369_vm6 = vcmask (!%p163_p2), 1046528   ;;  %vm2065_vm9 = vcmask (!%p163_p2), 1045504  }
   0x9   : > { %7472 = vmatpush3.bf16.msra.mxu1 (!%p163_p2), %v8488_v9  ;;  %v8491_v29 = vld [vmem:[%s10476_s2 + $0x48] sm:$0xff] (!%p163_p2)   ;;  %vm8879_vm2 = vmand (!%p163_p2), %vm200_vm0, %vm201_vm1  ;;  %v8493_v33 = vld [vmem:[%s10476_s2 + $0x50] sm:$0xff] (!%p163_p2)   ;;  %212 = vst [vmem:[#allocation2 + $0xa0] sm:$0xff] (!%p163_p2), %v8715_v43  ;;  %vm975_vm7 = vsmask.f32 (!%p163_p2), 7424  ;;  %vm2761_vm10 = vcmask (!%p163_p2), 1044480  }
   0xa   : > { %7473 = vmatprep.subr.bf16.mxu1 (!%p163_p2), %v8490_v11  ;;  %v203_v32 = vld [vmem:[#allocation2 + $0x8] sm:$0x3] (!%p163_p2)  ;;  %v8494_v35 = vld [vmem:[%s10476_s2 + $0x98] sm:$0xff] (!%p163_p2)   ;;  %v8496_v37 = vld [vmem:[%s10476_s2 + $0xa0] sm:$0xff] (!%p163_p2)   ;;  %vm1795_vm8 = vsmask.f32 (!%p163_p2), 6400 }
   0xb   : > { %7326 = vmatpush3.bf16.msra.mxu0 (!%p163_p2), %v8757_v1  ;;  %v204_v34 = vsel (!%p163_p2), %vm8879_vm2, 0, %v203_v32  ;;  %v8495_v36 = vld [vmem:[%s10476_s2 + $0x58] sm:$0xff] (!%p163_p2)   ;;  %vm8897_vm5 = vmand (!%p163_p2), %vm206_vm3, %vm207_vm4  ;;  %v8497_v40 = vld [vmem:[%s10476_s2 + $0x60] sm:$0xff] (!%p163_p2)   ;;  %v981_v32 = vrot.slane (!%p163_p2), %v8715_v43, 1  ;;  %vm2491_vm11 = vsmask.f32 (!%p163_p2), 5376 }
   0xc   : > { %7327 = vmatprep.subr.bf16.mxu0 (!%p163_p2), %v8767_v2  ;;  %205 = vst [vmem:[#allocation2 + $0x8] sm:$0x3] (!%p163_p2), %v204_v34  ;;  %v209_v38 = vld [vmem:[#allocation2 + $0x98] sm:$0xfe] (!%p163_p2)  ;;  %v8498_v41 = vld [vmem:[%s10476_s2 + $0xa8] sm:$0xff] (!%p163_p2)   ;;  %v8500_v45 = vld [vmem:[%s10476_s2 + $0xb0] sm:$0xff] (!%p163_p2)  }
   0xd   : > { %s10518_s16 = smov (!%p188_p3, %s6267_s16), 1  ;;  %7474 = vmatpush3.bf16.msra.mxu1 %v8490_v11  ;;  %v210_v42 = vsel %vm8897_vm5, 0, %v209_v38  ;;  %v8499_v44 = vld [vmem:[%s10476_s2 + $0x68] sm:$0xff]   ;;  %v8501_v46 = vld [vmem:[%s10476_s2 + $0x70] sm:$0xff]   ;;  %v8502_v47 = vld [vmem:[%s10476_s2 + $0xb8] sm:$0xff]  }
   0xe   : > { %s8451_s23 = smul.u32 144, %s10518_s16  ;;  %7475 = vmatprep.subr.bf16.mxu1 %v8492_v30  ;;  %211 = vst [vmem:[#allocation2 + $0x98] sm:$0xfe] %v210_v42  ;;  %v8503_v48 = vld [vmem:[%s10476_s2 + $0x78] sm:$0xff]   ;;  %v8929_v49 = vld [vmem:[%s10476_s2 + $0xc0] sm:$0xff]  }
   0xf   : > { %7328 = vmatpush3.bf16.msra.mxu0 %v8767_v2  ;;  %v8935_v50 = vld [vmem:[%s10476_s2] sm:$0xff]   ;;  %s8452_s17 = smul.u32 288, %s10518_s16 }
  0x10   : > { %s8773_s26 = scalar_lea.vmem %s10474_s0, %s8451_s23  ;;  %7329 = vmatprep.subr.bf16.mxu0 %v8779_v3  ;;  %v8546_v31 = vld [vmem:[%s10476_s2 + $0x20] sm:$0xff]  }
  0x11   : > { %v8470_v4 = vld [vmem:[%s8773_s26] sm:$0xff]   ;;  %v8471_v10 = vld [vmem:[%s8773_s26 + $0x8] sm:$0xff]   ;;  %v8472_v12 = vld [vmem:[%s8773_s26 + $0x10] sm:$0xff]   ;;  %7476 = vmatpush3.bf16.msra.mxu1 %v8492_v30  ;;  %s10345_s23 = scalar_lea.vmem %s10478_s4, %s8452_s17 }
  0x12   : > { %7339 = vmatprep.mubr.bf16.mxu0 %v8470_v4  ;;  %v8473_v13 = vld [vmem:[%s8773_s26 + $0x18] sm:$0xff]   ;;  %v8474_v14 = vld [vmem:[%s8773_s26 + $0x20] sm:$0xff]   ;;  %v8475_v15 = vld [vmem:[%s8773_s26 + $0x28] sm:$0xff]   ;;  %7477 = vmatprep.subr.bf16.mxu1 %v8494_v35 }
  0x13   : > { %7330 = vmatpush3.bf16.msra.mxu0 %v8779_v3  ;;  %v8476_v16 = vld [vmem:[%s8773_s26 + $0x30] sm:$0xff]   ;;  %v8477_v17 = vld [vmem:[%s8773_s26 + $0x38] sm:$0xff]   ;;  %v8478_v18 = vld [vmem:[%s8773_s26 + $0x40] sm:$0xff]  }
  0x14   : > { %7331 = vmatprep.subr.bf16.mxu0 %v8788_v5  ;;  %v8479_v19 = vld [vmem:[%s8773_s26 + $0x48] sm:$0xff]   ;;  %v8480_v20 = vld [vmem:[%s8773_s26 + $0x50] sm:$0xff]   ;;  %v8481_v21 = vld [vmem:[%s8773_s26 + $0x58] sm:$0xff]  }
  0x15   : > { %v8482_v22 = vld [vmem:[%s8773_s26 + $0x60] sm:$0xff]   ;;  %v8483_v23 = vld [vmem:[%s8773_s26 + $0x68] sm:$0xff]   ;;  %v8484_v24 = vld [vmem:[%s8773_s26 + $0x70] sm:$0xff]   ;;  %7478 = vmatpush3.bf16.msra.mxu1 %v8494_v35 }
  0x16   : > { %v8485_v25 = vld [vmem:[%s8773_s26 + $0x78] sm:$0xff]   ;;  %v8486_v26 = vld [vmem:[%s8773_s26 + $0x80] sm:$0xff]   ;;  %v8487_v28 = vld [vmem:[%s8773_s26 + $0x88] sm:$0xff]   ;;  %7479 = vmatprep.subr.bf16.mxu1 %v8496_v37 }
  0x17   : > { %7332 = vmatpush3.bf16.msra.mxu0 %v8788_v5 }
  0x18   : > { %7333 = vmatprep.subr.bf16.mxu0 %v8795_v6 }
  0x19   : > { %7480 = vmatpush3.bf16.msra.mxu1 %v8496_v37 }
  0x1a   : > { %7481 = vmatprep.subr.bf16.mxu1 %v8498_v41 }
  0x1b   : > { %7334 = vmatpush3.bf16.msra.mxu0 %v8795_v6 }
  0x1c   : > { %7335 = vmatprep.subr.bf16.mxu0 %v8802_v7 }
  0x1d   : > { %7482 = vmatpush3.bf16.msra.mxu1 %v8498_v41 }
  0x1e   : > { %7483 = vmatprep.subr.bf16.mxu1 %v8500_v45 }
  0x1f   : > { %7336 = vmatpush3.bf16.msra.mxu0 %v8802_v7 }
  0x20   : > { %7337 = vmatprep.subr.bf16.mxu0 %v8809_v8 }
  0x21   : > { %7484 = vmatpush3.bf16.msra.mxu1 %v8500_v45 }
  0x22   : > { %7485 = vmatprep.subr.bf16.mxu1 %v8502_v47 }
  0x23   : > { %7338 = vmatpush3.bf16.msra.mxu0 %v8809_v8 }
  0x24   : > { %7355 = vmatprep.subr.bf16.mxu0 %v8752_v0 }
  0x25   : > { %7486 = vmatpush3.bf16.msra.mxu1 %v8502_v47 }
  0x26   : > { %7340 = vmatmul.mubr.bf16.vlgmr.msra.gmra.mrb[0].mxu0 %v8471_v10  ;;  %7503 = vmatprep.subr.bf16.mxu1 %v8929_v49  ;;  %v543_v10 = vld [vmem:[#allocation2 + $0x8] sm:$0xfe] }
  0x27   : > { %7356 = vmatpush3.bf16.msra.mxu0 %v8752_v0  ;;  %7343 = vmatprep.mubr.bf16.mxu0 %v8472_v12 }
  0x28   : > { %7357 = vmatprep.subr.bf16.mxu0 %v8757_v1 }
  0x2b   : > { %7358 = vmatpush3.bf16.msra.mxu0 %v8757_v1 }
  0x2c   : > { %7359 = vmatprep.subr.bf16.mxu0 %v8767_v2 }
  0x2e   : > { %7344 = vmatmul.mubr.bf16.gmra.mrb[4].mxu0 %v8473_v13 }
  0x2f   : > { %7360 = vmatpush3.bf16.msra.mxu0 %v8767_v2  ;;  %7347 = vmatprep.mubr.bf16.mxu0 %v8474_v14 }
  0x30   : > { %7361 = vmatprep.subr.bf16.mxu0 %v8779_v3 }
  0x33   : > { %7362 = vmatpush3.bf16.msra.mxu0 %v8779_v3 }
  0x34   : > { %7363 = vmatprep.subr.bf16.mxu0 %v8788_v5 }
  0x36   : > { %7348 = vmatmul.mubr.bf16.gmra.mrb[8].mxu0 %v8475_v15 }
  0x37   : > { %7364 = vmatpush3.bf16.msra.mxu0 %v8788_v5  ;;  %7351 = vmatprep.mubr.bf16.mxu0 %v8476_v16 }
  0x38   : > { %7365 = vmatprep.subr.bf16.mxu0 %v8795_v6 }
  0x3b   : > { %7366 = vmatpush3.bf16.msra.mxu0 %v8795_v6 }
  0x3c   : > { %7367 = vmatprep.subr.bf16.mxu0 %v8802_v7 }
  0x3e   : > { %7352 = vmatmul.mubr.bf16.gmra.mrb[12].mxu0 %v8477_v17 }
  0x3f   : > { %7368 = vmatpush3.bf16.msra.mxu0 %v8802_v7  ;;  %7371 = vmatprep.mubr.bf16.mxu0 %v8478_v18 }
  0x40   : > { %7369 = vmatprep.subr.bf16.mxu0 %v8809_v8 }
  0x43   : > { %7370 = vmatpush3.bf16.msra.mxu0 %v8809_v8 }
  0x44   : > { %7387 = vmatprep.subr.bf16.mxu0 %v8752_v0 }
  0x46   : > { %7372 = vmatmul.mubr.bf16.vlgmr.msra.gmra.mrb[16].mxu0 %v8479_v19 }
  0x47   : > { %7375 = vmatprep.mubr.bf16.mxu0 %v8480_v20  ;;  %7388 = vmatpush3.bf16.msra.mxu0 %v8752_v0 }
  0x48   : > { %7389 = vmatprep.subr.bf16.mxu0 %v8757_v1 }
  0x4b   : > { %7390 = vmatpush3.bf16.msra.mxu0 %v8757_v1 }
  0x4c   : > { %7391 = vmatprep.subr.bf16.mxu0 %v8767_v2 }
  0x4e   : > { %7376 = vmatmul.mubr.bf16.gmra.mrb[20].mxu0 %v8481_v21 }
  0x4f   : > { %7379 = vmatprep.mubr.bf16.mxu0 %v8482_v22  ;;  %7392 = vmatpush3.bf16.msra.mxu0 %v8767_v2 }
  0x50   : > { %7393 = vmatprep.subr.bf16.mxu0 %v8779_v3 }
  0x53   : > { %7394 = vmatpush3.bf16.msra.mxu0 %v8779_v3 }
  0x54   : > { %7395 = vmatprep.subr.bf16.mxu0 %v8788_v5 }
  0x56   : > { %7380 = vmatmul.mubr.bf16.gmra.mrb[24].mxu0 %v8483_v23 }
  0x57   : > { %7383 = vmatprep.mubr.bf16.mxu0 %v8484_v24  ;;  %7396 = vmatpush3.bf16.msra.mxu0 %v8788_v5 }
  0x58   : > { %7397 = vmatprep.subr.bf16.mxu0 %v8795_v6 }
  0x5b   : > { %7398 = vmatpush3.bf16.msra.mxu0 %v8795_v6 }
  0x5c   : > { %7399 = vmatprep.subr.bf16.mxu0 %v8802_v7 }
  0x5e   : > { %7384 = vmatmul.mubr.bf16.gmra.mrb[28].mxu0 %v8485_v25 }
  0x5f   : > { %7400 = vmatpush3.bf16.msra.mxu0 %v8802_v7  ;;  %7403 = vmatprep.mubr.bf16.mxu0 %v8486_v26  ;;  %v1342_v26 = vld [vmem:[#allocation2] sm:$0xfe] }
  0x60   : > { %7401 = vmatprep.subr.bf16.mxu0 %v8809_v8  ;;  %v1370_v41 = vrot.slane %v1342_v26, 1  ;;  %v8508_v26 = vld [vmem:[%s10476_s2 + $0xd0] sm:$0xff]  }
  0x63   : > { %7402 = vmatpush3.bf16.msra.mxu0 %v8809_v8 }
  0x64   : > { %7407 = vmatprep.subr.bf16.mxu0 %v8489_v27 }
  0x66   : > { %7404 = vmatmul.mubr.bf16.vlgmr.msra.gmra.mrb[32].mxu0 %v8487_v28 }
  0x67   : > { %7408 = vmatpush3.bf16.msra.mxu0 %v8489_v27 }
  0x68   : > { %7409 = vmatprep.subr.bf16.mxu0 %v8491_v29 }
  0x6b   : > { %7410 = vmatpush3.bf16.msra.mxu0 %v8491_v29 }
  0x6c   : > { %7411 = vmatprep.subr.bf16.mxu0 %v8493_v33 }
  0x6f   : > { %7412 = vmatpush3.bf16.msra.mxu0 %v8493_v33 }
  0x70   : > { %7413 = vmatprep.subr.bf16.mxu0 %v8495_v36 }
  0x73   : > { %7414 = vmatpush3.bf16.msra.mxu0 %v8495_v36 }
  0x74   : > { %7415 = vmatprep.subr.bf16.mxu0 %v8497_v40 }
  0x77   : > { %7416 = vmatpush3.bf16.msra.mxu0 %v8497_v40 }
  0x78   : > { %7417 = vmatprep.subr.bf16.mxu0 %v8499_v44 }
  0x7b   : > { %7418 = vmatpush3.bf16.msra.mxu0 %v8499_v44 }
  0x7c   : > { %7419 = vmatprep.subr.bf16.mxu0 %v8501_v46 }
  0x7f   : > { %7420 = vmatpush3.bf16.msra.mxu0 %v8501_v46 }
  0x80   : > { %7421 = vmatprep.subr.bf16.mxu0 %v8503_v48 }
  0x83   : > { %7422 = vmatpush3.bf16.msra.mxu0 %v8503_v48 }
  0x84   : > { %7439 = vmatprep.subr.bf16.mxu0 %v8935_v50 }
  0xf9   : > { %v7341_v51 = vpop.f32.mrb[0].mxu0 }
  0xfa   : > { %v376_v52 = vpop.f32.mrb[1].mxu0  ;;  %v441_v54 = vmax.f32 %v7341_v51, 0.0 }
  0xfb   : > { %v7342_v53 = vpop.f32.mrb[2].mxu0  ;;  %v439_v57 = vmax.f32 %v376_v52, 0.0 }
  0xfc   : > { %v442_v55 = vmax.f32 %v7342_v53, 0.0  ;;  %v379_v56 = vpop.f32.mrb[3].mxu0 }
  0xfd   : > { %v440_v58 = vmax.f32 %v379_v56, 0.0 }
  0xfe   : > { %v456_v59 = vpack.c.bf16 %v442_v55, %v441_v54 }
  0xff   : > { %v455_v60 = vpack.c.bf16 %v440_v58, %v439_v57 }
 0x100   : > { %v472_v61 = vshrl.u32 %v456_v59, 16  ;;  %v475_v62 = vshll.u32 %v456_v59, 16 }
 0x101   : > { %v464_v63 = vshrl.u32 %v455_v60, 16  ;;  %v467_v0 = vshll.u32 %v455_v60, 16  ;;  %v7345_v1 = vpop.f32.mrb[4].mxu0 }
 0x102   : > { %v474_v2 = vrot.slane %v472_v61, 6  ;;  %v477_v3 = vrot.slane %v475_v62, 7  ;;  %v445_v4 = vmax.f32 %v7345_v1, 0.0  ;;  %v392_v5 = vpop.f32.mrb[5].mxu0 }
 0x103   : > { %v466_v6 = vrot.slane %v464_v63, 6  ;;  %v469_v7 = vrot.slane %v467_v0, 7  ;;  %v7346_v8 = vpop.f32.mrb[6].mxu0  ;;  %v443_v14 = vmax.f32 %v392_v5, 0.0 }
 0x104   : > { %v478_v9 = vor.u32 %v477_v3, %v474_v2  ;;  %v446_v11 = vmax.f32 %v7346_v8, 0.0  ;;  %v395_v12 = vpop.f32.mrb[7].mxu0 }
 0x105   : > { %v470_v13 = vor.u32 %v469_v7, %v466_v6  ;;  %v444_v15 = vmax.f32 %v395_v12, 0.0  ;;  %v8506_v6 = vld [vmem:[%s10476_s2 + $0xc8] sm:$0xff]  }
 0x106   : > { %v458_v16 = vpack.c.bf16 %v446_v11, %v445_v4 }
 0x107   : > { %v8939_v17 = vsel %vm201_vm1, %v470_v13, %v478_v9  ;;  %v544_v18 = vsel %vm8897_vm5, %v470_v13, %v543_v10  ;;  %v457_v19 = vpack.c.bf16 %v444_v15, %v443_v14 }
 0x108   : > { %545 = vst [vmem:[#allocation2 + $0x8] sm:$0xfe] %v544_v18  ;;  %546 = vst [vmem:[#allocation2 + $0x10] sm:$0xff] %v8939_v17  ;;  %v490_v20 = vshrl.u32 %v458_v16, 16  ;;  %v493_v21 = vshll.u32 %v458_v16, 16  ;;  %v992_v22 = vshll.u32 %v8939_v17, 16 }
 0x109   : > { %v481_v23 = vshrl.u32 %v457_v19, 16  ;;  %v484_v24 = vshll.u32 %v457_v19, 16  ;;  %v7349_v25 = vpop.f32.mrb[8].mxu0  ;;  %v996_v46 = vshrl.u32 %v8939_v17, 16  ;;  %v8952_v48 = vrot.slane %v8939_v17, 1 }
 0x10a   : > { %v492_v27 = vrot.slane %v490_v20, 6  ;;  %v495_v28 = vrot.slane %v493_v21, 7  ;;  %v449_v29 = vmax.f32 %v7349_v25, 0.0  ;;  %v408_v30 = vpop.f32.mrb[9].mxu0  ;;  %v8948_v36 = vrot.slane %v992_v22, 1 }
 0x10b   : > { %v483_v33 = vrot.slane %v481_v23, 6  ;;  %v486_v34 = vrot.slane %v484_v24, 7  ;;  %v7350_v35 = vpop.f32.mrb[10].mxu0  ;;  %v447_v44 = vmax.f32 %v408_v30, 0.0  ;;  %v8507_v30 = vld [vmem:[%s10476_s2 + $0x8] sm:$0xff]  }
 0x10c   : > { %v496_v37 = vor.u32 %v495_v28, %v492_v27  ;;  %v450_v38 = vmax.f32 %v7350_v35, 0.0  ;;  %v411_v40 = vpop.f32.mrb[11].mxu0  ;;  %v8965_v55 = vor.u32 %v996_v46, %v8948_v36 }
 0x10d   : > { %v487_v42 = vor.u32 %v486_v34, %v483_v33  ;;  %v448_v45 = vmax.f32 %v411_v40, 0.0 }
 0x10e   : > { %v460_v47 = vpack.c.bf16 %v450_v38, %v449_v29  ;;  %v553_v38 = vld [vmem:[#allocation2 + $0x48] sm:$0x3] }
 0x10f   : > { %v8955_v51 = vsel %vm201_vm1, %v478_v9, %v487_v42  ;;  %v8958_v52 = vsel %vm201_vm1, %v487_v42, %v496_v37  ;;  %v459_v53 = vpack.c.bf16 %v448_v45, %v447_v44  ;;  %v8960_v54 = vld [vmem:[#allocation2 + $0x8] sm:$0xff] }
 0x110   : > { %547 = vst [vmem:[#allocation2 + $0x18] sm:$0xff] %v8955_v51  ;;  %548 = vst [vmem:[#allocation2 + $0x20] sm:$0xff] %v8958_v52  ;;  %v508_v56 = vshrl.u32 %v460_v47, 16  ;;  %v511_v57 = vshll.u32 %v460_v47, 16  ;;  %v1371_v58 = vrot.slane %v8960_v54, 1  ;;  %v984_v59 = vshll.u32 %v8960_v54, 16 }
 0x111   : > { %v499_v60 = vshrl.u32 %v459_v53, 16  ;;  %v502_v61 = vshll.u32 %v459_v53, 16  ;;  %v7353_v62 = vpop.f32.mrb[12].mxu0  ;;  %v988_v63 = vshrl.u32 %v8960_v54, 16  ;;  %v1375_v0 = vrot.slane %v8955_v51, 1 }
 0x112   : > { %v510_v1 = vrot.slane %v508_v56, 6  ;;  %v513_v2 = vrot.slane %v511_v57, 7  ;;  %v453_v3 = vmax.f32 %v7353_v62, 0.0  ;;  %v424_v4 = vpop.f32.mrb[13].mxu0  ;;  %v1372_v5 = vsel %vm1369_vm6, %v1370_v41, %v1371_v58 }
 0x113   : > { %v501_v7 = vrot.slane %v499_v60, 6  ;;  %v504_v8 = vrot.slane %v502_v61, 7  ;;  %v451_v9 = vmax.f32 %v424_v4, 0.0  ;;  %v7354_v10 = vpop.f32.mrb[14].mxu0  ;;  %7487 = vmatprep.mubr.bf16.mxu1 %v1372_v5  ;;  %v1374_v11 = vsel %vm1369_vm6, %v1371_v58, %v8952_v48  ;;  %v8510_v58 = vld [vmem:[%s10476_s2 + $0xd8] sm:$0xff]  }
 0x114   : > { %v8979_v12 = vor.u32 %v513_v2, %v510_v1  ;;  %v454_v13 = vmax.f32 %v7354_v10, 0.0  ;;  %v427_v14 = vpop.f32.mrb[15].mxu0  ;;  %7488 = vmatmul.mubr.bf16.vlgmr.msra.gmra.mrb[0].mxu1 %v1374_v11  ;;  %v986_v15 = vrot.slane %v984_v59, 1  ;;  %v8983_v16 = vsel %vm1369_vm6, %v8952_v48, %v1375_v0  ;;  %v8512_v11 = vld [vmem:[%s10476_s2 + $0xe0] sm:$0xff]  }
 0x115   : > { %v505_v18 = vor.u32 %v504_v8, %v501_v7  ;;  %v452_v19 = vmax.f32 %v427_v14, 0.0  ;;  %7504 = vmatpush3.bf16.msra.mxu1 %v8929_v49  ;;  %7491 = vmatprep.mubr.bf16.mxu1 %v8983_v16  ;;  %v1377_v20 = vrot.slane %v8958_v52, 1  ;;  %v1000_v21 = vshll.u32 %v8955_v51, 16 }
 0x116   : > { %v462_v23 = vpack.c.bf16 %v454_v13, %v453_v3  ;;  %v987_v24 = vsel %vm975_vm7, %v981_v32, %v986_v15  ;;  %v990_v25 = vor.u32 %v988_v63, %v986_v15  ;;  %7505 = vmatprep.subr.bf16.mxu1 %v8506_v6  ;;  %v1004_v27 = vshrl.u32 %v8955_v51, 16 }
 0x117   : > { %v8995_v28 = vsel %vm201_vm1, %v496_v37, %v505_v18  ;;  %v8999_v49 = vsel %vm201_vm1, %v505_v18, %v8979_v12  ;;  %v461_v29 = vpack.c.bf16 %v452_v19, %v451_v9  ;;  %7423 = vmatprep.mubr.bf16.mxu0 %v987_v24  ;;  %v9005_v32 = vsel %vm1369_vm6, %v1375_v0, %v1377_v20  ;;  %v8511_v19 = vld [vmem:[%s10476_s2 + $0x18] sm:$0xff]  }
 0x118   : > { %549 = vst [vmem:[#allocation2 + $0x28] sm:$0xff] %v8995_v28  ;;  %550 = vst [vmem:[#allocation2 + $0x30] sm:$0xff] %v8999_v49  ;;  %v526_v33 = vshrl.u32 %v462_v23, 16  ;;  %v529_v34 = vshll.u32 %v462_v23, 16  ;;  %v995_v35 = vsel %vm975_vm7, %v990_v25, %v8948_v36  ;;  %v1002_v37 = vrot.slane %v1000_v21, 1 }
 0x119   : > { %v517_v40 = vshrl.u32 %v461_v29, 16  ;;  %v520_v41 = vshll.u32 %v461_v29, 16  ;;  %7424 = vmatmul.mubr.bf16.vlgmr.msra.gmra.mrb[36].mxu0 %v995_v35  ;;  %7506 = vmatpush3.bf16.msra.mxu1 %v8506_v6  ;;  %v7373_v42 = vpop.f32.mrb[16].mxu0  ;;  %v1008_v44 = vshll.u32 %v8958_v52, 16  ;;  %v1379_v45 = vrot.slane %v8995_v28, 1 }
 0x11a   : > { %v528_v47 = vrot.slane %v526_v33, 6  ;;  %v531_v53 = vrot.slane %v529_v34, 7  ;;  %7440 = vmatpush3.bf16.msra.mxu0 %v8935_v50  ;;  %v719_v56 = vmax.f32 %v7373_v42, 0.0  ;;  %v654_v57 = vpop.f32.mrb[17].mxu0  ;;  %7507 = vmatprep.subr.bf16.mxu1 %v8508_v26  ;;  %v1003_v36 = vsel %vm975_vm7, %v8965_v55, %v1002_v37  ;;  %v8509_v50 = vld [vmem:[%s10476_s2 + $0x10] sm:$0xff]  }
 0x11b   : > { %v519_v59 = vrot.slane %v517_v40, 6  ;;  %v522_v60 = vrot.slane %v520_v41, 7  ;;  %v717_v61 = vmax.f32 %v654_v57, 0.0  ;;  %v7374_v62 = vpop.f32.mrb[18].mxu0  ;;  %7441 = vmatprep.subr.bf16.mxu0 %v8507_v30  ;;  %7427 = vmatprep.mubr.bf16.mxu0 %v1003_v36  ;;  %v1006_v63 = vor.u32 %v1004_v27, %v1002_v37  ;;  %v8514_v40 = vld [vmem:[%s10476_s2 + $0xe8] sm:$0xff]   ;;  %v8513_v57 = vld [vmem:[%s10476_s2 + $0x20] sm:$0xff]  }
 0x11c   : > { %v532_v0 = vor.u32 %v531_v53, %v528_v47  ;;  %v720_v1 = vmax.f32 %v7374_v62, 0.0  ;;  %v657_v55 = vpop.f32.mrb[19].mxu0  ;;  %7492 = vmatmul.mubr.bf16.gmra.mrb[4].mxu1 %v9005_v32  ;;  %v1010_v2 = vrot.slane %v1008_v44, 1  ;;  %v9030_v3 = vsel %vm1369_vm6, %v1377_v20, %v1379_v45 }
 0x11d   : > { %v523_v4 = vor.u32 %v522_v60, %v519_v59  ;;  %v718_v5 = vmax.f32 %v657_v55, 0.0  ;;  %7508 = vmatpush3.bf16.msra.mxu1 %v8508_v26  ;;  %7495 = vmatprep.mubr.bf16.mxu1 %v9030_v3  ;;  %v1381_v6 = vrot.slane %v8999_v49, 1  ;;  %v1012_v7 = vshrl.u32 %v8958_v52, 16  ;;  %v8516_v55 = vld [vmem:[%s10476_s2 + $0xf0] sm:$0xff]  }
 0x11e   : > { %v554_v8 = vsel %vm8879_vm2, %v532_v0, %v553_v38  ;;  %v734_v9 = vpack.c.bf16 %v720_v1, %v719_v56  ;;  %7442 = vmatpush3.bf16.msra.mxu0 %v8507_v30  ;;  %v1011_v10 = vsel %vm975_vm7, %v1006_v63, %v1010_v2  ;;  %7509 = vmatprep.subr.bf16.mxu1 %v8510_v58  ;;  %v1016_v13 = vshll.u32 %v8995_v28, 16 }
 0x11f   : > { %555 = vst [vmem:[#allocation2 + $0x48] sm:$0x3] %v554_v8  ;;  %v9044_v14 = vsel %vm201_vm1, %v8979_v12, %v523_v4  ;;  %v9047_v15 = vsel %vm201_vm1, %v523_v4, %v532_v0  ;;  %v733_v18 = vpack.c.bf16 %v718_v5, %v717_v61  ;;  %7443 = vmatprep.subr.bf16.mxu0 %v8509_v50  ;;  %v1020_v30 = vshrl.u32 %v8995_v28, 16  ;;  %v9088_v0 = vld [vmem:[#allocation2 + $0x8] sm:$0xfe] }
 0x120   : > { %v9053_v20 = vsel %vm1369_vm6, %v1379_v45, %v1381_v6  ;;  %551 = vst [vmem:[#allocation2 + $0x38] sm:$0xff] %v9044_v14  ;;  %552 = vst [vmem:[#allocation2 + $0x40] sm:$0xff] %v9047_v15  ;;  %v750_v23 = vshrl.u32 %v734_v9, 16  ;;  %v753_v24 = vshll.u32 %v734_v9, 16  ;;  %v1014_v12 = vor.u32 %v1012_v7, %v1010_v2  ;;  %v8515_v9 = vld [vmem:[%s10476_s2 + $0x28] sm:$0xff]  }
 0x121   : > { %v1018_v25 = vrot.slane %v1016_v13, 1  ;;  %v742_v26 = vshrl.u32 %v733_v18, 16  ;;  %v745_v29 = vshll.u32 %v733_v18, 16  ;;  %7428 = vmatmul.mubr.bf16.gmra.mrb[40].mxu0 %v1011_v10  ;;  %7510 = vmatpush3.bf16.msra.mxu1 %v8510_v58  ;;  %v1024_v33 = vshll.u32 %v8999_v49, 16  ;;  %v7377_v34 = vpop.f32.mrb[20].mxu0 }
 0x122   : > { %v752_v35 = vrot.slane %v750_v23, 6  ;;  %v755_v37 = vrot.slane %v753_v24, 7  ;;  %7444 = vmatpush3.bf16.msra.mxu0 %v8509_v50  ;;  %7511 = vmatprep.subr.bf16.mxu1 %v8512_v11  ;;  %v9068_v41 = vrot.slane %v9044_v14, 1  ;;  %v670_v42 = vpop.f32.mrb[21].mxu0  ;;  %v1028_v60 = vshrl.u32 %v8999_v49, 16 }
 0x123   : > { %v1019_v38 = vsel %vm975_vm7, %v1014_v12, %v1018_v25  ;;  %v744_v45 = vrot.slane %v742_v26, 6  ;;  %v747_v47 = vrot.slane %v745_v29, 7  ;;  %7445 = vmatprep.subr.bf16.mxu0 %v8511_v19  ;;  %v1022_v53 = vor.u32 %v1020_v30, %v1018_v25  ;;  %v7378_v36 = vpop.f32.mrb[22].mxu0 }
 0x124   : > { %7431 = vmatprep.mubr.bf16.mxu0 %v1019_v38  ;;  %v1026_v56 = vrot.slane %v1024_v33, 1  ;;  %v9077_v58 = vor.u32 %v755_v37, %v752_v35  ;;  %7496 = vmatmul.mubr.bf16.gmra.mrb[8].mxu1 %v9053_v20  ;;  %v9082_v59 = vsel %vm1369_vm6, %v1381_v6, %v9068_v41  ;;  %v1032_v61 = vshll.u32 %v9044_v14, 16  ;;  %v673_v62 = vpop.f32.mrb[23].mxu0  ;;  %v8518_v35 = vld [vmem:[%s10476_s2 + $0xf8] sm:$0xff]  }
 0x125   : > { %v748_v63 = vor.u32 %v747_v47, %v744_v45  ;;  %7512 = vmatpush3.bf16.msra.mxu1 %v8512_v11  ;;  %7499 = vmatprep.mubr.bf16.mxu1 %v9082_v59  ;;  %v723_v5 = vmax.f32 %v7377_v34, 0.0  ;;  %v721_v11 = vmax.f32 %v670_v42, 0.0  ;;  %v724_v18 = vmax.f32 %v7378_v36, 0.0 }
 0x126   : > { %v1027_v50 = vsel %vm975_vm7, %v1022_v53, %v1026_v56  ;;  %v821_v1 = vld [vmem:[#allocation2 + $0x48] sm:$0xfe]  ;;  %7446 = vmatpush3.bf16.msra.mxu0 %v8511_v19  ;;  %7513 = vmatprep.subr.bf16.mxu1 %v8514_v40  ;;  %v1030_v2 = vor.u32 %v1028_v60, %v1026_v56  ;;  %v1034_v4 = vrot.slane %v1032_v61, 1  ;;  %v1591_v24 = vrot.slane %v9088_v0, 1 }
 0x127   : > { %v9099_v6 = vsel %vm201_vm1, %v748_v63, %v9077_v58  ;;  %v822_v8 = vsel %vm8897_vm5, %v748_v63, %v821_v1  ;;  %7447 = vmatprep.subr.bf16.mxu0 %v8513_v57  ;;  %v957_v10 = vld [vmem:[#allocation2 + $0x40] sm:$0x1]  ;;  %v736_v25 = vpack.c.bf16 %v724_v18, %v723_v5  ;;  %v722_v26 = vmax.f32 %v673_v62, 0.0 }
 0x128   : > { %823 = vst [vmem:[#allocation2 + $0x48] sm:$0xfe] %v822_v8  ;;  %824 = vst [vmem:[#allocation2 + $0x50] sm:$0xff] %v9099_v6  ;;  %v1385_v19 = vrot.slane %v957_v10, 1  ;;  %v1035_v23 = vsel %vm975_vm7, %v1030_v2, %v1034_v4  ;;  %v1040_v12 = vshll.u32 %v957_v10, 16  ;;  %v1036_v42 = vshrl.u32 %v9044_v14, 16 }
 0x129   : > { %7432 = vmatmul.mubr.bf16.gmra.mrb[44].mxu0 %v1027_v50  ;;  %7514 = vmatpush3.bf16.msra.mxu1 %v8514_v40  ;;  %v7381_v29 = vpop.f32.mrb[24].mxu0  ;;  %v8517_v40 = vld [vmem:[%s10476_s2 + $0x30] sm:$0xff]   ;;  %v768_v45 = vshrl.u32 %v736_v25, 16  ;;  %v771_v47 = vshll.u32 %v736_v25, 16  ;;  %v735_v53 = vpack.c.bf16 %v722_v26, %v721_v11  ;;  %v8520_v11 = vld [vmem:[%s10476_s2 + $0x100] sm:$0xff]  }
 0x12a   : > { %7448 = vmatpush3.bf16.msra.mxu0 %v8513_v57  ;;  %7515 = vmatprep.subr.bf16.mxu1 %v8516_v55  ;;  %v1386_v34 = vsel %vm1369_vm6, %v9068_v41, %v1385_v19  ;;  %v727_v37 = vmax.f32 %v7381_v29, 0.0  ;;  %v686_v38 = vpop.f32.mrb[25].mxu0  ;;  %v1593_v57 = vsel %vm1369_vm6, %v1591_v24, %v8952_v48  ;;  %v1042_v36 = vrot.slane %v1040_v12, 1 }
 0x12b   : > { %7449 = vmatprep.subr.bf16.mxu0 %v8515_v9  ;;  %7435 = vmatprep.mubr.bf16.mxu0 %v1035_v23  ;;  %v7382_v56 = vpop.f32.mrb[26].mxu0  ;;  %v725_v62 = vmax.f32 %v686_v38, 0.0  ;;  %v770_v1 = vrot.slane %v768_v45, 6  ;;  %v773_v2 = vrot.slane %v771_v47, 7  ;;  %v759_v5 = vshrl.u32 %v735_v53, 16 }
 0x12c   : > { %7500 = vmatmul.mubr.bf16.gmra.mrb[12].mxu1 %v1386_v34  ;;  %v728_v63 = vmax.f32 %v7382_v56, 0.0  ;;  %v689_v50 = vpop.f32.mrb[27].mxu0  ;;  %v762_v8 = vshll.u32 %v735_v53, 16  ;;  %v1038_v10 = vor.u32 %v1036_v42, %v1034_v4  ;;  %v8521_v34 = vld [vmem:[%s10476_s2 + $0x108] sm:$0xff]  }
 0x12d   : > { %7516 = vmatpush3.bf16.msra.mxu1 %v8516_v55  ;;  %7519 = vmatprep.mubr.bf16.mxu1 %v1593_v57  ;;  %v726_v18 = vmax.f32 %v689_v50, 0.0  ;;  %v8519_v55 = vld [vmem:[%s10476_s2 + $0x38] sm:$0xff]   ;;  %v774_v19 = vor.u32 %v773_v2, %v770_v1  ;;  %v761_v23 = vrot.slane %v759_v5, 6  ;;  %v1810_v50 = vrot.slane %v992_v22, 2 }
 0x12e   : > { %7450 = vmatpush3.bf16.msra.mxu0 %v8515_v9  ;;  %7517 = vmatprep.subr.bf16.mxu1 %v8518_v35  ;;  %v738_v48 = vpack.c.bf16 %v728_v63, %v727_v37  ;;  %v764_v24 = vrot.slane %v762_v8, 7  ;;  %v1043_v9 = vsel %vm975_vm7, %v1038_v10, %v1042_v36  ;;  %v8523_v10 = vld [vmem:[%s10476_s2 + $0x110] sm:$0xff]   ;;  %v1816_v22 = vrot.slane %v1004_v27, 1 }
 0x12f   : > { %7451 = vmatprep.subr.bf16.mxu0 %v8517_v40  ;;  %v737_v4 = vpack.c.bf16 %v726_v18, %v725_v62 }
 0x130   : > { %v786_v12 = vshrl.u32 %v738_v48, 16  ;;  %v789_v25 = vshll.u32 %v738_v48, 16  ;;  %v765_v26 = vor.u32 %v764_v24, %v761_v23 }
 0x131   : > { %7436 = vmatmul.mubr.bf16.gmra.mrb[48].mxu0 %v1043_v9  ;;  %7518 = vmatpush3.bf16.msra.mxu1 %v8518_v35  ;;  %v7385_v29 = vpop.f32.mrb[28].mxu0  ;;  %v777_v45 = vshrl.u32 %v737_v4, 16  ;;  %v780_v47 = vshll.u32 %v737_v4, 16  ;;  %v8522_v35 = vld [vmem:[%s10476_s2 + $0x40] sm:$0xff]  }
 0x132   : > { %7452 = vmatpush3.bf16.msra.mxu0 %v8517_v40  ;;  %7535 = vmatprep.subr.bf16.mxu1 %v8520_v11  ;;  %v788_v37 = vrot.slane %v786_v12, 6  ;;  %v791_v38 = vrot.slane %v789_v25, 7  ;;  %v702_v53 = vpop.f32.mrb[29].mxu0  ;;  %v9138_v40 = vsel %vm201_vm1, %v9077_v58, %v765_v26  ;;  %v9141_v56 = vsel %vm201_vm1, %v765_v26, %v774_v19 }
 0x133   : > { %7453 = vmatprep.subr.bf16.mxu0 %v8519_v55  ;;  %7455 = vmatprep.mubr.bf16.mxu0 %v8715_v43  ;;  %v7386_v57 = vpop.f32.mrb[30].mxu0  ;;  %825 = vst [vmem:[#allocation2 + $0x58] sm:$0xff] %v9138_v40  ;;  %826 = vst [vmem:[#allocation2 + $0x60] sm:$0xff] %v9141_v56  ;;  %v779_v43 = vrot.slane %v777_v45, 6  ;;  %v782_v62 = vrot.slane %v780_v47, 7  ;;  %v1807_v58 = vrot.slane %v996_v46, 1 }
 0x134   : > { %7520 = vmatmul.mubr.bf16.vlgmr.msra.gmra.mrb[0].mxu1 %v8983_v16  ;;  %v9146_v36 = vor.u32 %v791_v38, %v788_v37  ;;  %v705_v63 = vpop.f32.mrb[31].mxu0  ;;  %v731_v1 = vmax.f32 %v7385_v29, 0.0  ;;  %v729_v16 = vmax.f32 %v702_v53, 0.0  ;;  %v732_v5 = vmax.f32 %v7386_v57, 0.0  ;;  %v8524_v46 = vld [vmem:[%s10476_s2 + $0x48] sm:$0xff]  }
 0x135   : > { %7536 = vmatpush3.bf16.msra.mxu1 %v8520_v11  ;;  %7523 = vmatprep.mubr.bf16.mxu1 %v9005_v32  ;;  %v783_v2 = vor.u32 %v782_v62, %v779_v43  ;;  %v730_v8 = vmax.f32 %v705_v63, 0.0  ;;  %v1819_v32 = vrot.slane %v1000_v21, 2  ;;  %v1825_v11 = vrot.slane %v1012_v7, 1  ;;  %v831_v57 = vld [vmem:[#allocation2 + $0x88] sm:$0x3] }
 0x136   : > { %7454 = vmatpush3.bf16.msra.mxu0 %v8519_v55  ;;  %7537 = vmatprep.subr.bf16.mxu1 %v8521_v34  ;;  %v740_v55 = vpack.c.bf16 %v732_v5, %v731_v1  ;;  %v9175_v21 = vor.u32 %v1810_v50, %v1807_v58  ;;  %v1828_v7 = vrot.slane %v1008_v44, 2  ;;  %v8526_v44 = vld [vmem:[%s10476_s2 + $0x50] sm:$0xff]   ;;  %v1846_v58 = vrot.slane %v1024_v33, 2  ;;  %v8528_v50 = vld [vmem:[%s10476_s2 + $0x58] sm:$0xff]  }
 0x137   : > { %7695 = vmatprep.subr.bf16.mxu0 %v8522_v35  ;;  %v9166_v48 = vsel %vm201_vm1, %v774_v19, %v783_v2  ;;  %v9170_v18 = vsel %vm201_vm1, %v783_v2, %v9146_v36  ;;  %v739_v23 = vpack.c.bf16 %v730_v8, %v729_v16  ;;  %v1820_v27 = vor.u32 %v1819_v32, %v1816_v22  ;;  %v8530_v32 = vld [vmem:[%s10476_s2 + $0x60] sm:$0xff]  }
 0x138   : > { %827 = vst [vmem:[#allocation2 + $0x68] sm:$0xff] %v9166_v48  ;;  %828 = vst [vmem:[#allocation2 + $0x70] sm:$0xff] %v9170_v18  ;;  %v1834_v19 = vrot.slane %v1020_v30, 1  ;;  %v804_v9 = vshrl.u32 %v740_v55, 16  ;;  %v807_v12 = vshll.u32 %v740_v55, 16  ;;  %v1829_v29 = vor.u32 %v1828_v7, %v1825_v11  ;;  %v9251_v7 = vld [vmem:[#allocation2 + $0x48] sm:$0xff] }
 0x139   : > { %7456 = vmatmul.mubr.bf16.vlgmr.msra.gmra.mrb[36].mxu0 %v8960_v54  ;;  %7538 = vmatpush3.bf16.msra.mxu1 %v8521_v34  ;;  %v9181_v24 = vpop.f32.mrb[32].mxu0  ;;  %v8525_v54 = vld [vmem:[%s10476_s2 + $0x118] sm:$0xff]   ;;  %v795_v25 = vshrl.u32 %v739_v23, 16  ;;  %v798_v4 = vshll.u32 %v739_v23, 16  ;;  %v9194_v30 = vsel %vm1795_vm8, %v9175_v21, %v1820_v27  ;;  %v1837_v34 = vrot.slane %v1016_v13, 2 }
 0x13a   : > { %7459 = vmatprep.mubr.bf16.mxu0 %v8939_v17  ;;  %7696 = vmatpush3.bf16.msra.mxu0 %v8522_v35  ;;  %v9187_v26 = vpop.f32.mrb[33].mxu0  ;;  %v806_v38 = vrot.slane %v804_v9, 6  ;;  %v809_v45 = vrot.slane %v807_v12, 7  ;;  %v9205_v43 = vsel %vm1795_vm8, %v1820_v27, %v1829_v29  ;;  %v1843_v13 = vrot.slane %v1028_v60, 1 }
 0x13b   : > { %7539 = vmatprep.subr.bf16.mxu1 %v8523_v10  ;;  %7697 = vmatprep.subr.bf16.mxu0 %v8524_v46  ;;  %v9198_v37 = vpop.f32.mrb[34].mxu0  ;;  %v797_v47 = vrot.slane %v795_v25, 6  ;;  %v800_v53 = vrot.slane %v798_v4, 7  ;;  %v1838_v62 = vor.u32 %v1837_v34, %v1834_v19  ;;  %v1604_v1 = vrot.slane %v9047_v15, 1 }
 0x13c   : > { %7524 = vmatmul.mubr.bf16.gmra.mrb[4].mxu1 %v9030_v3  ;;  %v9201_v35 = vpop.f32.mrb[35].mxu0  ;;  %v810_v3 = vor.u32 %v809_v45, %v806_v38  ;;  %v1797_v60 = vshrl.u32 %v9088_v0, 16  ;;  %v1800_v16 = vshll.u32 %v9088_v0, 16  ;;  %v1852_v0 = vrot.slane %v1036_v42, 1  ;;  %v1564_v42 = vld [vmem:[#allocation2 + $0x48] sm:$0x1] }
 0x13d   : > { %7540 = vmatpush3.bf16.msra.mxu1 %v8523_v10  ;;  %7527 = vmatprep.mubr.bf16.mxu1 %v9053_v20  ;;  %v801_v63 = vor.u32 %v800_v53, %v797_v47  ;;  %v8527_v20 = vld [vmem:[%s10476_s2 + $0x120] sm:$0xff]   ;;  %v9221_v2 = vsel %vm1795_vm8, %v1829_v29, %v1838_v62  ;;  %v1847_v10 = vor.u32 %v1846_v58, %v1843_v13  ;;  %v1855_v22 = vrot.slane %v1032_v61, 2  ;;  %v8533_v29 = vld [vmem:[%s10476_s2 + $0x138] sm:$0xff]   ;;  %v8534_v38 = vld [vmem:[%s10476_s2 + $0x70] sm:$0xff]  }
 0x13e   : > { %7698 = vmatpush3.bf16.msra.mxu0 %v8524_v46  ;;  %7541 = vmatprep.subr.bf16.mxu1 %v8525_v54  ;;  %v832_v33 = vsel %vm8879_vm2, %v810_v3, %v831_v57  ;;  %v1605_v11 = vsel %vm1369_vm6, %v9068_v41, %v1604_v1  ;;  %v1799_v55 = vrot.slane %v1797_v60, 1  ;;  %v1802_v23 = vrot.slane %v1800_v16, 2  ;;  %v8531_v41 = vld [vmem:[%s10476_s2 + $0x130] sm:$0xff]   ;;  %v8535_v58 = vld [vmem:[%s10476_s2 + $0x140] sm:$0xff]  }
 0x13f   : > { %7699 = vmatprep.subr.bf16.mxu0 %v8526_v44  ;;  %v9227_v5 = vsel %vm201_vm1, %v9146_v36, %v801_v63  ;;  %v811_v8 = vsel %vm201_vm1, %v801_v63, %v810_v3  ;;  %833 = vst [vmem:[#allocation2 + $0x88] sm:$0x3] %v832_v33  ;;  %v8529_v36 = vld [vmem:[%s10476_s2 + $0x128] sm:$0xff]   ;;  %v9239_v46 = vsel %vm1795_vm8, %v1838_v62, %v1847_v10  ;;  %v1606_v61 = vrot.slane %v1564_v42, 1 }
 0x140   : > { %829 = vst [vmem:[#allocation2 + $0x78] sm:$0xff] %v9227_v5  ;;  %830 = vst [vmem:[#allocation2 + $0x80] sm:$0xff] %v811_v8  ;;  %v9249_v27 = vor.u32 %v1855_v22, %v1852_v0  ;;  %v1803_v9 = vor.u32 %v1802_v23, %v1799_v55  ;;  %v10492_v12 = vshll.u32 %v9251_v7, 16  ;;  %v2067_v25 = vrot.slane %v8939_v17, 2  ;;  %v8537_v8 = vld [vmem:[%s10476_s2 + $0x148] sm:$0xff]   ;;  %v8538_v0 = vld [vmem:[%s10476_s2] sm:$0xff]  }
 0x141   : > { %7460 = vmatmul.mubr.bf16.gmra.mrb[40].mxu0 %v8955_v51  ;;  %7542 = vmatpush3.bf16.msra.mxu1 %v8525_v54  ;;  %v3030_v54 = vshll.u32 %v9047_v15, 16  ;;  %v2069_v4 = vrot.slane %v8955_v51, 2  ;;  %v2071_v34 = vrot.slane %v8958_v52, 2  ;;  %v2073_v47 = vrot.slane %v8995_v28, 2  ;;  %v8551_v17 = vld [vmem:[%s10476_s2 + $0x180] sm:$0xff]  }
 0x142   : > { %7463 = vmatprep.mubr.bf16.mxu0 %v8958_v52  ;;  %7700 = vmatpush3.bf16.msra.mxu0 %v8526_v44  ;;  %v9255_v19 = vsel %vm1795_vm8, %v1847_v10, %v9249_v27  ;;  %v1607_v44 = vsel %vm1369_vm6, %v1604_v1, %v1606_v61  ;;  %v2075_v53 = vrot.slane %v8999_v49, 2  ;;  %v1812_v52 = vsel %vm1795_vm8, %v1803_v9, %v9175_v21  ;;  %v8539_v61 = vld [vmem:[%s10476_s2 + $0x150] sm:$0xff]  }
 0x143   : > { %7543 = vmatprep.subr.bf16.mxu1 %v8527_v20  ;;  %7701 = vmatprep.subr.bf16.mxu0 %v8528_v50  ;;  %v3032_v51 = vrot.slane %v3030_v54, 1  ;;  %v9282_v45 = vsel %vm2065_vm9, %v2067_v25, %v2069_v4  ;;  %v3028_v57 = vshrl.u32 %v9047_v15, 16  ;;  %v9290_v62 = vsel %vm2065_vm9, %v2069_v4, %v2071_v34 }
 0x144   : > { %7528 = vmatmul.mubr.bf16.gmra.mrb[8].mxu1 %v9082_v59  ;;  %v8532_v59 = vld [vmem:[%s10476_s2 + $0x68] sm:$0xff]   ;;  %v3037_v13 = vrot.slane %v10492_v12, 1  ;;  %v9295_v3 = vsel %vm2065_vm9, %v2071_v34, %v2073_v47  ;;  %v3043_v21 = vshll.u32 %v9099_v6, 16  ;;  %v3047_v1 = vshrl.u32 %v9099_v6, 16 }
 0x145   : > { %7544 = vmatpush3.bf16.msra.mxu1 %v8527_v20  ;;  %7531 = vmatprep.mubr.bf16.mxu1 %v1605_v11  ;;  %v3033_v63 = vor.u32 %v3032_v51, %v3028_v57  ;;  %v8536_v20 = vld [vmem:[%s10476_s2 + $0x78] sm:$0xff]   ;;  %v3051_v60 = vshll.u32 %v9138_v40, 16  ;;  %v3039_v33 = vshrl.u32 %v9251_v7, 16  ;;  %v3055_v42 = vshrl.u32 %v9138_v40, 16 }
 0x146   : > { %7702 = vmatpush3.bf16.msra.mxu0 %v8528_v50  ;;  %7545 = vmatprep.subr.bf16.mxu1 %v8529_v36  ;;  %v3045_v10 = vrot.slane %v3043_v21, 1  ;;  %v3059_v11 = vshll.u32 %v9141_v56, 16  ;;  %v901_v55 = vmax.f32 %v9181_v24, 0.0  ;;  %v899_v23 = vmax.f32 %v9187_v26, 0.0 }
 0x147   : > { %7703 = vmatprep.subr.bf16.mxu0 %v8530_v32  ;;  %v3038_v16 = vsel %vm975_vm7, %v3033_v63, %v3037_v13  ;;  %v3067_v24 = vshll.u32 %v9166_v48, 16  ;;  %v1864_v34 = vrot.slane %v3030_v54, 2  ;;  %v9353_v54 = vld [vmem:[#allocation2 + $0x48] sm:$0x3] }
 0x148   : > { %v3049_v22 = vor.u32 %v3047_v1, %v3045_v10 }
 0x149   : > { %7464 = vmatmul.mubr.bf16.gmra.mrb[44].mxu0 %v8995_v28  ;;  %7546 = vmatpush3.bf16.msra.mxu1 %v8529_v36  ;;  %v9298_v28 = vsel %vm2065_vm9, %v2073_v47, %v2075_v53  ;;  %v3041_v36 = vor.u32 %v3039_v33, %v3037_v13  ;;  %v8542_v13 = vld [vmem:[%s10476_s2 + $0x10] sm:$0xff]   ;;  %v3069_v21 = vrot.slane %v3067_v24, 1 }
 0x14a   : > { %7467 = vmatprep.mubr.bf16.mxu0 %v8999_v49  ;;  %7704 = vmatpush3.bf16.msra.mxu0 %v8530_v32  ;;  %v2077_v49 = vrot.slane %v9044_v14, 2  ;;  %v3053_v32 = vrot.slane %v3051_v60, 1 }
 0x14b   : > { %7547 = vmatprep.subr.bf16.mxu1 %v8531_v41  ;;  %7705 = vmatprep.subr.bf16.mxu0 %v8532_v59  ;;  %v3046_v26 = vsel %vm975_vm7, %v3041_v36, %v3045_v10  ;;  %v925_v10 = vld [vmem:[#allocation2 + $0x88] sm:$0xfe]  ;;  %v3075_v36 = vshll.u32 %v9170_v18, 16 }
 0x14c   : > { %7532 = vmatmul.mubr.bf16.gmra.mrb[12].mxu1 %v1607_v44  ;;  %v9311_v50 = vsel %vm2065_vm9, %v2075_v53, %v2077_v49  ;;  %v3054_v9 = vsel %vm975_vm7, %v3049_v22, %v3053_v32 }
 0x14d   : > { %7548 = vmatpush3.bf16.msra.mxu1 %v8531_v41  ;;  %7551 = vmatprep.mubr.bf16.mxu1 %v1812_v52  ;;  %v900_v41 = vmax.f32 %v9201_v35, 0.0  ;;  %v1861_v35 = vrot.slane %v3028_v57, 1 }
 0x14e   : > { %7706 = vmatpush3.bf16.msra.mxu0 %v8532_v59  ;;  %7549 = vmatprep.subr.bf16.mxu1 %v8533_v29  ;;  %v3063_v59 = vshrl.u32 %v9141_v56, 16 }
 0x14f   : > { %7707 = vmatprep.subr.bf16.mxu0 %v8534_v38  ;;  %v903_v44 = vpack.c.bf16 %v900_v41, %v899_v23  ;;  %v9356_v60 = vor.u32 %v1864_v34, %v1861_v35  ;;  %v3079_v23 = vshrl.u32 %v9170_v18, 16  ;;  %v2045_v35 = vld [vmem:[#allocation2 + $0x8] sm:$0xfc] }
 0x151   : > { %7468 = vmatmul.mubr.bf16.gmra.mrb[48].mxu0 %v9044_v14  ;;  %7550 = vmatpush3.bf16.msra.mxu1 %v8533_v29  ;;  %v3061_v29 = vrot.slane %v3059_v11, 1  ;;  %v906_v53 = vshrl.u32 %v903_v44, 16  ;;  %v909_v52 = vshll.u32 %v903_v44, 16  ;;  %v1868_v11 = vshrl.u32 %v9353_v54, 16  ;;  %v8563_v14 = vld [vmem:[%s10476_s2 + $0x1b0] sm:$0xff]  }
 0x152   : > { %7708 = vmatpush3.bf16.msra.mxu0 %v8534_v38  ;;  %7711 = vmatprep.mubr.bf16.mxu0 %v3038_v16  ;;  %v8541_v38 = vld [vmem:[%s10476_s2 + $0x158] sm:$0xff]   ;;  %v3071_v16 = vshrl.u32 %v9166_v48, 16  ;;  %v1866_v44 = vsel %vm1795_vm8, %v9249_v27, %v9356_v60  ;;  %v8548_v27 = vld [vmem:[%s10476_s2 + $0x28] sm:$0xff]  }
 0x153   : > { %7567 = vmatprep.subr.bf16.mxu1 %v8535_v58  ;;  %7709 = vmatprep.subr.bf16.mxu0 %v8536_v20  ;;  %v3065_v57 = vor.u32 %v3063_v59, %v3061_v29  ;;  %v911_v1 = vrot.slane %v909_v52, 7  ;;  %v8545_v59 = vld [vmem:[%s10476_s2 + $0x168] sm:$0xff]   ;;  %v1870_v39 = vrot.slane %v1868_v11, 1 }
 0x154   : > { %7552 = vmatmul.mubr.bf16.vlgmr.msra.gmra.mrb[0].mxu1 %v9194_v30  ;;  %v902_v30 = vmax.f32 %v9198_v37, 0.0  ;;  %v3057_v37 = vor.u32 %v3055_v42, %v3053_v32  ;;  %v3073_v24 = vor.u32 %v3071_v16, %v3069_v21  ;;  %v9412_v16 = vld [vmem:[#allocation2 + $0x20] sm:$0xff] }
 0x155   : > { %7568 = vmatpush3.bf16.msra.mxu1 %v8535_v58  ;;  %7555 = vmatprep.mubr.bf16.mxu1 %v9205_v43  ;;  %v8540_v43 = vld [vmem:[%s10476_s2 + $0x8] sm:$0xff]   ;;  %v3070_v42 = vsel %vm975_vm7, %v3065_v57, %v3069_v21 }
 0x156   : > { %7710 = vmatpush3.bf16.msra.mxu0 %v8536_v20  ;;  %7569 = vmatprep.subr.bf16.mxu1 %v8537_v8  ;;  %v904_v4 = vpack.c.bf16 %v902_v30, %v901_v55  ;;  %v908_v20 = vrot.slane %v906_v53, 6  ;;  %v1871_v55 = vshll.u32 %v9353_v54, 16  ;;  %v2066_v53 = vrot.slane %v2045_v35, 2  ;;  %v9495_v35 = vld [vmem:[#allocation2 + $0x50] sm:$0xff] }
 0x157   : > { %7727 = vmatprep.subr.bf16.mxu0 %v8538_v0 }
 0x158   : > { %v914_v51 = vshrl.u32 %v904_v4, 16  ;;  %v917_v47 = vshll.u32 %v904_v4, 16  ;;  %v912_v32 = vor.u32 %v911_v1, %v908_v20  ;;  %v9383_v4 = vld [vmem:[#allocation2 + $0x80] sm:$0x1]  ;;  %v8550_v20 = vld [vmem:[%s10476_s2 + $0x30] sm:$0xff]   ;;  %v2068_v1 = vsel %vm2065_vm9, %v2066_v53, %v2067_v25  ;;  %v8552_v25 = vld [vmem:[%s10476_s2 + $0x38] sm:$0xff]  }
 0x159   : > { %7712 = vmatmul.mubr.bf16.vlgmr.msra.gmra.mrb[52].mxu0 %v3046_v26  ;;  %7570 = vmatpush3.bf16.msra.mxu1 %v8537_v8  ;;  %v929_v8 = vld [vmem:[#allocation2 + $0x98] sm:$0x3]  ;;  %v3077_v26 = vrot.slane %v3075_v36, 1  ;;  %v10481_v53 = vrot.slane %v9495_v35, 2 }
 0x15a   : > { %7728 = vmatpush3.bf16.msra.mxu0 %v8538_v0  ;;  %7571 = vmatprep.subr.bf16.mxu1 %v8539_v61  ;;  %v916_v63 = vrot.slane %v914_v51, 6  ;;  %v919_v58 = vrot.slane %v917_v47, 7  ;;  %v3062_v0 = vsel %vm975_vm7, %v3057_v37, %v3061_v29  ;;  %v3087_v51 = vshrl.u32 %v9227_v5, 16  ;;  %v9427_v36 = vld [vmem:[#allocation2 + $0x38] sm:$0xff] }
 0x15b   : > { %7729 = vmatprep.subr.bf16.mxu0 %v8540_v43  ;;  %7715 = vmatprep.mubr.bf16.mxu0 %v3054_v9  ;;  %v1873_v9 = vrot.slane %v1871_v55, 2  ;;  %v3081_v37 = vor.u32 %v3079_v23, %v3077_v26  ;;  %v3078_v34 = vsel %vm975_vm7, %v3073_v24, %v3077_v26  ;;  %v9447_v23 = vld [vmem:[#allocation2 + $0x40] sm:$0xff]  ;;  %v8557_v26 = vld [vmem:[%s10476_s2 + $0x198] sm:$0xff]  }
 0x15c   : > { %7556 = vmatmul.mubr.bf16.gmra.mrb[4].mxu1 %v9221_v2  ;;  %v8543_v2 = vld [vmem:[%s10476_s2 + $0x160] sm:$0xff]   ;;  %v920_v22 = vor.u32 %v919_v58, %v916_v63  ;;  %v9402_v63 = vld [vmem:[#allocation2 + $0x18] sm:$0xff] }
 0x15d   : > { %7572 = vmatpush3.bf16.msra.mxu1 %v8539_v61  ;;  %7559 = vmatprep.mubr.bf16.mxu1 %v9239_v46  ;;  %v8544_v46 = vld [vmem:[%s10476_s2 + $0x18] sm:$0xff]   ;;  %v3083_v61 = vshll.u32 %v9227_v5, 16  ;;  %v1874_v47 = vor.u32 %v1873_v9, %v1870_v39  ;;  %v8558_v39 = vld [vmem:[%s10476_s2 + $0x90] sm:$0xff]  }
 0x15e   : > { %7730 = vmatpush3.bf16.msra.mxu0 %v8540_v43  ;;  %7573 = vmatprep.subr.bf16.mxu1 %v8541_v38  ;;  %v930_v30 = vsel %vm8879_vm2, %v920_v22, %v929_v8  ;;  %v921_v41 = vsel %vm201_vm1, %v912_v32, %v920_v22  ;;  %v926_v43 = vsel %vm8897_vm5, %v912_v32, %v925_v10  ;;  %v10487_v8 = vrot.slane %v9402_v63, 3  ;;  %v9416_v10 = vld [vmem:[#allocation2 + $0x28] sm:$0xff] }
 0x15f   : > { %7731 = vmatprep.subr.bf16.mxu0 %v8542_v13  ;;  %931 = vst [vmem:[#allocation2 + $0x98] sm:$0x3] %v930_v30  ;;  %927 = vst [vmem:[#allocation2 + $0x88] sm:$0xfe] %v926_v43  ;;  %v3085_v29 = vrot.slane %v3083_v61, 1  ;;  %v1875_v58 = vsel %vm1795_vm8, %v9356_v60, %v1874_v47  ;;  %v2767_v32 = vrot.slane %v9416_v10, 3 }
 0x160   : > { %928 = vst [vmem:[#allocation2 + $0x90] sm:$0xff] %v921_v41  ;;  %v2771_v61 = vrot.slane %v9427_v36, 3  ;;  %v8556_v43 = vld [vmem:[%s10476_s2 + $0x88] sm:$0xff]  }
 0x161   : > { %7716 = vmatmul.mubr.bf16.gmra.mrb[56].mxu0 %v3062_v0  ;;  %7574 = vmatpush3.bf16.msra.mxu1 %v8541_v38  ;;  %v8547_v38 = vld [vmem:[%s10476_s2 + $0x170] sm:$0xff]   ;;  %v3086_v52 = vsel %vm975_vm7, %v3081_v37, %v3085_v29  ;;  %v3089_v57 = vor.u32 %v3087_v51, %v3085_v29  ;;  %v2765_v0 = vrot.slane %v9412_v16, 3  ;;  %v9490_v37 = vld [vmem:[#allocation2 + $0x60] sm:$0xff]  ;;  %v2079_v51 = vrot.slane %v9047_v15, 2 }
 0x162   : > { %7732 = vmatpush3.bf16.msra.mxu0 %v8542_v13  ;;  %7575 = vmatprep.subr.bf16.mxu1 %v8543_v2  ;;  %v8549_v13 = vld [vmem:[%s10476_s2 + $0x178] sm:$0xff]   ;;  %v8559_v29 = vld [vmem:[%s10476_s2 + $0x1a0] sm:$0xff]   ;;  %v10484_v47 = vshrl.u32 %v9490_v37, 16 }
 0x163   : > { %7733 = vmatprep.subr.bf16.mxu0 %v8544_v46  ;;  %7719 = vmatprep.mubr.bf16.mxu0 %v3070_v42  ;;  %v9432_v22 = vsel %vm2761_vm10, %v10487_v8, %v2765_v0  ;;  %v8554_v42 = vld [vmem:[%s10476_s2 + $0x80] sm:$0xff]   ;;  %v9443_v11 = vsel %vm2761_vm10, %v2765_v0, %v2767_v32 }
 0x164   : > { %7560 = vmatmul.mubr.bf16.gmra.mrb[8].mxu1 %v9255_v19  ;;  %v3091_v19 = vshll.u32 %v9383_v4, 16 }
 0x165   : > { %7576 = vmatpush3.bf16.msra.mxu1 %v8543_v2  ;;  %7563 = vmatprep.mubr.bf16.mxu1 %v1866_v44  ;;  %v9425_v2 = vld [vmem:[#allocation2 + $0x30] sm:$0xff]  ;;  %v9488_v44 = vld [vmem:[#allocation2 + $0x58] sm:$0xff] }
 0x166   : > { %7734 = vmatpush3.bf16.msra.mxu0 %v8544_v46  ;;  %7577 = vmatprep.subr.bf16.mxu1 %v8545_v59  ;;  %v3093_v21 = vrot.slane %v3091_v19, 1  ;;  %v8553_v46 = vld [vmem:[%s10476_s2 + $0x188] sm:$0xff]   ;;  %v2769_v55 = vrot.slane %v9425_v2, 3  ;;  %v10486_v19 = vshrl.u32 %v9488_v44, 16 }
 0x167   : > { %7735 = vmatprep.subr.bf16.mxu0 %v8546_v31 }
 0x168   : > { %v3094_v60 = vsel %vm975_vm7, %v3089_v57, %v3093_v21  ;;  %v9452_v30 = vsel %vm2761_vm10, %v2767_v32, %v2769_v55  ;;  %v9455_v41 = vsel %vm2761_vm10, %v2769_v55, %v2771_v61  ;;  %v10483_v21 = vshll.u32 %v9490_v37, 16 }
 0x169   : > { %7720 = vmatmul.mubr.bf16.gmra.mrb[60].mxu0 %v3078_v34  ;;  %7578 = vmatpush3.bf16.msra.mxu1 %v8545_v59  ;;  %v9463_v59 = vld [vmem:[#allocation2 + $0x80] sm:$0xff] }
 0x16a   : > { %7736 = vmatpush3.bf16.msra.mxu0 %v8546_v31  ;;  %7579 = vmatprep.subr.bf16.mxu1 %v8547_v38  ;;  %v9477_v31 = vshll.u32 %v9463_v59, 16  ;;  %v9484_v9 = vshrl.u32 %v9463_v59, 16 }
 0x16b   : > { %7737 = vmatprep.subr.bf16.mxu0 %v8548_v27  ;;  %7723 = vmatprep.mubr.bf16.mxu0 %v3086_v52  ;;  %v9514_v52 = vrot.slane %v9488_v44, 2 }
 0x16c   : > { %7564 = vmatmul.mubr.bf16.gmra.mrb[12].mxu1 %v1875_v58 }
 0x16d   : > { %7580 = vmatpush3.bf16.msra.mxu1 %v8547_v38  ;;  %7583 = vmatprep.mubr.bf16.mxu1 %v2068_v1  ;;  %v9505_v38 = vld [vmem:[#allocation2 + $0x70] sm:$0xff]  ;;  %v9527_v1 = vld [vmem:[#allocation2 + $0x78] sm:$0xff] }
 0x16e   : > { %7738 = vmatpush3.bf16.msra.mxu0 %v8548_v27  ;;  %7581 = vmatprep.subr.bf16.mxu1 %v8549_v13  ;;  %v10485_v27 = vshll.u32 %v9488_v44, 16  ;;  %v4119_v58 = vrot.slane %v9505_v38, 2  ;;  %v10480_v55 = vrot.slane %v9527_v1, 2 }
 0x16f   : > { %7739 = vmatprep.subr.bf16.mxu0 %v8550_v20 }
 0x171   : > { %7724 = vmatmul.mubr.bf16.gmra.mrb[64].mxu0 %v3094_v60  ;;  %7582 = vmatpush3.bf16.msra.mxu1 %v8549_v13  ;;  %v4115_v13 = vrot.slane %v9490_v37, 2  ;;  %v9533_v60 = vsel %vm2065_vm9, %v10481_v53, %v9514_v52  ;;  %v8567_v53 = vld [vmem:[%s10476_s2 + $0x1c0] sm:$0xff]  }
 0x172   : > { %7740 = vmatpush3.bf16.msra.mxu0 %v8550_v20  ;;  %7743 = vmatprep.mubr.bf16.mxu0 %v9047_v15  ;;  %v8561_v15 = vld [vmem:[%s10476_s2 + $0x1a8] sm:$0xff]   ;;  %v8562_v20 = vld [vmem:[%s10476_s2 + $0xa0] sm:$0xff]  }
 0x173   : > { %7599 = vmatprep.subr.bf16.mxu1 %v8551_v17  ;;  %7741 = vmatprep.subr.bf16.mxu0 %v8552_v25 }
 0x174   : > { %7584 = vmatmul.mubr.bf16.vlgmr.msra.gmra.mrb[0].mxu1 %v9282_v45  ;;  %v8555_v45 = vld [vmem:[%s10476_s2 + $0x190] sm:$0xff]  }
 0x175   : > { %7600 = vmatpush3.bf16.msra.mxu1 %v8551_v17  ;;  %7587 = vmatprep.mubr.bf16.mxu1 %v9290_v62  ;;  %v10482_v62 = vrot.slane %v9447_v23, 3  ;;  %v9537_v17 = vsel %vm2065_vm9, %v9514_v52, %v4115_v13 }
 0x176   : > { %7742 = vmatpush3.bf16.msra.mxu0 %v8552_v25  ;;  %7601 = vmatprep.subr.bf16.mxu1 %v8553_v46  ;;  %v2080_v25 = vsel %vm2065_vm9, %v2077_v49, %v2079_v51  ;;  %v9558_v49 = vld [vmem:[#allocation2 + $0x10] sm:$0xfc] }
 0x177   : > { %7759 = vmatprep.subr.bf16.mxu0 %v8554_v42  ;;  %v9470_v24 = vsel %vm2761_vm10, %v2771_v61, %v10482_v62  ;;  %v4556_v61 = vrot.slane %v10483_v21, 3  ;;  %v8568_v62 = vld [vmem:[%s10476_s2 + $0xb8] sm:$0xff]  }
 0x179   : > { %7744 = vmatmul.mubr.bf16.vlgmr.msra.gmra.mrb[52].mxu0 %v9251_v7  ;;  %7602 = vmatpush3.bf16.msra.mxu1 %v8553_v46  ;;  %v4544_v46 = vrot.slane %v10486_v19, 2 }
 0x17a   : > { %7747 = vmatprep.mubr.bf16.mxu0 %v9099_v6  ;;  %7760 = vmatpush3.bf16.msra.mxu0 %v8554_v42  ;;  %v5059_v6 = vrot.slane %v9477_v31, 1  ;;  %v4547_v42 = vrot.slane %v10485_v27, 3 }
 0x17b   : > { %7603 = vmatprep.subr.bf16.mxu1 %v8555_v45  ;;  %7761 = vmatprep.subr.bf16.mxu0 %v8556_v43 }
 0x17c   : > { %7588 = vmatmul.mubr.bf16.gmra.mrb[4].mxu1 %v9295_v3  ;;  %v9497_v3 = vld [vmem:[#allocation2 + $0x68] sm:$0xff]  ;;  %v9500_v34 = vor.u32 %v5059_v6, %v9484_v9  ;;  %v9569_v6 = vor.u32 %v4547_v42, %v4544_v46  ;;  %v3393_v42 = vld [vmem:[#allocation2 + $0x40] sm:$0xfe] }
 0x17d   : > { %7604 = vmatpush3.bf16.msra.mxu1 %v8555_v45  ;;  %7591 = vmatprep.mubr.bf16.mxu1 %v9298_v28  ;;  %v8560_v28 = vld [vmem:[%s10476_s2 + $0x98] sm:$0xff]   ;;  %v4117_v57 = vrot.slane %v9497_v3, 2  ;;  %v10479_v45 = vrot.slane %v9488_v44, 3 }
 0x17e   : > { %7762 = vmatpush3.bf16.msra.mxu0 %v8556_v43  ;;  %7605 = vmatprep.subr.bf16.mxu1 %v8557_v26  ;;  %v8564_v43 = vld [vmem:[%s10476_s2 + $0xa8] sm:$0xff]  }
 0x17f   : > { %7763 = vmatprep.subr.bf16.mxu0 %v8558_v39  ;;  %v9544_v0 = vsel %vm2065_vm9, %v4115_v13, %v4117_v57  ;;  %v9547_v32 = vsel %vm2065_vm9, %v4117_v57, %v4119_v58  ;;  %v2287_v57 = vrot.slane %v9558_v49, 2 }
 0x181   : > { %7748 = vmatmul.mubr.bf16.gmra.mrb[56].mxu0 %v9138_v40  ;;  %7606 = vmatpush3.bf16.msra.mxu1 %v8557_v26  ;;  %v2081_v26 = vrot.slane %v9353_v54, 2 }
 0x182   : > { %7764 = vmatpush3.bf16.msra.mxu0 %v8558_v39  ;;  %7607 = vmatprep.subr.bf16.mxu1 %v8559_v29  ;;  %v2288_v39 = vrot.slane %v9402_v63, 2 }
 0x183   : > { %7765 = vmatprep.subr.bf16.mxu0 %v8560_v28  ;;  %7751 = vmatprep.mubr.bf16.mxu0 %v9141_v56 }
 0x184   : > { %7592 = vmatmul.mubr.bf16.gmra.mrb[8].mxu1 %v9311_v50  ;;  %v4553_v50 = vrot.slane %v10484_v47, 2  ;;  %v2289_v46 = vsel %vm2065_vm9, %v2287_v57, %v2288_v39  ;;  %v4808_v57 = vrot.slane %v9505_v38, 3 }
 0x185   : > { %7608 = vmatpush3.bf16.msra.mxu1 %v8559_v29  ;;  %7595 = vmatprep.mubr.bf16.mxu1 %v2080_v25  ;;  %v4804_v29 = vrot.slane %v9490_v37, 3  ;;  %v8565_v25 = vld [vmem:[%s10476_s2 + $0x1b8] sm:$0xff]  }
 0x186   : > { %7766 = vmatpush3.bf16.msra.mxu0 %v8560_v28  ;;  %7609 = vmatprep.subr.bf16.mxu1 %v8561_v15  ;;  %v9575_v28 = vsel %vm2065_vm9, %v4119_v58, %v10480_v55  ;;  %v4557_v13 = vor.u32 %v4556_v61, %v4553_v50  ;;  %v10490_v50 = vshrl.u32 %v9497_v3, 16  ;;  %v10489_v61 = vshll.u32 %v9497_v3, 16 }
 0x187   : > { %7767 = vmatprep.subr.bf16.mxu0 %v8562_v20  ;;  %v9582_v54 = vsel %vm2761_vm10, %v10479_v45, %v4804_v29  ;;  %v10488_v45 = vshrl.u32 %v9505_v38, 16  ;;  %v10491_v55 = vshll.u32 %v9505_v38, 16 }
 0x188   : > { %v9589_v58 = vsel %vm2491_vm11, %v9569_v6, %v4557_v13  ;;  %v4565_v21 = vrot.slane %v10489_v61, 3 }
 0x189   : > { %7752 = vmatmul.mubr.bf16.gmra.mrb[60].mxu0 %v9166_v48  ;;  %7610 = vmatpush3.bf16.msra.mxu1 %v8561_v15  ;;  %v2082_v15 = vsel %vm2065_vm9, %v2079_v51, %v2081_v26  ;;  %v3420_v51 = vrot.slane %v9251_v7, 1  ;;  %v4806_v26 = vrot.slane %v9497_v3, 3  ;;  %v4574_v47 = vrot.slane %v10491_v55, 3  ;;  %v8704_v55 = vld [vmem:[#allocation2 + $0x50] sm:$0xff] }
 0x18a   : > { %7768 = vmatpush3.bf16.msra.mxu0 %v8562_v20  ;;  %7611 = vmatprep.subr.bf16.mxu1 %v8563_v14  ;;  %v8566_v20 = vld [vmem:[%s10476_s2 + $0xb0] sm:$0xff]  }
 0x18b   : > { %7769 = vmatprep.subr.bf16.mxu0 %v8564_v43  ;;  %7755 = vmatprep.mubr.bf16.mxu0 %v9170_v18  ;;  %v9623_v19 = vsel %vm2761_vm10, %v4804_v29, %v4806_v26  ;;  %v9626_v8 = vsel %vm2761_vm10, %v4806_v26, %v4808_v57  ;;  %v3422_v29 = vrot.slane %v8704_v55, 1  ;;  %v8570_v26 = vld [vmem:[%s10476_s2 + $0xc0] sm:$0xff]   ;;  %v10495_v55 = vrot.slane %v9527_v1, 3 }
 0x18c   : > { %7596 = vmatmul.mubr.bf16.gmra.mrb[12].mxu1 %v2082_v15  ;;  %v3419_v15 = vrot.slane %v3393_v42, 1  ;;  %v4571_v42 = vrot.slane %v10488_v45, 2  ;;  %v8569_v45 = vld [vmem:[%s10476_s2 + $0x1c8] sm:$0xff]  }
 0x18d   : > { %7612 = vmatpush3.bf16.msra.mxu1 %v8563_v14  ;;  %7615 = vmatprep.mubr.bf16.mxu1 %v2289_v46  ;;  %v2290_v14 = vrot.slane %v9412_v16, 2  ;;  %v2292_v46 = vrot.slane %v9416_v10, 2  ;;  %v9665_v12 = vsel %vm2761_vm10, %v4808_v57, %v10495_v55 }
 0x18e   : > { %7770 = vmatpush3.bf16.msra.mxu0 %v8564_v43  ;;  %7613 = vmatprep.subr.bf16.mxu1 %v8565_v25  ;;  %v4562_v43 = vrot.slane %v10490_v50, 2  ;;  %v3421_v27 = vsel %vm1369_vm6, %v3419_v15, %v3420_v51  ;;  %v4575_v50 = vor.u32 %v4574_v47, %v4571_v42  ;;  %v4589_v42 = vrot.slane %v9484_v9, 2 }
 0x18f   : > { %7771 = vmatprep.subr.bf16.mxu0 %v8566_v20  ;;  %v2293_v15 = vsel %vm2065_vm9, %v2290_v14, %v2292_v46 }
 0x190   : > { %v4566_v61 = vor.u32 %v4565_v21, %v4562_v43  ;;  %v3423_v43 = vsel %vm1369_vm6, %v3420_v51, %v3422_v29  ;;  %v8573_v51 = vld [vmem:[%s10476_s2 + $0x1d8] sm:$0xff]  }
 0x191   : > { %7756 = vmatmul.mubr.bf16.gmra.mrb[64].mxu0 %v9227_v5  ;;  %7614 = vmatpush3.bf16.msra.mxu1 %v8565_v25  ;;  %v2291_v25 = vsel %vm2065_vm9, %v2288_v39, %v2290_v14  ;;  %v3424_v39 = vrot.slane %v9138_v40, 1  ;;  %v8571_v14 = vld [vmem:[%s10476_s2 + $0x1d0] sm:$0xff]  }
 0x192   : > { %7772 = vmatpush3.bf16.msra.mxu0 %v8566_v20  ;;  %7775 = vmatprep.mubr.bf16.mxu0 %v3421_v27  ;;  %v10494_v27 = vshrl.u32 %v9527_v1, 16  ;;  %v10493_v20 = vshll.u32 %v9527_v1, 16  ;;  %v9639_v21 = vsel %vm2491_vm11, %v4557_v13, %v4566_v61  ;;  %v9642_v47 = vsel %vm2491_vm11, %v4566_v61, %v4575_v50  ;;  %v8572_v13 = vld [vmem:[%s10476_s2 + $0xc8] sm:$0xff]  }
 0x193   : > { %7631 = vmatprep.subr.bf16.mxu1 %v8567_v53  ;;  %7773 = vmatprep.subr.bf16.mxu0 %v8568_v62  ;;  %v2294_v61 = vrot.slane %v9425_v2, 2 }
 0x194   : > { %7616 = vmatmul.mubr.bf16.vlgmr.msra.gmra.mrb[0].mxu1 %v2291_v25  ;;  %v4580_v40 = vrot.slane %v10494_v27, 2  ;;  %v3425_v25 = vsel %vm1369_vm6, %v3422_v29, %v3424_v39  ;;  %v3426_v29 = vrot.slane %v9141_v56, 1  ;;  %v8575_v56 = vld [vmem:[%s10476_s2 + $0x1e0] sm:$0xff]  }
 0x195   : > { %7632 = vmatpush3.bf16.msra.mxu1 %v8567_v53  ;;  %7619 = vmatprep.mubr.bf16.mxu1 %v2293_v15  ;;  %v2296_v53 = vrot.slane %v9427_v36, 2  ;;  %v4592_v15 = vrot.slane %v9477_v31, 3 }
 0x196   : > { %7774 = vmatpush3.bf16.msra.mxu0 %v8568_v62  ;;  %7633 = vmatprep.subr.bf16.mxu1 %v8569_v45  ;;  %v4583_v62 = vrot.slane %v10493_v20, 3 }
 0x197   : > { %7791 = vmatprep.subr.bf16.mxu0 %v8570_v26  ;;  %v9675_v27 = vor.u32 %v4592_v15, %v4589_v42  ;;  %v2297_v57 = vsel %vm2065_vm9, %v2294_v61, %v2296_v53  ;;  %v2493_v42 = vshrl.u32 %v9558_v49, 16  ;;  %v2496_v15 = vshll.u32 %v9558_v49, 16 }
 0x198   : > { %v4584_v20 = vor.u32 %v4583_v62, %v4580_v40  ;;  %v3427_v40 = vsel %vm1369_vm6, %v3424_v39, %v3426_v29  ;;  %v8577_v39 = vld [vmem:[%s10476_s2 + $0x1e8] sm:$0xff]   ;;  %v3430_v62 = vrot.slane %v9170_v18, 1  ;;  %v3432_v18 = vrot.slane %v9227_v5, 1 }
 0x199   : > { %7776 = vmatmul.mubr.bf16.vlgmr.msra.gmra.mrb[52].mxu0 %v3423_v43  ;;  %7634 = vmatpush3.bf16.msra.mxu1 %v8569_v45  ;;  %v2295_v45 = vsel %vm2065_vm9, %v2292_v46, %v2294_v61  ;;  %v8574_v43 = vld [vmem:[%s10476_s2 + $0xd0] sm:$0xff]   ;;  %v2504_v61 = vshll.u32 %v9402_v63, 16  ;;  %v2498_v55 = vrot.slane %v2496_v15, 3  ;;  %v2510_v5 = vshrl.u32 %v9412_v16, 16  ;;  %v8581_v15 = vld [vmem:[%s10476_s2 + $0x1f8] sm:$0xff]  }
 0x19a   : > { %7779 = vmatprep.mubr.bf16.mxu0 %v3425_v25  ;;  %7792 = vmatpush3.bf16.msra.mxu0 %v8570_v26  ;;  %v3428_v26 = vrot.slane %v9166_v48, 1  ;;  %v9680_v25 = vsel %vm2491_vm11, %v4575_v50, %v4584_v20  ;;  %v9684_v46 = vsel %vm2491_vm11, %v4584_v20, %v9675_v27  ;;  %v8576_v48 = vld [vmem:[%s10476_s2 + $0xd8] sm:$0xff]   ;;  %v2298_v50 = vrot.slane %v9447_v23, 2 }
 0x19b   : > { %7635 = vmatprep.subr.bf16.mxu1 %v8571_v14  ;;  %7793 = vmatprep.subr.bf16.mxu0 %v8572_v13 }
 0x19c   : > { %7620 = vmatmul.mubr.bf16.gmra.mrb[4].mxu1 %v2295_v45  ;;  %v3429_v20 = vsel %vm1369_vm6, %v3426_v29, %v3428_v26  ;;  %v2299_v45 = vsel %vm2065_vm9, %v2296_v53, %v2298_v50  ;;  %v3431_v49 = vsel %vm1369_vm6, %v3428_v26, %v3430_v62  ;;  %v8579_v53 = vld [vmem:[%s10476_s2 + $0x1f0] sm:$0xff]   ;;  %v2519_v26 = vshrl.u32 %v9416_v10, 16 }
 0x19d   : > { %7636 = vmatpush3.bf16.msra.mxu1 %v8571_v14  ;;  %7623 = vmatprep.mubr.bf16.mxu1 %v2297_v57  ;;  %v2300_v14 = vrot.slane %v9251_v7, 2 }
 0x19e   : > { %7794 = vmatpush3.bf16.msra.mxu0 %v8572_v13  ;;  %7637 = vmatprep.subr.bf16.mxu1 %v8573_v51  ;;  %v2501_v13 = vshrl.u32 %v9402_v63, 16 }
 0x19f   : > { %7795 = vmatprep.subr.bf16.mxu0 %v8574_v43  ;;  %v2301_v29 = vsel %vm2065_vm9, %v2298_v50, %v2300_v14  ;;  %v8580_v50 = vld [vmem:[%s10476_s2 + $0xe8] sm:$0xff]  }
 0x1a0   : > { %v2503_v57 = vrot.slane %v2501_v13, 2 }
 0x1a1   : > { %7780 = vmatmul.mubr.bf16.gmra.mrb[56].mxu0 %v3427_v40  ;;  %7638 = vmatpush3.bf16.msra.mxu1 %v8573_v51  ;;  %v8578_v51 = vld [vmem:[%s10476_s2 + $0xe0] sm:$0xff]   ;;  %v2506_v40 = vrot.slane %v2504_v61, 3  ;;  %v3433_v61 = vsel %vm1369_vm6, %v3430_v62, %v3432_v18 }
 0x1a2   : > { %7796 = vmatpush3.bf16.msra.mxu0 %v8574_v43  ;;  %7639 = vmatprep.subr.bf16.mxu1 %v8575_v56  ;;  %v2260_v43 = vld [vmem:[#allocation2 + $0x50] sm:$0x3] }
 0x1a3   : > { %7797 = vmatprep.subr.bf16.mxu0 %v8576_v48  ;;  %7783 = vmatprep.mubr.bf16.mxu0 %v3429_v20  ;;  %v2495_v20 = vrot.slane %v2493_v42, 2  ;;  %v2302_v13 = vrot.slane %v2260_v43, 2  ;;  %v9726_v43 = vld [vmem:[#allocation2 + $0x48] sm:$0xfe] }
 0x1a4   : > { %7624 = vmatmul.mubr.bf16.gmra.mrb[8].mxu1 %v2299_v45  ;;  %v2522_v45 = vshll.u32 %v9416_v10, 16  ;;  %v8582_v10 = vld [vmem:[%s10476_s2 + $0xf0] sm:$0xff]  }
 0x1a5   : > { %7640 = vmatpush3.bf16.msra.mxu1 %v8575_v56  ;;  %7627 = vmatprep.mubr.bf16.mxu1 %v2301_v29  ;;  %v2513_v56 = vshll.u32 %v9412_v16, 16  ;;  %v2499_v42 = vor.u32 %v2498_v55, %v2495_v20  ;;  %v3434_v29 = vrot.slane %v9383_v4, 1  ;;  %v2303_v16 = vsel %vm2065_vm9, %v2300_v14, %v2302_v13  ;;  %v8584_v20 = vld [vmem:[%s10476_s2 + $0xf8] sm:$0xff]  }
 0x1a6   : > { %7798 = vmatpush3.bf16.msra.mxu0 %v8576_v48  ;;  %7641 = vmatprep.subr.bf16.mxu1 %v8577_v39  ;;  %v2507_v48 = vor.u32 %v2506_v40, %v2503_v57  ;;  %v2524_v57 = vrot.slane %v2522_v45, 3  ;;  %v3639_v4 = vrot.slane %v9726_v43, 1  ;;  %v3640_v40 = vrot.slane %v9495_v35, 1 }
 0x1a7   : > { %7799 = vmatprep.subr.bf16.mxu0 %v8578_v51  ;;  %v2515_v62 = vrot.slane %v2513_v56, 3  ;;  %v3435_v14 = vsel %vm1369_vm6, %v3432_v18, %v3434_v29  ;;  %v3642_v29 = vrot.slane %v9488_v44, 1 }
 0x1a8   : > { %v2508_v55 = vsel %vm2491_vm11, %v2499_v42, %v2507_v48  ;;  %v3641_v18 = vsel %vm1369_vm6, %v3639_v4, %v3640_v40 }
 0x1a9   : > { %7784 = vmatmul.mubr.bf16.gmra.mrb[60].mxu0 %v3431_v49  ;;  %7642 = vmatpush3.bf16.msra.mxu1 %v8577_v39  ;;  %v2512_v39 = vrot.slane %v2510_v5, 2  ;;  %v8583_v49 = vld [vmem:[%s10476_s2 + $0x200] sm:$0xff]   ;;  %v2531_v5 = vshll.u32 %v9425_v2, 16  ;;  %v3643_v4 = vsel %vm1369_vm6, %v3640_v40, %v3642_v29 }
 0x1aa   : > { %7800 = vmatpush3.bf16.msra.mxu0 %v8578_v51  ;;  %7643 = vmatprep.subr.bf16.mxu1 %v8579_v53  ;;  %v2521_v51 = vrot.slane %v2519_v26, 2  ;;  %v8585_v26 = vld [vmem:[%s10476_s2 + $0x208] sm:$0xff]  }
 0x1ab   : > { %7801 = vmatprep.subr.bf16.mxu0 %v8580_v50  ;;  %7787 = vmatprep.mubr.bf16.mxu0 %v3433_v61  ;;  %v2516_v13 = vor.u32 %v2515_v62, %v2512_v39  ;;  %v2540_v61 = vshll.u32 %v9427_v36, 16  ;;  %v3644_v39 = vrot.slane %v9490_v37, 1  ;;  %v8588_v62 = vld [vmem:[%s10476_s2 + $0x108] sm:$0xff]  }
 0x1ac   : > { %7628 = vmatmul.mubr.bf16.gmra.mrb[12].mxu1 %v2303_v16  ;;  %v2525_v56 = vor.u32 %v2524_v57, %v2521_v51  ;;  %v2546_v51 = vshrl.u32 %v9447_v23, 16  ;;  %v2549_v57 = vshll.u32 %v9447_v23, 16 }
 0x1ad   : > { %7644 = vmatpush3.bf16.msra.mxu1 %v8579_v53  ;;  %7647 = vmatprep.mubr.bf16.mxu1 %v2508_v55  ;;  %v2528_v53 = vshrl.u32 %v9425_v2, 16  ;;  %v2517_v45 = vsel %vm2491_vm11, %v2507_v48, %v2516_v13  ;;  %v8586_v2 = vld [vmem:[%s10476_s2 + $0x100] sm:$0xff]   ;;  %v8587_v48 = vld [vmem:[%s10476_s2 + $0x210] sm:$0xff]  }
 0x1ae   : > { %7802 = vmatpush3.bf16.msra.mxu0 %v8580_v50  ;;  %7645 = vmatprep.subr.bf16.mxu1 %v8581_v15  ;;  %v2537_v50 = vshrl.u32 %v9427_v36, 16  ;;  %v2533_v36 = vrot.slane %v2531_v5, 3  ;;  %v2548_v40 = vrot.slane %v2546_v51, 2  ;;  %v2551_v5 = vrot.slane %v2549_v57, 3 }
 0x1af   : > { %7803 = vmatprep.subr.bf16.mxu0 %v8582_v10  ;;  %v2530_v42 = vrot.slane %v2528_v53, 2  ;;  %v8590_v53 = vld [vmem:[%s10476_s2 + $0x110] sm:$0xff]  }
 0x1b0   : > { %v2539_v16 = vrot.slane %v2537_v50, 2 }
 0x1b1   : > { %7788 = vmatmul.mubr.bf16.gmra.mrb[64].mxu0 %v3435_v14  ;;  %7646 = vmatpush3.bf16.msra.mxu1 %v8581_v15  ;;  %v2526_v15 = vsel %vm2491_vm11, %v2516_v13, %v2525_v56  ;;  %v2534_v55 = vor.u32 %v2533_v36, %v2530_v42  ;;  %v8591_v42 = vld [vmem:[%s10476_s2 + $0x220] sm:$0xff]   ;;  %v2552_v36 = vor.u32 %v2551_v5, %v2548_v40  ;;  %v8595_v40 = vld [vmem:[%s10476_s2 + $0x230] sm:$0xff]   ;;  %v8596_v5 = vld [vmem:[%s10476_s2 + $0x128] sm:$0xff]  }
 0x1b2   : > { %7804 = vmatpush3.bf16.msra.mxu0 %v8582_v10  ;;  %7807 = vmatprep.mubr.bf16.mxu0 %v3641_v18  ;;  %v2542_v10 = vrot.slane %v2540_v61, 3  ;;  %v3646_v61 = vrot.slane %v9497_v3, 1  ;;  %v2557_v18 = vrot.slane %v3039_v33, 2  ;;  %v8592_v33 = vld [vmem:[%s10476_s2 + $0x118] sm:$0xff]  }
 0x1b3   : > { %7663 = vmatprep.subr.bf16.mxu1 %v8583_v49  ;;  %7805 = vmatprep.subr.bf16.mxu0 %v8584_v20  ;;  %v2535_v13 = vsel %vm2491_vm11, %v2525_v56, %v2534_v55  ;;  %v3648_v56 = vrot.slane %v9505_v38, 1 }
 0x1b4   : > { %7648 = vmatmul.mubr.bf16.vlgmr.msra.gmra.mrb[0].mxu1 %v2517_v45  ;;  %v2543_v14 = vor.u32 %v2542_v10, %v2539_v16 }
 0x1b5   : > { %7664 = vmatpush3.bf16.msra.mxu1 %v8583_v49  ;;  %7651 = vmatprep.mubr.bf16.mxu1 %v2526_v15  ;;  %v3645_v49 = vsel %vm1369_vm6, %v3642_v29, %v3644_v39  ;;  %v3647_v29 = vsel %vm1369_vm6, %v3644_v39, %v3646_v61  ;;  %v3649_v10 = vsel %vm1369_vm6, %v3646_v61, %v3648_v56  ;;  %v2741_v61 = vld [vmem:[#allocation2 + $0x10] sm:$0xf8] }
 0x1b6   : > { %7806 = vmatpush3.bf16.msra.mxu0 %v8584_v20  ;;  %7665 = vmatprep.subr.bf16.mxu1 %v8585_v26  ;;  %v8589_v20 = vld [vmem:[%s10476_s2 + $0x218] sm:$0xff]   ;;  %v2544_v50 = vsel %vm2491_vm11, %v2534_v55, %v2543_v14  ;;  %v8594_v55 = vld [vmem:[%s10476_s2 + $0x120] sm:$0xff]  }
 0x1b7   : > { %7823 = vmatprep.subr.bf16.mxu0 %v8586_v2 }
 0x1b9   : > { %7808 = vmatmul.mubr.bf16.vlgmr.msra.gmra.mrb[52].mxu0 %v3643_v4  ;;  %7666 = vmatpush3.bf16.msra.mxu1 %v8585_v26  ;;  %v10500_v26 = vshll.u32 %v9251_v7, 16  ;;  %v3650_v4 = vrot.slane %v9527_v1, 1 }
 0x1ba   : > { %7811 = vmatprep.mubr.bf16.mxu0 %v3645_v49  ;;  %7824 = vmatpush3.bf16.msra.mxu0 %v8586_v2  ;;  %v9780_v2 = vld [vmem:[#allocation2 + $0x50] sm:$0x7]  ;;  %v3652_v49 = vrot.slane %v9463_v59, 1 }
 0x1bb   : > { %7667 = vmatprep.subr.bf16.mxu1 %v8587_v48  ;;  %7825 = vmatprep.subr.bf16.mxu0 %v8588_v62  ;;  %v2560_v45 = vrot.slane %v10500_v26, 3  ;;  %v2564_v7 = vshrl.u32 %v9780_v2, 16  ;;  %v2567_v15 = vshll.u32 %v9780_v2, 16  ;;  %v3613_v26 = vld [vmem:[#allocation2 + $0x88] sm:$0x1] }
 0x1bc   : > { %7652 = vmatmul.mubr.bf16.gmra.mrb[4].mxu1 %v2535_v13  ;;  %v3846_v13 = vshll.u32 %v9726_v43, 16 }
 0x1bd   : > { %7668 = vmatpush3.bf16.msra.mxu1 %v8587_v48  ;;  %7655 = vmatprep.mubr.bf16.mxu1 %v2544_v50  ;;  %v2561_v16 = vor.u32 %v2560_v45, %v2557_v18  ;;  %v8593_v48 = vld [vmem:[%s10476_s2 + $0x228] sm:$0xff]   ;;  %v2566_v39 = vrot.slane %v2564_v7, 2  ;;  %v2569_v51 = vrot.slane %v2567_v15, 3  ;;  %v3651_v18 = vsel %vm1369_vm6, %v3648_v56, %v3650_v4  ;;  %v8597_v15 = vld [vmem:[%s10476_s2 + $0x238] sm:$0xff]  }
 0x1be   : > { %7826 = vmatpush3.bf16.msra.mxu0 %v8588_v62  ;;  %7669 = vmatprep.subr.bf16.mxu1 %v8589_v20  ;;  %v2553_v62 = vsel %vm2491_vm11, %v2543_v14, %v2552_v36  ;;  %v3851_v14 = vshrl.u32 %v9495_v35, 16  ;;  %v2762_v7 = vrot.slane %v2741_v61, 3  ;;  %v8601_v61 = vld [vmem:[%s10476_s2 + $0x140] sm:$0xff]  }
 0x1bf   : > { %7827 = vmatprep.subr.bf16.mxu0 %v8590_v53  ;;  %v2562_v57 = vsel %vm2491_vm11, %v2552_v36, %v2561_v16  ;;  %v2570_v50 = vor.u32 %v2569_v51, %v2566_v39  ;;  %v8600_v51 = vld [vmem:[%s10476_s2] sm:$0xff]  }
 0x1c1   : > { %7812 = vmatmul.mubr.bf16.gmra.mrb[56].mxu0 %v3647_v29  ;;  %7670 = vmatpush3.bf16.msra.mxu1 %v8589_v20  ;;  %v3843_v20 = vshrl.u32 %v9726_v43, 16  ;;  %v3653_v43 = vsel %vm1369_vm6, %v3650_v4, %v3652_v49  ;;  %v2571_v56 = vsel %vm2491_vm11, %v2561_v16, %v2570_v50  ;;  %v8598_v29 = vld [vmem:[%s10476_s2 + $0x130] sm:$0xff]   ;;  %v8599_v16 = vld [vmem:[%s10476_s2 + $0x138] sm:$0xff]  }
 0x1c2   : > { %7815 = vmatprep.mubr.bf16.mxu0 %v3649_v10  ;;  %7828 = vmatpush3.bf16.msra.mxu0 %v8590_v53  ;;  %v3854_v53 = vshll.u32 %v9495_v35, 16  ;;  %v10501_v10 = vrot.slane %v9402_v63, 3 }
 0x1c3   : > { %7671 = vmatprep.subr.bf16.mxu1 %v8591_v42  ;;  %7829 = vmatprep.subr.bf16.mxu0 %v8592_v33  ;;  %v3845_v45 = vrot.slane %v3843_v20, 1  ;;  %v10503_v20 = vshll.u32 %v9488_v44, 16 }
 0x1c4   : > { %7656 = vmatmul.mubr.bf16.gmra.mrb[8].mxu1 %v2553_v62  ;;  %v3856_v36 = vrot.slane %v3854_v53, 2  ;;  %v3654_v62 = vrot.slane %v3613_v26, 1  ;;  %v10504_v53 = vshrl.u32 %v9490_v37, 16  ;;  %v8604_v26 = vld [vmem:[%s10476_s2 + $0x10] sm:$0xff]  }
 0x1c5   : > { %7672 = vmatpush3.bf16.msra.mxu1 %v8591_v42  ;;  %7659 = vmatprep.mubr.bf16.mxu1 %v2562_v57  ;;  %v3848_v42 = vrot.slane %v3846_v13, 2  ;;  %v10502_v57 = vshrl.u32 %v9488_v44, 16  ;;  %v3865_v13 = vrot.slane %v10503_v20, 2  ;;  %v3907_v20 = vrot.slane %v9484_v9, 1 }
 0x1c6   : > { %7830 = vmatpush3.bf16.msra.mxu0 %v8592_v33  ;;  %7673 = vmatprep.subr.bf16.mxu1 %v8593_v48  ;;  %v3853_v33 = vrot.slane %v3851_v14, 1  ;;  %v3655_v63 = vsel %vm1369_vm6, %v3652_v49, %v3654_v62  ;;  %v8602_v49 = vld [vmem:[%s10476_s2 + $0x8] sm:$0xff]   ;;  %v8607_v62 = vld [vmem:[%s10476_s2 + $0x158] sm:$0xff]   ;;  %v10512_v9 = vrot.slane %v9447_v23, 3  ;;  %v8612_v23 = vld [vmem:[%s10476_s2 + $0x30] sm:$0xff]  }
 0x1c7   : > { %7831 = vmatprep.subr.bf16.mxu0 %v8594_v55  ;;  %v3862_v4 = vrot.slane %v10502_v57, 1 }
 0x1c8   : > { %v3857_v39 = vor.u32 %v3856_v36, %v3853_v33  ;;  %v10507_v33 = vshll.u32 %v9497_v3, 16 }
 0x1c9   : > { %7816 = vmatmul.mubr.bf16.gmra.mrb[60].mxu0 %v3651_v18  ;;  %7674 = vmatpush3.bf16.msra.mxu1 %v8593_v48  ;;  %v2764_v48 = vsel %vm2761_vm10, %v2762_v7, %v10501_v10  ;;  %v3866_v18 = vor.u32 %v3865_v13, %v3862_v4  ;;  %v10508_v7 = vshrl.u32 %v9505_v38, 16  ;;  %v8606_v10 = vld [vmem:[%s10476_s2 + $0x18] sm:$0xff]   ;;  %v3910_v13 = vrot.slane %v9477_v31, 2 }
 0x1ca   : > { %7819 = vmatprep.mubr.bf16.mxu0 %v3653_v43  ;;  %7832 = vmatpush3.bf16.msra.mxu0 %v8594_v55  ;;  %v3849_v55 = vor.u32 %v3848_v42, %v3845_v45  ;;  %v8603_v43 = vld [vmem:[%s10476_s2 + $0x148] sm:$0xff]  }
 0x1cb   : > { %7675 = vmatprep.subr.bf16.mxu1 %v8595_v40  ;;  %7833 = vmatprep.subr.bf16.mxu0 %v8596_v5  ;;  %v3867_v45 = vsel %vm1795_vm8, %v3857_v39, %v3866_v18 }
 0x1cc   : > { %7660 = vmatmul.mubr.bf16.gmra.mrb[12].mxu1 %v2571_v56  ;;  %v3858_v14 = vsel %vm1795_vm8, %v3849_v55, %v3857_v39  ;;  %v10509_v56 = vshll.u32 %v9505_v38, 16  ;;  %v8608_v55 = vld [vmem:[%s10476_s2 + $0x20] sm:$0xff]  }
 0x1cd   : > { %7676 = vmatpush3.bf16.msra.mxu1 %v8595_v40  ;;  %7679 = vmatprep.mubr.bf16.mxu1 %v2764_v48  ;;  %v3871_v40 = vrot.slane %v10504_v53, 1  ;;  %v8610_v53 = vld [vmem:[%s10476_s2 + $0x28] sm:$0xff]  }
 0x1ce   : > { %7834 = vmatpush3.bf16.msra.mxu0 %v8596_v5  ;;  %7677 = vmatprep.subr.bf16.mxu1 %v8597_v15  ;;  %v10505_v5 = vshll.u32 %v9490_v37, 16 }
 0x1cf   : > { %7835 = vmatprep.subr.bf16.mxu0 %v8598_v29 }
 0x1d0   : > { %v3874_v50 = vrot.slane %v10505_v5, 2 }
 0x1d1   : > { %7820 = vmatmul.mubr.bf16.gmra.mrb[64].mxu0 %v3655_v63  ;;  %7678 = vmatpush3.bf16.msra.mxu1 %v8597_v15  ;;  %v3889_v15 = vrot.slane %v10508_v7, 1  ;;  %v5270_v7 = vld [vmem:[#allocation2 + $0x80] sm:$0xfe] }
 0x1d2   : > { %7836 = vmatpush3.bf16.msra.mxu0 %v8598_v29  ;;  %7839 = vmatprep.mubr.bf16.mxu0 %v3858_v14  ;;  %v3875_v37 = vor.u32 %v3874_v50, %v3871_v40  ;;  %v3892_v29 = vrot.slane %v10509_v56, 2  ;;  %v9887_v14 = vld [vmem:[#allocation2 + $0x88] sm:$0x3]  ;;  %v8609_v40 = vld [vmem:[%s10476_s2 + $0x160] sm:$0xff]  }
 0x1d3   : > { %7837 = vmatprep.subr.bf16.mxu0 %v8599_v16  ;;  %8003 = vmatprep.subr.bf16.mxu1 %v8600_v51  ;;  %v3914_v50 = vshrl.u32 %v9887_v14, 16  ;;  %v8616_v56 = vld [vmem:[%s10476_s2 + $0x80] sm:$0xff]  }
 0x1d4   : > { %7680 = vmatmul.mubr.bf16.vlgmr.msra.gmra.mrb[0].mxu1 %v9432_v22  ;;  %v10506_v22 = vshrl.u32 %v9497_v3, 16  ;;  %v3876_v36 = vsel %vm1795_vm8, %v3866_v18, %v3875_v37  ;;  %v8605_v3 = vld [vmem:[%s10476_s2 + $0x150] sm:$0xff]   ;;  %v3893_v38 = vor.u32 %v3892_v29, %v3889_v15  ;;  %v8611_v18 = vld [vmem:[%s10476_s2 + $0x168] sm:$0xff]   ;;  %v8615_v15 = vld [vmem:[%s10476_s2 + $0x178] sm:$0xff]  }
 0x1d5   : > { %8004 = vmatpush3.bf16.msra.mxu1 %v8600_v51  ;;  %7683 = vmatprep.mubr.bf16.mxu1 %v9443_v11  ;;  %v3883_v11 = vrot.slane %v10507_v33, 2  ;;  %v10510_v51 = vshrl.u32 %v9527_v1, 16  ;;  %v9924_v29 = vld [vmem:[#allocation2 + $0x88] sm:$0xff] }
 0x1d6   : > { %7838 = vmatpush3.bf16.msra.mxu0 %v8599_v16  ;;  %8005 = vmatprep.subr.bf16.mxu1 %v8602_v49  ;;  %v3880_v42 = vrot.slane %v10506_v22, 1  ;;  %v8705_v16 = vld [vmem:[#allocation2 + $0x48] sm:$0xff]  ;;  %v8614_v22 = vld [vmem:[%s10476_s2 + $0x38] sm:$0xff]  }
 0x1d7   : > { %7855 = vmatprep.subr.bf16.mxu0 %v8601_v61  ;;  %v3898_v63 = vrot.slane %v10510_v51, 1  ;;  %v8621_v51 = vld [vmem:[%s10476_s2 + $0x190] sm:$0xff]  }
 0x1d8   : > { %v3884_v48 = vor.u32 %v3883_v11, %v3880_v42  ;;  %v4091_v42 = vld [vmem:[#allocation2 + $0x48] sm:$0xfc] }
 0x1d9   : > { %7840 = vmatmul.mubr.bf16.vlgmr.msra.gmra.mrb[52].mxu0 %v3867_v45  ;;  %8006 = vmatpush3.bf16.msra.mxu1 %v8602_v49  ;;  %v3917_v49 = vshll.u32 %v9887_v14, 16 }
 0x1da   : > { %7843 = vmatprep.mubr.bf16.mxu0 %v3876_v36  ;;  %7856 = vmatpush3.bf16.msra.mxu0 %v8601_v61  ;;  %v3885_v39 = vsel %vm1795_vm8, %v3875_v37, %v3884_v48  ;;  %v3894_v4 = vsel %vm1795_vm8, %v3884_v48, %v3893_v38  ;;  %v3911_v61 = vor.u32 %v3910_v13, %v3907_v20  ;;  %v4110_v36 = vrot.slane %v4091_v42, 2  ;;  %v8627_v13 = vld [vmem:[%s10476_s2 + $0x1a8] sm:$0xff]   ;;  %v8632_v42 = vld [vmem:[%s10476_s2 + $0xc0] sm:$0xff]  }
 0x1db   : > { %7857 = vmatprep.subr.bf16.mxu0 %v8603_v43  ;;  %8007 = vmatprep.subr.bf16.mxu1 %v8604_v26  ;;  %v10513_v48 = vrot.slane %v9495_v35, 2 }
 0x1dc   : > { %7684 = vmatmul.mubr.bf16.gmra.mrb[4].mxu1 %v9452_v30  ;;  %v2775_v30 = vrot.slane %v8705_v16, 3  ;;  %v8620_v16 = vld [vmem:[%s10476_s2 + $0x90] sm:$0xff]  }
 0x1dd   : > { %8008 = vmatpush3.bf16.msra.mxu1 %v8604_v26  ;;  %7687 = vmatprep.mubr.bf16.mxu1 %v9455_v41  ;;  %v10511_v41 = vshll.u32 %v9527_v1, 16  ;;  %v3919_v26 = vrot.slane %v3917_v49, 2 }
 0x1de   : > { %7858 = vmatpush3.bf16.msra.mxu0 %v8603_v43  ;;  %8009 = vmatprep.subr.bf16.mxu1 %v8606_v10  ;;  %v2776_v31 = vsel %vm2761_vm10, %v10512_v9, %v2775_v30  ;;  %v3916_v43 = vrot.slane %v3914_v50, 1  ;;  %v8629_v50 = vld [vmem:[%s10476_s2 + $0x1b0] sm:$0xff]  }
 0x1df   : > { %7859 = vmatprep.subr.bf16.mxu0 %v8605_v3  ;;  %v3901_v57 = vrot.slane %v10511_v41, 2  ;;  %v8626_v41 = vld [vmem:[%s10476_s2 + $0xa8] sm:$0xff]  }
 0x1e0   : > { %v3920_v11 = vor.u32 %v3919_v26, %v3916_v43  ;;  %v10006_v43 = vld [vmem:[#allocation2 + $0x90] sm:$0xff] }
 0x1e1   : > { %7844 = vmatmul.mubr.bf16.gmra.mrb[56].mxu0 %v3885_v39  ;;  %8010 = vmatpush3.bf16.msra.mxu1 %v8606_v10  ;;  %v3902_v5 = vor.u32 %v3901_v57, %v3898_v63  ;;  %v8619_v39 = vld [vmem:[%s10476_s2 + $0x188] sm:$0xff]   ;;  %v8624_v63 = vld [vmem:[%s10476_s2 + $0xa0] sm:$0xff]  }
 0x1e2   : > { %7847 = vmatprep.mubr.bf16.mxu0 %v3894_v4  ;;  %7860 = vmatpush3.bf16.msra.mxu0 %v8605_v3  ;;  %v3921_v10 = vsel %vm1795_vm8, %v3911_v61, %v3920_v11  ;;  %v5290_v3 = vrot.slane %v5270_v7, 1  ;;  %v8625_v57 = vld [vmem:[%s10476_s2 + $0x1a0] sm:$0xff]   ;;  %v5421_v11 = vrot.slane %v10006_v43, 1  ;;  %v8634_v7 = vld [vmem:[%s10476_s2 + $0xc8] sm:$0xff]  }
 0x1e3   : > { %7861 = vmatprep.subr.bf16.mxu0 %v8607_v62  ;;  %8011 = vmatprep.subr.bf16.mxu1 %v8608_v55  ;;  %v3903_v37 = vsel %vm1795_vm8, %v3893_v38, %v3902_v5  ;;  %v3912_v45 = vsel %vm1795_vm8, %v3902_v5, %v3911_v61  ;;  %v4112_v38 = vsel %vm2065_vm9, %v4110_v36, %v10513_v48  ;;  %v9969_v4 = vld [vmem:[#allocation2 + $0x80] sm:$0xff]  ;;  %v9991_v5 = vld [vmem:[#allocation2 + $0x50] sm:$0xfc]  ;;  %v4125_v61 = vrot.slane %v9887_v14, 2  ;;  %v8631_v14 = vld [vmem:[%s10476_s2 + $0x1b8] sm:$0xff]  }
 0x1e4   : > { %7688 = vmatmul.mubr.bf16.gmra.mrb[8].mxu1 %v9470_v24  ;;  %v2777_v24 = vrot.slane %v9780_v2, 3  ;;  %v8613_v2 = vld [vmem:[%s10476_s2 + $0x170] sm:$0xff]   ;;  %v9972_v20 = vrot.slane %v9969_v4, 2 }
 0x1e5   : > { %8012 = vmatpush3.bf16.msra.mxu1 %v8608_v55  ;;  %7691 = vmatprep.mubr.bf16.mxu1 %v2776_v31  ;;  %v8617_v55 = vld [vmem:[%s10476_s2 + $0x180] sm:$0xff]   ;;  %v8630_v31 = vld [vmem:[%s10476_s2 + $0xb8] sm:$0xff]  }
 0x1e6   : > { %7862 = vmatpush3.bf16.msra.mxu0 %v8607_v62  ;;  %8013 = vmatprep.subr.bf16.mxu1 %v8610_v53  ;;  %v2778_v33 = vsel %vm2761_vm10, %v2775_v30, %v2777_v24  ;;  %v8618_v62 = vld [vmem:[%s10476_s2 + $0x88] sm:$0xff]   ;;  %v8622_v30 = vld [vmem:[%s10476_s2 + $0x98] sm:$0xff]   ;;  %v4330_v24 = vrot.slane %v9991_v5, 2 }
 0x1e7   : > { %7863 = vmatprep.subr.bf16.mxu0 %v8609_v40 }
 0x1e8   : > { %v4332_v36 = vsel %vm2065_vm9, %v4330_v24, %v9514_v52 }
 0x1e9   : > { %7848 = vmatmul.mubr.bf16.gmra.mrb[60].mxu0 %v3903_v37  ;;  %8014 = vmatpush3.bf16.msra.mxu1 %v8610_v53  ;;  %v8628_v53 = vld [vmem:[%s10476_s2 + $0xb0] sm:$0xff]   ;;  %v10004_v37 = vld [vmem:[#allocation2 + $0x88] sm:$0xfe] }
 0x1ea   : > { %7851 = vmatprep.mubr.bf16.mxu0 %v3912_v45  ;;  %7864 = vmatpush3.bf16.msra.mxu0 %v8609_v40  ;;  %v10514_v40 = vrot.slane %v9527_v1, 2  ;;  %v5546_v24 = vshrl.u32 %v10004_v37, 16 }
 0x1eb   : > { %7865 = vmatprep.subr.bf16.mxu0 %v8611_v18  ;;  %8015 = vmatprep.subr.bf16.mxu1 %v8612_v23 }
 0x1ec   : > { %7692 = vmatmul.mubr.bf16.gmra.mrb[12].mxu1 %v2778_v33  ;;  %v9985_v9 = vsel %vm2065_vm9, %v10514_v40, %v9972_v20  ;;  %v4126_v33 = vsel %vm2065_vm9, %v9972_v20, %v4125_v61  ;;  %v4304_v61 = vld [vmem:[#allocation2 + $0x90] sm:$0x3] }
 0x1ed   : > { %8016 = vmatpush3.bf16.msra.mxu1 %v8612_v23  ;;  %8019 = vmatprep.mubr.bf16.mxu1 %v9463_v59  ;;  %v5291_v59 = vrot.slane %v9924_v29, 1 }
 0x1ee   : > { %7866 = vmatpush3.bf16.msra.mxu0 %v8611_v18  ;;  %8017 = vmatprep.subr.bf16.mxu1 %v8614_v22  ;;  %v9999_v18 = vld [vmem:[#allocation2 + $0x90] sm:$0x1] }
 0x1ef   : > { %7867 = vmatprep.subr.bf16.mxu0 %v8613_v2  ;;  %v5292_v35 = vsel %vm1369_vm6, %v5290_v3, %v5291_v59 }
 0x1f1   : > { %7852 = vmatmul.mubr.bf16.gmra.mrb[64].mxu0 %v3921_v10  ;;  %8018 = vmatpush3.bf16.msra.mxu1 %v8614_v22  ;;  %v5293_v22 = vrot.slane %v9999_v18, 1 }
 0x1f2   : > { %7868 = vmatpush3.bf16.msra.mxu0 %v8613_v2  ;;  %7871 = vmatprep.mubr.bf16.mxu0 %v4112_v38  ;;  %v5420_v2 = vrot.slane %v10004_v37, 1  ;;  %v8635_v38 = vld [vmem:[%s10476_s2 + $0x1c8] sm:$0xff]  }
 0x1f3   : > { %7869 = vmatprep.subr.bf16.mxu0 %v8615_v15  ;;  %8023 = vmatprep.subr.bf16.mxu1 %v8616_v56 }
 0x1f4   : > { %8020 = vmatmul.mubr.bf16.vlgmr.msra.gmra.mrb[16].mxu1 %v9924_v29  ;;  %v5422_v52 = vsel %vm1369_vm6, %v5420_v2, %v5421_v11 }
 0x1f5   : > { %8024 = vmatpush3.bf16.msra.mxu1 %v8616_v56  ;;  %8039 = vmatprep.mubr.bf16.mxu1 %v5292_v35  ;;  %v8633_v56 = vld [vmem:[%s10476_s2 + $0x1c0] sm:$0xff]   ;;  %v8637_v35 = vld [vmem:[%s10476_s2 + $0x1d0] sm:$0xff]  }
 0x1f6   : > { %7870 = vmatpush3.bf16.msra.mxu0 %v8615_v15  ;;  %8025 = vmatprep.subr.bf16.mxu1 %v8618_v62  ;;  %v5294_v15 = vsel %vm1369_vm6, %v5291_v59, %v5293_v22  ;;  %v5557_v22 = vshll.u32 %v10006_v43, 16 }
 0x1f7   : > { %7887 = vmatprep.subr.bf16.mxu0 %v8617_v55 }
 0x1f9   : > { %7872 = vmatmul.mubr.bf16.vlgmr.msra.gmra.mrb[52].mxu0 %v9533_v60  ;;  %8026 = vmatpush3.bf16.msra.mxu1 %v8618_v62  ;;  %v8623_v60 = vld [vmem:[%s10476_s2 + $0x198] sm:$0xff]   ;;  %v8636_v62 = vld [vmem:[%s10476_s2 + $0xd0] sm:$0xff]  }
 0x1fa   : > { %7875 = vmatprep.mubr.bf16.mxu0 %v9537_v17  ;;  %7888 = vmatpush3.bf16.msra.mxu0 %v8617_v55  ;;  %v8638_v55 = vld [vmem:[%s10476_s2 + $0xd8] sm:$0xff]  }
 0x1fb   : > { %7889 = vmatprep.subr.bf16.mxu0 %v8619_v39  ;;  %8027 = vmatprep.subr.bf16.mxu1 %v8620_v16 }
 0x1fd   : > { %8028 = vmatpush3.bf16.msra.mxu1 %v8620_v16 }
 0x1fe   : > { %7890 = vmatpush3.bf16.msra.mxu0 %v8619_v39  ;;  %8029 = vmatprep.subr.bf16.mxu1 %v8622_v30 }
 0x1ff   : > { %7891 = vmatprep.subr.bf16.mxu0 %v8621_v51 }
 0x201   : > { %7876 = vmatmul.mubr.bf16.gmra.mrb[56].mxu0 %v9544_v0  ;;  %8030 = vmatpush3.bf16.msra.mxu1 %v8622_v30  ;;  %v8639_v30 = vld [vmem:[%s10476_s2 + $0x1d8] sm:$0xff]  }
 0x202   : > { %7879 = vmatprep.mubr.bf16.mxu0 %v9547_v32  ;;  %7892 = vmatpush3.bf16.msra.mxu0 %v8621_v51  ;;  %v8640_v51 = vld [vmem:[%s10476_s2 + $0xe0] sm:$0xff]  }
 0x203   : > { %7893 = vmatprep.subr.bf16.mxu0 %v8623_v60  ;;  %8031 = vmatprep.subr.bf16.mxu1 %v8624_v63 }
 0x205   : > { %8032 = vmatpush3.bf16.msra.mxu1 %v8624_v63  ;;  %v8641_v63 = vld [vmem:[%s10476_s2 + $0x1e0] sm:$0xff]  }
 0x206   : > { %7894 = vmatpush3.bf16.msra.mxu0 %v8623_v60  ;;  %8033 = vmatprep.subr.bf16.mxu1 %v8626_v41  ;;  %v8642_v60 = vld [vmem:[%s10476_s2 + $0xe8] sm:$0xff]  }
 0x207   : > { %7895 = vmatprep.subr.bf16.mxu0 %v8625_v57 }
 0x209   : > { %7880 = vmatmul.mubr.bf16.gmra.mrb[60].mxu0 %v9575_v28  ;;  %8034 = vmatpush3.bf16.msra.mxu1 %v8626_v41 }
 0x20a   : > { %7883 = vmatprep.mubr.bf16.mxu0 %v9985_v9  ;;  %7896 = vmatpush3.bf16.msra.mxu0 %v8625_v57 }
 0x20b   : > { %7897 = vmatprep.subr.bf16.mxu0 %v8627_v13  ;;  %8035 = vmatprep.subr.bf16.mxu1 %v8628_v53 }
 0x20c   : > { %v9996_v49 = vpop.f32.mrb[36].mxu0 }
 0x20d   : > { %v10001_v23 = vpop.f32.mrb[37].mxu0  ;;  %8036 = vmatpush3.bf16.msra.mxu1 %v8628_v53 }
 0x20e   : > { %v10008_v26 = vpop.f32.mrb[38].mxu0  ;;  %7898 = vmatpush3.bf16.msra.mxu0 %v8627_v13  ;;  %8037 = vmatprep.subr.bf16.mxu1 %v8630_v31  ;;  %v4537_v13 = vshll.u32 %v9991_v5, 16 }
 0x20f   : > { %v10010_v45 = vpop.f32.mrb[39].mxu0  ;;  %7899 = vmatprep.subr.bf16.mxu0 %v8629_v50 }
 0x210   : > { %v4539_v2 = vrot.slane %v4537_v13, 3 }
 0x211   : > { %7884 = vmatmul.mubr.bf16.gmra.mrb[64].mxu0 %v4126_v33  ;;  %8038 = vmatpush3.bf16.msra.mxu1 %v8630_v31  ;;  %v8643_v31 = vld [vmem:[%s10476_s2 + $0x1e8] sm:$0xff]  }
 0x212   : > { %7900 = vmatpush3.bf16.msra.mxu0 %v8629_v50  ;;  %7903 = vmatprep.mubr.bf16.mxu0 %v4332_v36  ;;  %v8644_v50 = vld [vmem:[%s10476_s2 + $0xf0] sm:$0xff]   ;;  %v8646_v36 = vld [vmem:[%s10476_s2 + $0xf8] sm:$0xff]  }
 0x213   : > { %7901 = vmatprep.subr.bf16.mxu0 %v8631_v14  ;;  %8043 = vmatprep.subr.bf16.mxu1 %v8632_v42 }
 0x214   : > { %v10034_v10 = vpop.f32.mrb[40].mxu0  ;;  %8040 = vmatmul.mubr.bf16.vlgmr.msra.gmra.mrb[16].mxu1 %v5294_v15  ;;  %v5548_v15 = vrot.slane %v5546_v24, 1  ;;  %v5066_v24 = vshrl.u32 %v9924_v29, 16 }
 0x215   : > { %v10039_v3 = vpop.f32.mrb[41].mxu0  ;;  %8044 = vmatpush3.bf16.msra.mxu1 %v8632_v42  ;;  %8059 = vmatprep.mubr.bf16.mxu1 %v5422_v52  ;;  %v5559_v52 = vrot.slane %v5557_v22, 2 }
 0x216   : > { %v10041_v48 = vpop.f32.mrb[42].mxu0  ;;  %7902 = vmatpush3.bf16.msra.mxu0 %v8631_v14  ;;  %8045 = vmatprep.subr.bf16.mxu1 %v8634_v7  ;;  %v5554_v14 = vshrl.u32 %v10006_v43, 16 }
 0x217   : > { %v10043_v59 = vpop.f32.mrb[43].mxu0  ;;  %7919 = vmatprep.subr.bf16.mxu0 %v8633_v56 }
 0x219   : > { %7904 = vmatmul.mubr.bf16.vlgmr.msra.gmra.mrb[52].mxu0 %v9537_v17  ;;  %8046 = vmatpush3.bf16.msra.mxu1 %v8634_v7  ;;  %v8645_v7 = vld [vmem:[%s10476_s2 + $0x1f0] sm:$0xff]  }
 0x21a   : > { %7907 = vmatprep.mubr.bf16.mxu0 %v9544_v0  ;;  %7920 = vmatpush3.bf16.msra.mxu0 %v8633_v56 }
 0x21b   : > { %7921 = vmatprep.subr.bf16.mxu0 %v8635_v38  ;;  %8047 = vmatprep.subr.bf16.mxu1 %v8636_v62 }
 0x21c   : > { %v10059_v39 = vpop.f32.mrb[44].mxu0 }
 0x21d   : > { %v10061_v16 = vpop.f32.mrb[45].mxu0  ;;  %8048 = vmatpush3.bf16.msra.mxu1 %v8636_v62  ;;  %v8647_v62 = vld [vmem:[%s10476_s2 + $0x1f8] sm:$0xff]  }
 0x21e   : > { %v10063_v17 = vpop.f32.mrb[46].mxu0  ;;  %7922 = vmatpush3.bf16.msra.mxu0 %v8635_v38  ;;  %8049 = vmatprep.subr.bf16.mxu1 %v8638_v55 }
 0x21f   : > { %v10065_v0 = vpop.f32.mrb[47].mxu0  ;;  %7923 = vmatprep.subr.bf16.mxu0 %v8637_v35 }
 0x221   : > { %7908 = vmatmul.mubr.bf16.gmra.mrb[56].mxu0 %v9547_v32  ;;  %8050 = vmatpush3.bf16.msra.mxu1 %v8638_v55  ;;  %v4343_v32 = vrot.slane %v9924_v29, 2 }
 0x222   : > { %7911 = vmatprep.mubr.bf16.mxu0 %v9575_v28  ;;  %7924 = vmatpush3.bf16.msra.mxu0 %v8637_v35  ;;  %v4534_v28 = vshrl.u32 %v9991_v5, 16  ;;  %v5549_v5 = vshll.u32 %v10004_v37, 16  ;;  %v4345_v37 = vrot.slane %v4304_v61, 2  ;;  %v8648_v35 = vld [vmem:[%s10476_s2 + $0x100] sm:$0xff]   ;;  %v8653_v61 = vld [vmem:[%s10476_s2 + $0x210] sm:$0xff]  }
 0x223   : > { %7925 = vmatprep.subr.bf16.mxu0 %v8639_v30  ;;  %8051 = vmatprep.subr.bf16.mxu1 %v8640_v51  ;;  %v4344_v42 = vsel %vm2065_vm9, %v9972_v20, %v4343_v32  ;;  %v5556_v20 = vrot.slane %v5554_v14, 1  ;;  %v4598_v14 = vrot.slane %v5066_v24, 2 }
 0x224   : > { %v10081_v41 = vpop.f32.mrb[48].mxu0  ;;  %v4536_v33 = vrot.slane %v4534_v28, 2  ;;  %v5551_v56 = vrot.slane %v5549_v5, 2  ;;  %v8650_v28 = vld [vmem:[%s10476_s2 + $0x108] sm:$0xff]   ;;  %v4599_v5 = vshll.u32 %v9924_v29, 16 }
 0x225   : > { %v10083_v57 = vpop.f32.mrb[49].mxu0  ;;  %8052 = vmatpush3.bf16.msra.mxu1 %v8640_v51 }
 0x226   : > { %v10088_v53 = vpop.f32.mrb[50].mxu0  ;;  %7926 = vmatpush3.bf16.msra.mxu0 %v8639_v30  ;;  %8053 = vmatprep.subr.bf16.mxu1 %v8642_v60  ;;  %v4540_v38 = vor.u32 %v4539_v2, %v4536_v33  ;;  %v4346_v30 = vsel %vm2065_vm9, %v4343_v32, %v4345_v37  ;;  %v5552_v51 = vor.u32 %v5551_v56, %v5548_v15  ;;  %v8649_v32 = vld [vmem:[%s10476_s2 + $0x200] sm:$0xff]   ;;  %v4601_v22 = vrot.slane %v4599_v5, 3  ;;  %v8658_v33 = vld [vmem:[%s10476_s2 + $0x128] sm:$0xff]   ;;  %v10171_v37 = vld [vmem:[#allocation2 + $0x98] sm:$0x3] }
 0x227   : > { %v10090_v40 = vpop.f32.mrb[51].mxu0  ;;  %7927 = vmatprep.subr.bf16.mxu0 %v8641_v63  ;;  %v5563_v15 = vshrl.u32 %v10171_v37, 16  ;;  %v5566_v56 = vshll.u32 %v10171_v37, 16 }
 0x229   : > { %7912 = vmatmul.mubr.bf16.gmra.mrb[60].mxu0 %v9985_v9  ;;  %8054 = vmatpush3.bf16.msra.mxu1 %v8642_v60  ;;  %v5400_v9 = vld [vmem:[#allocation2 + $0x98] sm:$0x1]  ;;  %v10118_v60 = vor.u32 %v5559_v52, %v5556_v20 }
 0x22a   : > { %7915 = vmatprep.mubr.bf16.mxu0 %v4344_v42  ;;  %7928 = vmatpush3.bf16.msra.mxu0 %v8641_v63  ;;  %v5423_v55 = vrot.slane %v5400_v9, 1  ;;  %v4549_v63 = vsel %vm2491_vm11, %v4540_v38, %v9569_v6  ;;  %v10160_v42 = vld [vmem:[#allocation2 + $0x90] sm:$0x7] }
 0x22b   : > { %7929 = vmatprep.subr.bf16.mxu0 %v8643_v31  ;;  %8055 = vmatprep.subr.bf16.mxu1 %v8644_v50  ;;  %v5561_v6 = vsel %vm1795_vm8, %v5552_v51, %v10118_v60  ;;  %v4605_v2 = vshrl.u32 %v10160_v42, 16  ;;  %v8660_v9 = vld [vmem:[%s10476_s2 + $0x130] sm:$0xff]   ;;  %v5568_v51 = vrot.slane %v5566_v56, 2  ;;  %v8678_v56 = vld [vmem:[%s10476_s2 + $0x178] sm:$0xff]  }
 0x22c   : > { %v5424_v13 = vsel %vm1369_vm6, %v5421_v11, %v5423_v55  ;;  %v8652_v11 = vld [vmem:[%s10476_s2 + $0x110] sm:$0xff]  }
 0x22d   : > { %8056 = vmatpush3.bf16.msra.mxu1 %v8644_v50  ;;  %v8654_v50 = vld [vmem:[%s10476_s2 + $0x118] sm:$0xff]   ;;  %v4607_v20 = vrot.slane %v4605_v2, 2  ;;  %v4782_v55 = vld [vmem:[#allocation2 + $0x50] sm:$0xf8]  ;;  %v8674_v2 = vld [vmem:[%s10476_s2 + $0x168] sm:$0xff]  }
 0x22e   : > { %7930 = vmatpush3.bf16.msra.mxu0 %v8643_v31  ;;  %8057 = vmatprep.subr.bf16.mxu1 %v8646_v36  ;;  %v8651_v31 = vld [vmem:[%s10476_s2 + $0x208] sm:$0xff]  }
 0x22f   : > { %7931 = vmatprep.subr.bf16.mxu0 %v8645_v7 }
 0x231   : > { %7916 = vmatmul.mubr.bf16.gmra.mrb[64].mxu0 %v4346_v30  ;;  %8058 = vmatpush3.bf16.msra.mxu1 %v8646_v36  ;;  %v4608_v36 = vshll.u32 %v10160_v42, 16  ;;  %v5565_v30 = vrot.slane %v5563_v15, 1 }
 0x232   : > { %7932 = vmatpush3.bf16.msra.mxu0 %v8645_v7  ;;  %7935 = vmatprep.mubr.bf16.mxu0 %v4549_v63  ;;  %v4602_v7 = vor.u32 %v4601_v22, %v4598_v14  ;;  %v4801_v63 = vrot.slane %v4782_v55, 3  ;;  %v8665_v14 = vld [vmem:[%s10476_s2 + $0x40] sm:$0xff]   ;;  %v8667_v22 = vld [vmem:[%s10476_s2 + $0x48] sm:$0xff]   ;;  %v8679_v55 = vld [vmem:[%s10476_s2 + $0x78] sm:$0xff]  }
 0x233   : > { %7933 = vmatprep.subr.bf16.mxu0 %v8647_v62  ;;  %8063 = vmatprep.subr.bf16.mxu1 %v8648_v35  ;;  %v4610_v52 = vrot.slane %v4608_v36, 3  ;;  %v8673_v36 = vld [vmem:[%s10476_s2 + $0x60] sm:$0xff]  }
 0x234   : > { %8060 = vmatmul.mubr.bf16.vlgmr.msra.gmra.mrb[16].mxu1 %v5424_v13  ;;  %v4603_v38 = vsel %vm2491_vm11, %v9675_v27, %v4602_v7  ;;  %v5674_v27 = vld [vmem:[#allocation2 + $0x88] sm:$0xfc]  ;;  %v5569_v13 = vor.u32 %v5568_v51, %v5565_v30  ;;  %v5070_v30 = vshll.u32 %v9999_v18, 16 }
 0x235   : > { %8064 = vmatpush3.bf16.msra.mxu1 %v8648_v35  ;;  %8079 = vmatprep.mubr.bf16.mxu1 %v5561_v6  ;;  %v8661_v35 = vld [vmem:[%s10476_s2 + $0x230] sm:$0xff]  }
 0x236   : > { %7934 = vmatpush3.bf16.msra.mxu0 %v8647_v62  ;;  %8065 = vmatprep.subr.bf16.mxu1 %v8650_v28  ;;  %v8662_v62 = vld [vmem:[%s10476_s2 + $0x138] sm:$0xff]  }
 0x237   : > { %7951 = vmatprep.subr.bf16.mxu0 %v8649_v32 }
 0x239   : > { %7936 = vmatmul.mubr.bf16.vlgmr.msra.gmra.mrb[52].mxu0 %v9589_v58  ;;  %8066 = vmatpush3.bf16.msra.mxu1 %v8650_v28  ;;  %v8655_v58 = vld [vmem:[%s10476_s2 + $0x218] sm:$0xff]  }
 0x23a   : > { %7939 = vmatprep.mubr.bf16.mxu0 %v9639_v21  ;;  %7952 = vmatpush3.bf16.msra.mxu0 %v8649_v32  ;;  %v8656_v21 = vld [vmem:[%s10476_s2 + $0x120] sm:$0xff]   ;;  %v8663_v28 = vld [vmem:[%s10476_s2 + $0x238] sm:$0xff]  }
 0x23b   : > { %7953 = vmatprep.subr.bf16.mxu0 %v8651_v31  ;;  %8067 = vmatprep.subr.bf16.mxu1 %v8652_v11  ;;  %v8664_v32 = vld [vmem:[%s10476_s2 + $0x140] sm:$0xff]  }
 0x23d   : > { %8068 = vmatpush3.bf16.msra.mxu1 %v8652_v11  ;;  %v5694_v11 = vrot.slane %v10006_v43, 2 }
 0x23e   : > { %7954 = vmatpush3.bf16.msra.mxu0 %v8651_v31  ;;  %8069 = vmatprep.subr.bf16.mxu1 %v8654_v50  ;;  %v5693_v31 = vrot.slane %v5674_v27, 2 }
 0x23f   : > { %7955 = vmatprep.subr.bf16.mxu0 %v8653_v61 }
 0x241   : > { %7940 = vmatmul.mubr.bf16.gmra.mrb[56].mxu0 %v9642_v47  ;;  %8070 = vmatpush3.bf16.msra.mxu1 %v8654_v50  ;;  %v8657_v47 = vld [vmem:[%s10476_s2 + $0x220] sm:$0xff]   ;;  %v10515_v50 = vrot.slane %v9488_v44, 3  ;;  %v5695_v44 = vsel %vm2065_vm9, %v5693_v31, %v5694_v11 }
 0x242   : > { %7943 = vmatprep.mubr.bf16.mxu0 %v9680_v25  ;;  %7956 = vmatpush3.bf16.msra.mxu0 %v8653_v61  ;;  %v8659_v25 = vld [vmem:[%s10476_s2 + $0x228] sm:$0xff]  }
 0x243   : > { %7957 = vmatprep.subr.bf16.mxu0 %v8655_v58  ;;  %8071 = vmatprep.subr.bf16.mxu1 %v8656_v21  ;;  %v4803_v61 = vsel %vm2761_vm10, %v4801_v63, %v10515_v50 }
 0x245   : > { %8072 = vmatpush3.bf16.msra.mxu1 %v8656_v21  ;;  %v5570_v21 = vsel %vm1795_vm8, %v10118_v60, %v5569_v13  ;;  %v8668_v60 = vld [vmem:[%s10476_s2 + $0x150] sm:$0xff]  }
 0x246   : > { %7958 = vmatpush3.bf16.msra.mxu0 %v8655_v58  ;;  %8073 = vmatprep.subr.bf16.mxu1 %v8658_v33  ;;  %v8666_v58 = vld [vmem:[%s10476_s2 + $0x148] sm:$0xff]   ;;  %v8682_v13 = vld [vmem:[%s10476_s2 + $0x190] sm:$0xff]  }
 0x247   : > { %7959 = vmatprep.subr.bf16.mxu0 %v8657_v47 }
 0x249   : > { %7944 = vmatmul.mubr.bf16.gmra.mrb[60].mxu0 %v9684_v46  ;;  %8074 = vmatpush3.bf16.msra.mxu1 %v8658_v33  ;;  %v4611_v46 = vor.u32 %v4610_v52, %v4607_v20  ;;  %v8670_v33 = vld [vmem:[%s10476_s2 + $0x158] sm:$0xff]   ;;  %v8677_v20 = vld [vmem:[%s10476_s2 + $0x70] sm:$0xff]  }
 0x24a   : > { %7947 = vmatprep.mubr.bf16.mxu0 %v4603_v38  ;;  %7960 = vmatpush3.bf16.msra.mxu0 %v8657_v47  ;;  %v8669_v47 = vld [vmem:[%s10476_s2 + $0x50] sm:$0xff]   ;;  %v10259_v38 = vld [vmem:[#allocation2 + $0x98] sm:$0xff] }
 0x24b   : > { %7961 = vmatprep.subr.bf16.mxu0 %v8659_v25  ;;  %8075 = vmatprep.subr.bf16.mxu1 %v8660_v9  ;;  %v4612_v6 = vsel %vm2491_vm11, %v4602_v7, %v4611_v46  ;;  %v4812_v7 = vrot.slane %v9969_v4, 3  ;;  %v5801_v52 = vld [vmem:[#allocation2 + $0x90] sm:$0xfc]  ;;  %v5824_v63 = vrot.slane %v10259_v38, 2  ;;  %v5957_v50 = vshrl.u32 %v10259_v38, 16 }
 0x24c   : > { %v5823_v46 = vrot.slane %v5801_v52, 2  ;;  %v5949_v31 = vshrl.u32 %v5801_v52, 16 }
 0x24d   : > { %8076 = vmatpush3.bf16.msra.mxu1 %v8660_v9  ;;  %v10516_v9 = vrot.slane %v9527_v1, 3  ;;  %v4816_v1 = vrot.slane %v10160_v42, 3  ;;  %v8680_v42 = vld [vmem:[%s10476_s2 + $0x180] sm:$0xff]  }
 0x24e   : > { %7962 = vmatpush3.bf16.msra.mxu0 %v8659_v25  ;;  %8077 = vmatprep.subr.bf16.mxu1 %v8662_v62  ;;  %v4814_v25 = vrot.slane %v9924_v29, 3  ;;  %v8683_v29 = vld [vmem:[%s10476_s2 + $0x198] sm:$0xff]  }
 0x24f   : > { %7963 = vmatprep.subr.bf16.mxu0 %v8661_v35  ;;  %v4813_v15 = vsel %vm2761_vm10, %v10516_v9, %v4812_v7  ;;  %v8693_v9 = vld [vmem:[%s10476_s2 + $0x1e8] sm:$0xff]  }
 0x250   : > { %v4815_v4 = vsel %vm2761_vm10, %v4812_v7, %v4814_v25  ;;  %v4817_v51 = vsel %vm2761_vm10, %v4814_v25, %v4816_v1  ;;  %v8690_v25 = vld [vmem:[%s10476_s2 + $0x1d0] sm:$0xff]  }
 0x251   : > { %7948 = vmatmul.mubr.bf16.gmra.mrb[64].mxu0 %v4612_v6  ;;  %8078 = vmatpush3.bf16.msra.mxu1 %v8662_v62  ;;  %v5064_v62 = vrot.slane %v4599_v5, 1  ;;  %v8686_v6 = vld [vmem:[%s10476_s2 + $0x1b0] sm:$0xff]  }
 0x252   : > { %7964 = vmatpush3.bf16.msra.mxu0 %v8661_v35  ;;  %7967 = vmatprep.mubr.bf16.mxu0 %v4803_v61  ;;  %v5696_v35 = vrot.slane %v10171_v37, 2  ;;  %v8681_v37 = vld [vmem:[%s10476_s2 + $0x188] sm:$0xff]   ;;  %v5960_v61 = vshll.u32 %v10259_v38, 16 }
 0x253   : > { %7965 = vmatprep.subr.bf16.mxu0 %v8663_v28  ;;  %8083 = vmatprep.subr.bf16.mxu1 %v8664_v32  ;;  %v5065_v5 = vsel %vm975_vm7, %v9500_v34, %v5064_v62  ;;  %v5068_v27 = vor.u32 %v5066_v24, %v5064_v62  ;;  %v5072_v34 = vrot.slane %v5070_v30, 1  ;;  %v8684_v24 = vld [vmem:[%s10476_s2 + $0x1a0] sm:$0xff]  }
 0x254   : > { %8080 = vmatmul.mubr.bf16.vlgmr.msra.gmra.mrb[16].mxu1 %v5570_v21  ;;  %v5697_v18 = vsel %vm2065_vm9, %v5694_v11, %v5696_v35  ;;  %v5952_v11 = vshll.u32 %v5801_v52, 16  ;;  %v5803_v21 = vld [vmem:[#allocation2 + $0xa0] sm:$0x3] }
 0x255   : > { %8084 = vmatpush3.bf16.msra.mxu1 %v8664_v32  ;;  %8099 = vmatprep.mubr.bf16.mxu1 %v5695_v44  ;;  %v5073_v43 = vsel %vm975_vm7, %v5068_v27, %v5072_v34  ;;  %v8685_v32 = vld [vmem:[%s10476_s2 + $0x1a8] sm:$0xff]  }
 0x256   : > { %7966 = vmatpush3.bf16.msra.mxu0 %v8663_v28  ;;  %8085 = vmatprep.subr.bf16.mxu1 %v8666_v58  ;;  %v5825_v28 = vsel %vm2065_vm9, %v5823_v46, %v5824_v63  ;;  %v5954_v44 = vrot.slane %v5952_v11, 3 }
 0x257   : > { %7983 = vmatprep.subr.bf16.mxu0 %v8665_v14 }
 0x259   : > { %7968 = vmatmul.mubr.bf16.vlgmr.msra.gmra.mrb[52].mxu0 %v9582_v54  ;;  %8086 = vmatpush3.bf16.msra.mxu1 %v8666_v58  ;;  %v8671_v54 = vld [vmem:[%s10476_s2 + $0x58] sm:$0xff]  }
 0x25a   : > { %7971 = vmatprep.mubr.bf16.mxu0 %v9623_v19  ;;  %7984 = vmatpush3.bf16.msra.mxu0 %v8665_v14  ;;  %v8672_v19 = vld [vmem:[%s10476_s2 + $0x160] sm:$0xff]   ;;  %v8687_v58 = vld [vmem:[%s10476_s2 + $0x1b8] sm:$0xff]   ;;  %v5951_v14 = vrot.slane %v5949_v31, 2 }
 0x25b   : > { %7985 = vmatprep.subr.bf16.mxu0 %v8667_v22  ;;  %8087 = vmatprep.subr.bf16.mxu1 %v8668_v60 }
 0x25d   : > { %8088 = vmatpush3.bf16.msra.mxu1 %v8668_v60  ;;  %v5962_v60 = vrot.slane %v5960_v61, 3 }
 0x25e   : > { %7986 = vmatpush3.bf16.msra.mxu0 %v8667_v22  ;;  %8089 = vmatprep.subr.bf16.mxu1 %v8670_v33  ;;  %v5959_v22 = vrot.slane %v5957_v50, 2 }
 0x25f   : > { %7987 = vmatprep.subr.bf16.mxu0 %v8669_v47 }
 0x261   : > { %7972 = vmatmul.mubr.bf16.gmra.mrb[56].mxu0 %v9626_v8  ;;  %8090 = vmatpush3.bf16.msra.mxu1 %v8670_v33  ;;  %v8676_v8 = vld [vmem:[%s10476_s2 + $0x170] sm:$0xff]   ;;  %v8688_v33 = vld [vmem:[%s10476_s2 + $0x1c0] sm:$0xff]  }
 0x262   : > { %7975 = vmatprep.mubr.bf16.mxu0 %v9665_v12  ;;  %7988 = vmatpush3.bf16.msra.mxu0 %v8669_v47  ;;  %v8675_v12 = vld [vmem:[%s10476_s2 + $0x68] sm:$0xff]   ;;  %v5826_v47 = vrot.slane %v5803_v21, 2 }
 0x263   : > { %7989 = vmatprep.subr.bf16.mxu0 %v8671_v54  ;;  %8091 = vmatprep.subr.bf16.mxu1 %v8672_v19 }
 0x265   : > { %8092 = vmatpush3.bf16.msra.mxu1 %v8672_v19  ;;  %v10308_v19 = vor.u32 %v5962_v60, %v5959_v22 }
 0x266   : > { %7990 = vmatpush3.bf16.msra.mxu0 %v8671_v54  ;;  %8093 = vmatprep.subr.bf16.mxu1 %v8674_v2  ;;  %v5955_v54 = vor.u32 %v5954_v44, %v5951_v14 }
 0x267   : > { %7991 = vmatprep.subr.bf16.mxu0 %v8673_v36 }
 0x268   : > { %v5964_v7 = vsel %vm2491_vm11, %v5955_v54, %v10308_v19 }
 0x269   : > { %7976 = vmatmul.mubr.bf16.gmra.mrb[60].mxu0 %v4813_v15  ;;  %8094 = vmatpush3.bf16.msra.mxu1 %v8674_v2  ;;  %v8689_v2 = vld [vmem:[%s10476_s2 + $0x1c8] sm:$0xff]   ;;  %v10328_v15 = vld [vmem:[#allocation2 + $0xa0] sm:$0x7] }
 0x26a   : > { %7979 = vmatprep.mubr.bf16.mxu0 %v4815_v4  ;;  %7992 = vmatpush3.bf16.msra.mxu0 %v8673_v36  ;;  %v5827_v36 = vsel %vm2065_vm9, %v5824_v63, %v5826_v47  ;;  %v8694_v4 = vld [vmem:[%s10476_s2 + $0x1f0] sm:$0xff]   ;;  %v5966_v1 = vshrl.u32 %v10328_v15, 16  ;;  %v5969_v52 = vshll.u32 %v10328_v15, 16 }
 0x26b   : > { %7993 = vmatprep.subr.bf16.mxu0 %v8675_v12  ;;  %8095 = vmatprep.subr.bf16.mxu1 %v8676_v8 }
 0x26d   : > { %8096 = vmatpush3.bf16.msra.mxu1 %v8676_v8  ;;  %v8692_v8 = vld [vmem:[%s10476_s2 + $0x1e0] sm:$0xff]  }
 0x26e   : > { %7994 = vmatpush3.bf16.msra.mxu0 %v8675_v12  ;;  %8097 = vmatprep.subr.bf16.mxu1 %v8678_v56  ;;  %v8691_v12 = vld [vmem:[%s10476_s2 + $0x1d8] sm:$0xff]  }
 0x26f   : > { %7995 = vmatprep.subr.bf16.mxu0 %v8677_v20 }
 0x271   : > { %7980 = vmatmul.mubr.bf16.gmra.mrb[64].mxu0 %v4817_v51  ;;  %8098 = vmatpush3.bf16.msra.mxu1 %v8678_v56  ;;  %v10337_v56 = vld [vmem:[%s10477_s3] ss:$0 sm:$0xff] }
 0x272   : > { %7996 = vmatpush3.bf16.msra.mxu0 %v8677_v20  ;;  %7999 = vmatprep.mubr.bf16.mxu0 %v5065_v5 }
 0x273   : > { %7997 = vmatprep.subr.bf16.mxu0 %v8679_v55  ;;  %8103 = vmatprep.subr.bf16.mxu1 %v8680_v42 }
 0x274   : > { %8100 = vmatmul.mubr.bf16.vlgmr.msra.gmra.mrb[16].mxu1 %v5697_v18 }
 0x275   : > { %8104 = vmatpush3.bf16.msra.mxu1 %v8680_v42  ;;  %8119 = vmatprep.mubr.bf16.mxu1 %v5825_v28  ;;  %v8696_v28 = vld [vmem:[%s10476_s2 + $0x200] sm:$0xff]  }
 0x276   : > { %7998 = vmatpush3.bf16.msra.mxu0 %v8679_v55  ;;  %8105 = vmatprep.subr.bf16.mxu1 %v8681_v37 }
 0x279   : > { %8000 = vmatmul.mubr.bf16.vlgmr.msra.gmra.mrb[68].mxu0 %v5073_v43  ;;  %8106 = vmatpush3.bf16.msra.mxu1 %v8681_v37  ;;  %v5968_v37 = vrot.slane %v5966_v1, 2 }
 0x27a   : > { %8107 = vmatprep.subr.bf16.mxu1 %v8682_v13 }
 0x27d   : > { %8108 = vmatpush3.bf16.msra.mxu1 %v8682_v13 }
 0x27e   : > { %8109 = vmatprep.subr.bf16.mxu1 %v8683_v29 }
 0x281   : > { %8110 = vmatpush3.bf16.msra.mxu1 %v8683_v29 }
 0x282   : > { %8111 = vmatprep.subr.bf16.mxu1 %v8684_v24 }
 0x285   : > { %8112 = vmatpush3.bf16.msra.mxu1 %v8684_v24  ;;  %v6097_v24 = vrot.slane %v10259_v38, 3 }
 0x286   : > { %8113 = vmatprep.subr.bf16.mxu1 %v8685_v32 }
 0x289   : > { %8114 = vmatpush3.bf16.msra.mxu1 %v8685_v32 }
 0x28a   : > { %8115 = vmatprep.subr.bf16.mxu1 %v8686_v6 }
 0x28d   : > { %8116 = vmatpush3.bf16.msra.mxu1 %v8686_v6 }
 0x28e   : > { %8117 = vmatprep.subr.bf16.mxu1 %v8687_v58 }
 0x291   : > { %8118 = vmatpush3.bf16.msra.mxu1 %v8687_v58 }
 0x292   : > { %8123 = vmatprep.subr.bf16.mxu1 %v8688_v33 }
 0x294   : > { %8120 = vmatmul.mubr.bf16.vlgmr.msra.gmra.mrb[16].mxu1 %v5827_v36  ;;  %v8699_v36 = vld [vmem:[%s10476_s2 + $0x218] sm:$0xff]  }
 0x295   : > { %8124 = vmatpush3.bf16.msra.mxu1 %v8688_v33  ;;  %8139 = vmatprep.mubr.bf16.mxu1 %v5964_v7 }
 0x296   : > { %8125 = vmatprep.subr.bf16.mxu1 %v8689_v2 }
 0x299   : > { %8126 = vmatpush3.bf16.msra.mxu1 %v8689_v2 }
 0x29a   : > { %8127 = vmatprep.subr.bf16.mxu1 %v8690_v25 }
 0x29d   : > { %8128 = vmatpush3.bf16.msra.mxu1 %v8690_v25 }
 0x29e   : > { %8129 = vmatprep.subr.bf16.mxu1 %v8691_v12 }
 0x2a1   : > { %8130 = vmatpush3.bf16.msra.mxu1 %v8691_v12 }
 0x2a2   : > { %8131 = vmatprep.subr.bf16.mxu1 %v8692_v8 }
 0x2a5   : > { %8132 = vmatpush3.bf16.msra.mxu1 %v8692_v8 }
 0x2a6   : > { %8133 = vmatprep.subr.bf16.mxu1 %v8693_v9 }
 0x2a7   : > { %v7681_v20 = vpop.f32.mrb[0].mxu1 }
 0x2a8   : > { %v8163_v62 = vadd.f32 %v7681_v20, %v9996_v49  ;;  %v2869_v55 = vpop.f32.mrb[1].mxu1  ;;  %v8695_v49 = vld [vmem:[%s10476_s2 + $0x1f8] sm:$0xff]  }
 0x2a9   : > { %v8164_v35 = vadd.f32 %v2869_v55, %v10001_v23  ;;  %8134 = vmatpush3.bf16.msra.mxu1 %v8693_v9  ;;  %v7682_v42 = vpop.f32.mrb[2].mxu1  ;;  %v5971_v23 = vrot.slane %v5969_v52, 3 }
 0x2aa   : > { %v2956_v30 = vadd.f32 %v8163_v62, %v10337_v56  ;;  %v8165_v51 = vadd.f32 %v7682_v42, %v10008_v26  ;;  %v2872_v46 = vpop.f32.mrb[3].mxu1  ;;  %8135 = vmatprep.subr.bf16.mxu1 %v8694_v4  ;;  %v6077_v26 = vld [vmem:[#allocation2 + $0x90] sm:$0xf8]  ;;  %v8701_v62 = vld [vmem:[%s10476_s2 + $0x228] sm:$0xff]   ;;  %v6099_v42 = vrot.slane %v10328_v15, 3 }
 0x2ab   : > { %v2954_v63 = vadd.f32 %v8164_v35, %v10337_v56  ;;  %v8166_v5 = vadd.f32 %v2872_v46, %v10010_v45  ;;  %v5972_v13 = vor.u32 %v5971_v23, %v5968_v37  ;;  %v6096_v29 = vrot.slane %v6077_v26, 3 }
 0x2ac   : > { %2972 = vst [vmem:[%s10345_s23 + $0x10] sm:$0xff] %v2956_v30  ;;  %v2957_v18 = vadd.f32 %v8165_v51, %v10337_v56  ;;  %v6100_v30 = vsel %vm2761_vm10, %v6097_v24, %v6099_v42 }
 0x2ad   : > { %2970 = vst [vmem:[%s10345_s23] sm:$0xff] %v2954_v63  ;;  %v2955_v27 = vadd.f32 %v8166_v5, %v10337_v56  ;;  %8136 = vmatpush3.bf16.msra.mxu1 %v8694_v4 }
 0x2ae   : > { %2973 = vst [vmem:[%s10345_s23 + $0x18] sm:$0xff] %v2957_v18  ;;  %8137 = vmatprep.subr.bf16.mxu1 %v8695_v49 }
 0x2af   : > { %2971 = vst [vmem:[%s10345_s23 + $0x8] sm:$0xff] %v2955_v27  ;;  %v7685_v34 = vpop.f32.mrb[4].mxu1 }
 0x2b0   : > { %v8167_v45 = vadd.f32 %v7685_v34, %v10034_v10  ;;  %v2885_v43 = vpop.f32.mrb[5].mxu1  ;;  %v8697_v10 = vld [vmem:[%s10476_s2 + $0x208] sm:$0xff]  }
 0x2b1   : > { %v8168_v32 = vadd.f32 %v2885_v43, %v10039_v3  ;;  %8138 = vmatpush3.bf16.msra.mxu1 %v8695_v49  ;;  %v7686_v6 = vpop.f32.mrb[6].mxu1  ;;  %v5973_v3 = vsel %vm2491_vm11, %v10308_v19, %v5972_v13 }
 0x2b2   : > { %v2960_v31 = vadd.f32 %v8167_v45, %v10337_v56  ;;  %v8169_v11 = vadd.f32 %v7686_v6, %v10041_v48  ;;  %v2888_v50 = vpop.f32.mrb[7].mxu1  ;;  %8143 = vmatprep.subr.bf16.mxu1 %v8696_v28  ;;  %v6098_v48 = vsel %vm2761_vm10, %v6096_v29, %v6097_v24 }
 0x2b3   : > { %v2958_v61 = vadd.f32 %v8168_v32, %v10337_v56  ;;  %v8170_v58 = vadd.f32 %v2888_v50, %v10043_v59  ;;  %v8698_v59 = vld [vmem:[%s10476_s2 + $0x210] sm:$0xff]  }
 0x2b4   : > { %2976 = vst [vmem:[%s10345_s23 + $0x30] sm:$0xff] %v2960_v31  ;;  %v2961_v21 = vadd.f32 %v8169_v11, %v10337_v56  ;;  %8140 = vmatmul.mubr.bf16.vlgmr.msra.gmra.mrb[16].mxu1 %v5973_v3 }
 0x2b5   : > { %2974 = vst [vmem:[%s10345_s23 + $0x20] sm:$0xff] %v2958_v61  ;;  %v2959_v14 = vadd.f32 %v8170_v58, %v10337_v56  ;;  %8144 = vmatpush3.bf16.msra.mxu1 %v8696_v28  ;;  %8159 = vmatprep.mubr.bf16.mxu1 %v6098_v48 }
 0x2b6   : > { %2977 = vst [vmem:[%s10345_s23 + $0x38] sm:$0xff] %v2961_v21  ;;  %8145 = vmatprep.subr.bf16.mxu1 %v8697_v10 }
 0x2b7   : > { %2975 = vst [vmem:[%s10345_s23 + $0x28] sm:$0xff] %v2959_v14  ;;  %v7689_v44 = vpop.f32.mrb[8].mxu1 }
 0x2b8   : > { %v8171_v22 = vadd.f32 %v7689_v44, %v10059_v39  ;;  %v2901_v60 = vpop.f32.mrb[9].mxu1 }
 0x2b9   : > { %v8172_v33 = vadd.f32 %v2901_v60, %v10061_v16  ;;  %8146 = vmatpush3.bf16.msra.mxu1 %v8697_v10  ;;  %v7690_v47 = vpop.f32.mrb[10].mxu1 }
 0x2ba   : > { %v2964_v54 = vadd.f32 %v8171_v22, %v10337_v56  ;;  %v8173_v19 = vadd.f32 %v7690_v47, %v10063_v17  ;;  %v2904_v2 = vpop.f32.mrb[11].mxu1  ;;  %8147 = vmatprep.subr.bf16.mxu1 %v8698_v59  ;;  %v8700_v17 = vld [vmem:[%s10476_s2 + $0x220] sm:$0xff]  }
 0x2bb   : > { %v2962_v7 = vadd.f32 %v8172_v33, %v10337_v56  ;;  %v8174_v39 = vadd.f32 %v2904_v2, %v10065_v0 }
 0x2bc   : > { %2980 = vst [vmem:[%s10345_s23 + $0x50] sm:$0xff] %v2964_v54  ;;  %v2965_v16 = vadd.f32 %v8173_v19, %v10337_v56 }
 0x2bd   : > { %2978 = vst [vmem:[%s10345_s23 + $0x40] sm:$0xff] %v2962_v7  ;;  %v2963_v25 = vadd.f32 %v8174_v39, %v10337_v56  ;;  %8148 = vmatpush3.bf16.msra.mxu1 %v8698_v59 }
 0x2be   : > { %2981 = vst [vmem:[%s10345_s23 + $0x58] sm:$0xff] %v2965_v16  ;;  %8149 = vmatprep.subr.bf16.mxu1 %v8699_v36 }
 0x2bf   : > { %2979 = vst [vmem:[%s10345_s23 + $0x48] sm:$0xff] %v2963_v25  ;;  %v7693_v12 = vpop.f32.mrb[12].mxu1 }
 0x2c0   : > { %v8175_v8 = vadd.f32 %v7693_v12, %v10081_v41  ;;  %v2917_v0 = vpop.f32.mrb[13].mxu1 }
 0x2c1   : > { %v8176_v9 = vadd.f32 %v2917_v0, %v10083_v57  ;;  %8150 = vmatpush3.bf16.msra.mxu1 %v8699_v36  ;;  %v7694_v4 = vpop.f32.mrb[14].mxu1 }
 0x2c2   : > { %v2968_v20 = vadd.f32 %v8175_v8, %v10337_v56  ;;  %v8177_v1 = vadd.f32 %v7694_v4, %v10088_v53  ;;  %v2920_v52 = vpop.f32.mrb[15].mxu1  ;;  %8151 = vmatprep.subr.bf16.mxu1 %v8700_v17  ;;  %v8702_v53 = vld [vmem:[%s10476_s2 + $0x230] sm:$0xff]  }
 0x2c3   : > { %v2966_v55 = vadd.f32 %v8176_v9, %v10337_v56  ;;  %v8178_v41 = vadd.f32 %v2920_v52, %v10090_v40  ;;  %v8703_v40 = vld [vmem:[%s10476_s2 + $0x238] sm:$0xff]  }
 0x2c4   : > { %2984 = vst [vmem:[%s10345_s23 + $0x70] sm:$0xff] %v2968_v20  ;;  %v2969_v57 = vadd.f32 %v8177_v1, %v10337_v56 }
 0x2c5   : > { %2982 = vst [vmem:[%s10345_s23 + $0x60] sm:$0xff] %v2966_v55  ;;  %v2967_v35 = vadd.f32 %v8178_v41, %v10337_v56  ;;  %8152 = vmatpush3.bf16.msra.mxu1 %v8700_v17 }
 0x2c6   : > { %2985 = vst [vmem:[%s10345_s23 + $0x78] sm:$0xff] %v2969_v57  ;;  %8153 = vmatprep.subr.bf16.mxu1 %v8701_v62 }
 0x2c7   : > { %2983 = vst [vmem:[%s10345_s23 + $0x68] sm:$0xff] %v2967_v35 }
 0x2c9   : > { %8154 = vmatpush3.bf16.msra.mxu1 %v8701_v62 }
 0x2ca   : > { %8155 = vmatprep.subr.bf16.mxu1 %v8702_v53 }
 0x2cd   : > { %8156 = vmatpush3.bf16.msra.mxu1 %v8702_v53 }
 0x2ce   : > { %8157 = vmatprep.subr.bf16.mxu1 %v8703_v40 }
 0x2d1   : > { %8158 = vmatpush3.bf16.msra.mxu1 %v8703_v40 }
 0x2d4   : > { %8160 = vmatmul.mubr.bf16.vlgmr.msra.gmra.mrb[16].mxu1 %v6100_v30 }
 0x32c   : > { %v7969_v51 = vpop.f32.mrb[52].mxu0 }
 0x32d   : > { %v4989_v46 = vadd.f32 %v7969_v51, %v10337_v56  ;;  %v4908_v49 = vpop.f32.mrb[53].mxu0 }
 0x32e   : > { %v4987_v63 = vadd.f32 %v10337_v56, %v4908_v49  ;;  %v7970_v5 = vpop.f32.mrb[54].mxu0 }
 0x32f   : > { %5005 = vst [vmem:[%s10345_s23 + $0x90] sm:$0xff] %v4989_v46  ;;  %v4990_v37 = vadd.f32 %v7970_v5, %v10337_v56  ;;  %v4911_v15 = vpop.f32.mrb[55].mxu0 }
 0x330   : > { %5003 = vst [vmem:[%s10345_s23 + $0x80] sm:$0xff] %v4987_v63  ;;  %v4988_v38 = vadd.f32 %v10337_v56, %v4911_v15 }
 0x331   : > { %5006 = vst [vmem:[%s10345_s23 + $0x98] sm:$0xff] %v4990_v37 }
 0x332   : > { %5004 = vst [vmem:[%s10345_s23 + $0x88] sm:$0xff] %v4988_v38 }
 0x334   : > { %v7973_v23 = vpop.f32.mrb[56].mxu0 }
 0x335   : > { %v4993_v18 = vadd.f32 %v7973_v23, %v10337_v56  ;;  %v4924_v27 = vpop.f32.mrb[57].mxu0 }
 0x336   : > { %v4991_v26 = vadd.f32 %v10337_v56, %v4924_v27  ;;  %v7974_v28 = vpop.f32.mrb[58].mxu0 }
 0x337   : > { %5009 = vst [vmem:[%s10345_s23 + $0xb0] sm:$0xff] %v4993_v18  ;;  %v4994_v34 = vadd.f32 %v7974_v28, %v10337_v56  ;;  %v4927_v13 = vpop.f32.mrb[59].mxu0 }
 0x338   : > { %5007 = vst [vmem:[%s10345_s23 + $0xa0] sm:$0xff] %v4991_v26  ;;  %v4992_v45 = vadd.f32 %v10337_v56, %v4927_v13 }
 0x339   : > { %5010 = vst [vmem:[%s10345_s23 + $0xb8] sm:$0xff] %v4994_v34 }
 0x33a   : > { %5008 = vst [vmem:[%s10345_s23 + $0xa8] sm:$0xff] %v4992_v45 }
 0x33c   : > { %v7977_v43 = vpop.f32.mrb[60].mxu0 }
 0x33d   : > { %v4997_v29 = vadd.f32 %v7977_v43, %v10337_v56  ;;  %v4940_v24 = vpop.f32.mrb[61].mxu0 }
 0x33e   : > { %v4995_v32 = vadd.f32 %v10337_v56, %v4940_v24  ;;  %v7978_v6 = vpop.f32.mrb[62].mxu0 }
 0x33f   : > { %5013 = vst [vmem:[%s10345_s23 + $0xd0] sm:$0xff] %v4997_v29  ;;  %v4998_v31 = vadd.f32 %v7978_v6, %v10337_v56  ;;  %v4943_v11 = vpop.f32.mrb[63].mxu0 }
 0x340   : > { %5011 = vst [vmem:[%s10345_s23 + $0xc0] sm:$0xff] %v4995_v32  ;;  %v4996_v50 = vadd.f32 %v10337_v56, %v4943_v11 }
 0x341   : > { %5014 = vst [vmem:[%s10345_s23 + $0xd8] sm:$0xff] %v4998_v31 }
 0x342   : > { %5012 = vst [vmem:[%s10345_s23 + $0xc8] sm:$0xff] %v4996_v50 }
 0x344   : > { %v7981_v10 = vpop.f32.mrb[64].mxu0 }
 0x345   : > { %v5001_v61 = vadd.f32 %v7981_v10, %v10337_v56  ;;  %v4956_v58 = vpop.f32.mrb[65].mxu0 }
 0x346   : > { %v4999_v3 = vadd.f32 %v10337_v56, %v4956_v58  ;;  %v7982_v21 = vpop.f32.mrb[66].mxu0 }
 0x347   : > { %5017 = vst [vmem:[%s10345_s23 + $0xf0] sm:$0xff] %v5001_v61  ;;  %v5002_v48 = vadd.f32 %v7982_v21, %v10337_v56  ;;  %v4959_v14 = vpop.f32.mrb[67].mxu0 }
 0x348   : > { %5015 = vst [vmem:[%s10345_s23 + $0xe0] sm:$0xff] %v4999_v3  ;;  %v5000_v59 = vadd.f32 %v10337_v56, %v4959_v14 }
 0x349   : > { %5018 = vst [vmem:[%s10345_s23 + $0xf8] sm:$0xff] %v5002_v48 }
 0x34a   : > { %5016 = vst [vmem:[%s10345_s23 + $0xe8] sm:$0xff] %v5000_v59 }
 0x34c   : > { %v8001_v44 = vpop.f32.mrb[68].mxu0 }
 0x34d   : > { %v5158_v22 = vpop.f32.mrb[69].mxu0 }
 0x34e   : > { %v8002_v60 = vpop.f32.mrb[70].mxu0 }
 0x34f   : > { %v5161_v33 = vpop.f32.mrb[71].mxu0 }
 0x3a7   : > { %v8161_v47 = vpop.f32.mrb[16].mxu1 }
 0x3a8   : > { %v8179_v54 = vadd.f32 %v8161_v47, %v8001_v44  ;;  %v6185_v19 = vpop.f32.mrb[17].mxu1 }
 0x3a9   : > { %v8180_v2 = vadd.f32 %v6185_v19, %v5158_v22  ;;  %v8162_v36 = vpop.f32.mrb[18].mxu1 }
 0x3aa   : > { %v6206_v7 = vadd.f32 %v8179_v54, %v10337_v56  ;;  %v8181_v39 = vadd.f32 %v8162_v36, %v8002_v60  ;;  %v6188_v16 = vpop.f32.mrb[19].mxu1 }
 0x3ab   : > { %v6204_v25 = vadd.f32 %v8180_v2, %v10337_v56  ;;  %v8182_v17 = vadd.f32 %v6188_v16, %v5161_v33 }
 0x3ac   : > { %6210 = vst [vmem:[%s10345_s23 + $0x110] sm:$0xff] %v6206_v7  ;;  %v6207_v12 = vadd.f32 %v8181_v39, %v10337_v56 }
 0x3ad   : > { %6208 = vst [vmem:[%s10345_s23 + $0x100] sm:$0xff] %v6204_v25  ;;  %v6205_v8 = vadd.f32 %v8182_v17, %v10337_v56 }
 0x3ae   : > { %6211 = vst [vmem:[%s10345_s23 + $0x118] sm:$0xff] %v6207_v12 }
 0x3af   : > { %6209 = vst [vmem:[%s10345_s23 + $0x108] sm:$0xff] %v6205_v8 }
 0x3b0 PF: > { %s14_s15 = sadd.s32 1, %s8713_s15  }
 0x3b1   : > { %p11_p4 = scmp.ge.s32.totalorder %s14_s15, 4  }
 0x3b3   :  { %13 = sbr.rel (!%p11_p4) target bundleno = 1 (0x1), region = 74 }

</bundles_post_ra>
